<compile_context>
chip_gen: v7x
topology: tpu7x:2x2x1
jax: 0.10.0
libtpu: 0.0.40
codegen_flags: <defaults>
</compile_context>

<pallas_src>
import functools

import jax
import jax.numpy as jnp
from jax.experimental import pallas as pl
from jax.experimental.pallas import tpu as pltpu


# ----------------------------- kernel -------------------------------------- #

def _fused_self_attention_kernel(x_ref, wq_ref, bq_ref, wkv_ref, bkv_ref,
                                 seg_ref, o_ref, qt_scr, kv_scr,
                                 *, compute_dtype, exp_dtype, approx_recip):
    """Grid = (batch, split, q_tile).  One batch's x block stays resident
    across the q sweep; K/V(+ones) and Q^T are projected once per (batch,
    split) into VMEM scratch (recompute per split keeps megacore q-splitting
    correct; the projections are tiny vs. the attention matmuls)."""
    C = wq_ref.shape[0]
    HW = x_ref.shape[2]
    Tq = o_ref.shape[2]
    qi = pl.program_id(2)
    # global q-tile index with the parallel split axis folded in.
    g = pl.program_id(1) * pl.num_programs(2) + qi

    # ---- per (batch, split): 1x1-conv projections, off the per-tile path ----
    @pl.when(qi == 0)
    def _():
        xf = x_ref[0]                                                 # [C, HW]
        # K and V in one fused [2C, C] x [C, HW] matmul (+ bias), f32 accum,
        # rounded once into compute_dtype scratch.
        kv = (jnp.dot(wkv_ref[...], xf, preferred_element_type=jnp.float32)
              + bkv_ref[...])                                         # [2C, HW]
        kv_scr[0:2 * C, :] = kv.astype(kv_scr.dtype)
        # Constant ones row fused below the V rows: the PV matmul then also
        # produces the softmax row-sums for free.
        kv_scr[pl.ds(2 * C, 1), :] = jnp.ones((1, HW), kv_scr.dtype)
        # Q produced directly in query-major [HW, C] layout, so QK^T needs no
        # runtime transpose of a [C, HW] tile.
        qt = (jax.lax.dot_general(xf, wq_ref[...], (((0,), (1,)), ((), ())),
                                  preferred_element_type=jnp.float32)
              + bq_ref[...])                                          # [HW, C]
        qt_scr[...] = qt.astype(qt_scr.dtype)

    # ---- per query tile ----
    start = pl.multiple_of(g * Tq, Tq)
    q_t = qt_scr[pl.ds(start, Tq), :]                                 # [Tq, C]
    k = kv_scr[0:C, :]                                                # [C, HW]
    v1 = kv_scr[pl.ds(C, C + 1), :]                                   # [C+1, HW] = V ; ones

    # scores[p, j] = sum_c q[c, p] * k[c, j]   (no 1/sqrt(C): matches module)
    s = jax.lax.dot_general(q_t, k, (((1,), (0,)), ((), ())),
                            preferred_element_type=jnp.float32)       # [Tq, HW]

    # softmax over keys; normalization deferred past the PV matmul.
    m = jnp.max(s, axis=-1, keepdims=True)                            # [Tq, 1]
    p = jnp.exp((s - m).astype(exp_dtype))                            # [Tq, HW]
    if jnp.dtype(exp_dtype) != jnp.dtype(compute_dtype):
        p_c = p.astype(compute_dtype)
    else:
        p_c = p

    # Single MXU pass: rows 0..C-1 are V @ P^T, row C is the P row-sums.
    out_l = jax.lax.dot_general(v1, p_c, (((1,), (1,)), ((), ())),
                                preferred_element_type=jnp.float32)   # [C+1, Tq]
    l_row = out_l[C:C + 1, :]                                         # [1, Tq]
    out = out_l[0:C, :] * pl.reciprocal(l_row, approx=approx_recip)   # [C, Tq]

    # residual add against the matching x slice.
    x_res = x_ref[0, :, pl.ds(start, Tq)]                             # [C, Tq]
    z = out + x_res.astype(jnp.float32)

    # Final softmax over W-pixel segments of the lane axis, done lane-dense
    # with two tiny matmuls against the 0/1 segment matrix (segment-sum + its
    # broadcast back).  Subtracting the per-row max instead of the per-segment
    # max is mathematically identical (softmax shift invariance); it is only a
    # numerical concern if a segment sits ~>80 (f32) below the row max, which
    # does not happen at typical activation scales.  Exact reciprocal here
    # (tiny: C x Tq/W values) so output rows sum to 1.
    zm = jnp.max(z, axis=-1, keepdims=True)                           # [C, 1]
    e = jnp.exp(z - zm)                                               # [C, Tq]
    seg = seg_ref[...]                                                # [Tq, Tq//W]
    seg_sum = jnp.dot(e, seg, preferred_element_type=jnp.float32)     # [C, Tq//W]
    denom = jax.lax.dot_general(pl.reciprocal(seg_sum, approx=False), seg,
                                (((1,), (1,)), ((), ())),
                                preferred_element_type=jnp.float32)   # [C, Tq]
    o_ref[0] = (e * denom).astype(o_ref.dtype)


# ----------------------------- wrapper helpers ------------------------------ #

def _round_up(v, m):
    return -(-v // m) * m


def _tile_bytes(rows, cols, dtype):
    """VMEM footprint of a [rows, cols] buffer incl. sublane/lane padding."""
    isz = jnp.dtype(dtype).itemsize
    sub = max(8 * 4 // isz, 8)           # f32: 8, bf16: 16 sublane packing
    return _round_up(max(rows, 1), sub) * _round_up(max(cols, 1), 128) * isz


def _vmem_capacity_bytes():
    """Physical VMEM per TensorCore (v5e/v6e: 128 MiB, v7x: 64 MiB)."""
    try:
        cap = int(getattr(pltpu.get_tpu_info(), "vmem_capacity_bytes", 0))
        if cap > 0:
            return cap
    except Exception:
        pass
    return 64 * 2 ** 20                  # conservative fallback (v7x per-core)


def _default_exp_dtype(compute_dtype):
    """Low-precision exp only where the EUP is bf16-capable (v6e / v7x)."""
    if jnp.dtype(compute_dtype) == jnp.dtype(jnp.float32):
        return jnp.float32
    try:
        kind = jax.devices()[0].device_kind.lower()
    except Exception:
        kind = ""
    if any(tag in kind for tag in ("v6", "v7", "tpu7")):
        return compute_dtype
    return jnp.float32                   # v5e and older: f32 EUP only


def _pick_query_tile(HW, W, target):
    """Largest q-tile <= target that divides HW and is a multiple of W (so the
    final W-softmax segments never straddle tiles), preferring 256-lane
    alignment (v6e/v7x MXU N-dim), then 128; else the full pixel axis."""
    divisors = [t for t in range(W, HW + 1, W) if HW % t == 0]
    for align in (256, 128):
        cands = [t for t in divisors if t <= target and t % align == 0]
        if cands:
            return max(cands)
    return HW


def _estimate_vmem_bytes(C, HW, Tq, nh_t, x_dtype, compute_dtype, exp_dtype,
                         single_buffer_params):
    """Padded per-core VMEM estimate for the chosen tiling."""
    nbuf_p = 1 if single_buffer_params else 2
    est = 0
    est += 2 * _tile_bytes(C, HW, x_dtype)                 # x block (double buf)
    est += 2 * _tile_bytes(C, Tq, x_dtype)                 # out block
    est += nbuf_p * (_tile_bytes(C, C, jnp.float32)        # wq
                     + _tile_bytes(1, C, jnp.float32)      # bq
                     + _tile_bytes(2 * C, C, jnp.float32)  # wkv
                     + _tile_bytes(2 * C, 1, jnp.float32)  # bkv
                     + _tile_bytes(Tq, nh_t, jnp.float32)) # seg
    est += _tile_bytes(HW, C, compute_dtype)               # qt scratch (lane-padded)
    est += _tile_bytes(2 * C + 1, HW, compute_dtype)       # K ; V ; ones scratch
    est += _tile_bytes(Tq, HW, jnp.float32)                # scores
    est += _tile_bytes(Tq, HW, exp_dtype)                  # exp tile
    est += 4 * _tile_bytes(C + 1, Tq, jnp.float32)         # out/residual/exp/denom
    return est


# ----------------------------- wrapper -------------------------------------- #

def self_attention_pallas(x, wq, bq, wk, bk, wv, bv, *,
                          q_tile_target=512,
                          compute_dtype=jnp.bfloat16,
                          approx_recip=None):
    B, C, H, W = x.shape
    HW = H * W
    if approx_recip is None:
        # approximate (EUP) reciprocal only on the low-precision path, and only
        # for the deferred attention normalization (final softmax stays exact).
        approx_recip = (jnp.dtype(compute_dtype) != jnp.dtype(jnp.float32))

    cap = _vmem_capacity_bytes()

    # Generation-aware q-tile: shrink the target if the padded estimate would
    # exceed half of this chip's VMEM (keeps full double-buffering on v7x).
    targets = [t for t in sorted({q_tile_target, 256, 128}, reverse=True)
               if t <= q_tile_target] or [q_tile_target]
    Tq = HW
    for tgt in targets:
        Tq = _pick_query_tile(HW, W, tgt)
        est0 = _estimate_vmem_bytes(C, HW, Tq, Tq // W, x.dtype, compute_dtype,
                                    jnp.float32, False)
        if est0 <= cap // 2:
            break
    nh_t = Tq // W
    nq = HW // Tq

    # Odd batch counts (esp. B=1) under-fill a 2-TensorCore chip if only the
    # batch axis is parallel: split the q axis in two parallel halves.
    nsplit = 2 if (B % 2 == 1 and nq >= 2 and nq % 2 == 0) else 1
    nq_split = nq // nsplit

    x2d = x.reshape(B, C, HW)                          # free metadata reshape
    wkv = jnp.concatenate([wk, wv], axis=0)            # [2C, C] fused K/V weight
    bkv = jnp.concatenate([bk, bv], axis=0).reshape(2 * C, 1)
    bq_row = bq.reshape(1, C)
    # 0/1 segment matrix for the softmax-over-W (same for every q tile).
    seg = (jnp.arange(Tq)[:, None] // W
           == jnp.arange(nh_t)[None, :]).astype(jnp.float32)          # [Tq, nh_t]

    def _run(single_buffer_params, exp_dtype):
        est = _estimate_vmem_bytes(C, HW, Tq, nh_t, x.dtype, compute_dtype,
                                   exp_dtype, single_buffer_params)
        # Cap at ~85% of the *queried* physical VMEM (64 MiB on v7x).
        vmem_limit = int(min(max(int(1.5 * est), 32 * 2 ** 20),
                             int(0.85 * cap)))

        kernel = functools.partial(_fused_self_attention_kernel,
                                   compute_dtype=compute_dtype,
                                   exp_dtype=exp_dtype,
                                   approx_recip=approx_recip)

        def const_spec(shape):
            # Grid-invariant operands: a single pipeline buffer is enough.
            idx = lambda b, s, q: (0,) * len(shape)
            if single_buffer_params:
                return pl.BlockSpec(shape, idx, pipeline_mode=pl.Buffered(1))
            return pl.BlockSpec(shape, idx)

        grid_spec = pltpu.PrefetchScalarGridSpec(
            num_scalar_prefetch=0,
            grid=(B, nsplit, nq_split),
            in_specs=[
                pl.BlockSpec((1, C, HW), lambda b, s, q: (b, 0, 0)),   # x
                const_spec((C, C)),                                    # Wq
                const_spec((1, C)),                                    # bq (row)
                const_spec((2 * C, C)),                                # W_kv
                const_spec((2 * C, 1)),                                # b_kv
                const_spec((Tq, nh_t)),                                # seg matrix
            ],
            out_specs=pl.BlockSpec(
                (1, C, Tq), lambda b, s, q: (b, 0, s * nq_split + q)),
            scratch_shapes=[
                pltpu.VMEM((HW, C), compute_dtype),         # Q^T (query-major)
                pltpu.VMEM((2 * C + 1, HW), compute_dtype), # K ; V ; ones
            ],
        )
        return pl.pallas_call(
            kernel,
            out_shape=jax.ShapeDtypeStruct((B, C, HW), x.dtype),
            grid_spec=grid_spec,
            compiler_params=pltpu.CompilerParams(
                dimension_semantics=("parallel", "parallel", "arbitrary"),
                vmem_limit_bytes=vmem_limit),
        )(x2d, wq, bq_row, wkv, bkv, seg)

    exp_dtype = _default_exp_dtype(compute_dtype)
    try:
        y2d = jax.block_until_ready(_run(True, exp_dtype))
    except Exception:
        # Graceful degradation for Pallas builds that reject single-buffered
        # pipeline_mode (or bf16 exp): same fused kernel, conservative config.
        y2d = _run(False, jnp.float32)

    return y2d.reshape(B, C, H, W)


# --------------------------- pure-JAX reference ----------------------------- #

def self_attention_ref(x, wq, bq, wk, bk, wv, bv):
    B, C, H, W = x.shape
    xf = x.reshape(B, C, H * W)
    q = jnp.einsum('oc,bcp->bop', wq, xf) + bq[None, :, None]
    k = jnp.einsum('oc,bcp->bop', wk, xf) + bk[None, :, None]
    v = jnp.einsum('oc,bcp->bop', wv, xf) + bv[None, :, None]
    attn = jnp.einsum('bcp,bcq->bpq', q, k)          # q.permute(0,2,1) @ k
    attn = jax.nn.softmax(attn, axis=-1)
    out = jnp.einsum('bcq,bpq->bcp', v, attn)        # v @ attn.permute(0,2,1)
    out = (out + xf).reshape(B, C, H, W)
    return jax.nn.softmax(out, axis=-1)              # softmax over W


# --------------------------------- main -------------------------------------- #

if __name__ == "__main__":
    B, C, H, W = 2, 4, 16, 16
    key = jax.random.PRNGKey(0)
    kx, kwq, kbq, kwk, kbk, kwv, kbv = jax.random.split(key, 7)

    x = jax.random.normal(kx, (B, C, H, W), dtype=jnp.float32)
    # Deterministic synthetic Conv2d(C, C, 1) parameters (PyTorch-like scale).
    bound = 1.0 / jnp.sqrt(jnp.float32(C))
    wq = jax.random.uniform(kwq, (C, C), jnp.float32, -bound, bound)
    bq = jax.random.uniform(kbq, (C,), jnp.float32, -bound, bound)
    wk = jax.random.uniform(kwk, (C, C), jnp.float32, -bound, bound)
    bk = jax.random.uniform(kbk, (C,), jnp.float32, -bound, bound)
    wv = jax.random.uniform(kwv, (C, C), jnp.float32, -bound, bound)
    bv = jax.random.uniform(kbv, (C,), jnp.float32, -bound, bound)

    ref = self_attention_ref(x, wq, bq, wk, bk, wv, bv)

    # Exact path: f32 MXU inputs + exact reciprocals -> tight tolerance.
    out_f32 = self_attention_pallas(x, wq, bq, wk, bk, wv, bv,
                                    compute_dtype=jnp.float32)
    out_f32 = jax.block_until_ready(out_f32)
    assert out_f32.shape == (B, C, H, W)
    assert jnp.allclose(out_f32, ref, rtol=1e-5, atol=1e-5), \
        "f32 path mismatch vs reference"

    # Optimized path: bf16 MXU inputs (f32 accumulation), bf16 scratch,
    # bf16 exp on v6e/v7x, approx reciprocal for the attention normalization.
    out_bf16 = self_attention_pallas(x, wq, bq, wk, bk, wv, bv)
    out_bf16 = jax.block_until_ready(out_bf16)
    assert out_bf16.shape == (B, C, H, W)
    assert jnp.allclose(out_bf16, ref, rtol=5e-2, atol=5e-2), \
        "bf16 path mismatch vs reference"

    print("KERNEL_OK")
</pallas_src>

<mosaic_0001>
module attributes {stable_mosaic.version = 11 : i64} {
  func.func @_fused_self_attention_kernel(%arg0: i32, %arg1: i32, %arg2: i32, %arg3: memref<1x4x256xf32, #tpu.memory_space<vmem>>, %arg4: memref<4x4xf32, #tpu.memory_space<vmem>>, %arg5: memref<1x4xf32, #tpu.memory_space<vmem>>, %arg6: memref<8x4xf32, #tpu.memory_space<vmem>>, %arg7: memref<8x1xf32, #tpu.memory_space<vmem>>, %arg8: memref<256x16xf32, #tpu.memory_space<vmem>>, %arg9: memref<1x4x256xf32, #tpu.memory_space<vmem>>, %arg10: memref<256x4xf32, #tpu.memory_space<vmem>>, %arg11: memref<9x256xf32, #tpu.memory_space<vmem>>) attributes {dimension_semantics = [#tpu.dimension_semantics<parallel>, #tpu.dimension_semantics<parallel>, #tpu.dimension_semantics<arbitrary>], iteration_bounds = array<i64: 2, 1, 1>, scalar_prefetch = 0 : i64, scratch_operands = 2 : i64, tpu.core_type = #tpu.core_type<tc>, window_params = [{transform_indices = @transform_0, window_bounds = array<i64: 1, 4, 256>}, {pipeline_mode = #tpu.pipeline_mode<synchronous>, transform_indices = @transform_1, window_bounds = array<i64: 4, 4>}, {pipeline_mode = #tpu.pipeline_mode<synchronous>, transform_indices = @transform_2, window_bounds = array<i64: 1, 4>}, {pipeline_mode = #tpu.pipeline_mode<synchronous>, transform_indices = @transform_3, window_bounds = array<i64: 8, 4>}, {pipeline_mode = #tpu.pipeline_mode<synchronous>, transform_indices = @transform_4, window_bounds = array<i64: 8, 1>}, {pipeline_mode = #tpu.pipeline_mode<synchronous>, transform_indices = @transform_5, window_bounds = array<i64: 256, 16>}, {transform_indices = @transform_6, window_bounds = array<i64: 1, 4, 256>}]} {
    %c1_i32 = arith.constant 1 : i32
    %0 = arith.muli %arg1, %c1_i32 : i32
    %1 = arith.addi %0, %arg2 : i32
    %c0_i32 = arith.constant 0 : i32
    %2 = arith.cmpi eq, %arg2, %c0_i32 : i32
    %3 = arith.extui %2 : i1 to i32
    %c0_i32_0 = arith.constant 0 : i32
    %4 = arith.cmpi ne, %3, %c0_i32_0 : i32
    scf.if %4 {
      %c0_16 = arith.constant 0 : index
      %c0_17 = arith.constant 0 : index
      %c0_18 = arith.constant 0 : index
      %40 = vector.load %arg3[%c0_16, %c0_17, %c0_18] : memref<1x4x256xf32, #tpu.memory_space<vmem>>, vector<1x4x256xf32>
      %41 = vector.shape_cast %40 : vector<1x4x256xf32> to vector<4x256xf32>
      %c0_19 = arith.constant 0 : index
      %c0_20 = arith.constant 0 : index
      %42 = vector.load %arg6[%c0_19, %c0_20] : memref<8x4xf32, #tpu.memory_space<vmem>>, vector<8x4xf32>
      %cst_21 = arith.constant dense<0.000000e+00> : vector<8x256xf32>
      %43 = tpu.matmul %42, %41, %cst_21 {dimension_numbers = #tpu.dot_dimension_numbers<[1], [0], [0], [1], [0, 0, 1, 1], [], []>} : vector<8x4xf32>, vector<4x256xf32>, vector<8x256xf32> -> vector<8x256xf32>
      %c0_22 = arith.constant 0 : index
      %c0_23 = arith.constant 0 : index
      %44 = vector.load %arg7[%c0_22, %c0_23] : memref<8x1xf32, #tpu.memory_space<vmem>>, vector<8x1xf32>
      %45 = vector.broadcast %44 : vector<8x1xf32> to vector<8x256xf32>
      %46 = arith.addf %43, %45 : vector<8x256xf32>
      %c0_24 = arith.constant 0 : index
      %c0_25 = arith.constant 0 : index
      %47 = vector.load %arg11[%c0_24, %c0_25] : memref<9x256xf32, #tpu.memory_space<vmem>>, vector<8x256xf32>
      tpu.vector_store %arg11[%c0_24, %c0_25], %46 {strides = array<i32>} : memref<9x256xf32, #tpu.memory_space<vmem>>, vector<8x256xf32>,
      %cst_26 = arith.constant 1.000000e+00 : f32
      %48 = vector.broadcast %cst_26 : f32 to vector<1x256xf32>
      %c8 = arith.constant 8 : index
      %c0_27 = arith.constant 0 : index
      %49 = vector.load %arg11[%c8, %c0_27] : memref<9x256xf32, #tpu.memory_space<vmem>>, vector<1x256xf32>
      tpu.vector_store %arg11[%c8, %c0_27], %48 {strides = array<i32>} : memref<9x256xf32, #tpu.memory_space<vmem>>, vector<1x256xf32>,
      %c0_28 = arith.constant 0 : index
      %c0_29 = arith.constant 0 : index
      %50 = vector.load %arg4[%c0_28, %c0_29] : memref<4x4xf32, #tpu.memory_space<vmem>>, vector<4x4xf32>
      %cst_30 = arith.constant dense<0.000000e+00> : vector<256x4xf32>
      %51 = tpu.matmul %41, %50, %cst_30 {dimension_numbers = #tpu.dot_dimension_numbers<[0], [1], [1], [0], [0, 1, 1, 0], [], []>} : vector<4x256xf32>, vector<4x4xf32>, vector<256x4xf32> -> vector<256x4xf32>
      %c0_31 = arith.constant 0 : index
      %c0_32 = arith.constant 0 : index
      %52 = vector.load %arg5[%c0_31, %c0_32] : memref<1x4xf32, #tpu.memory_space<vmem>>, vector<1x4xf32>
      %53 = vector.broadcast %52 : vector<1x4xf32> to vector<256x4xf32>
      %54 = arith.addf %51, %53 : vector<256x4xf32>
      %c0_33 = arith.constant 0 : index
      %c0_34 = arith.constant 0 : index
      %55 = vector.load %arg10[%c0_33, %c0_34] : memref<256x4xf32, #tpu.memory_space<vmem>>, vector<256x4xf32>
      tpu.vector_store %arg10[%c0_33, %c0_34], %54 {strides = array<i32>} : memref<256x4xf32, #tpu.memory_space<vmem>>, vector<256x4xf32>,
    } else {
    }
    %c256_i32 = arith.constant 256 : i32
    %5 = arith.muli %1, %c256_i32 : i32
    %6 = tpu.assume_multiple %5, 256 : i32
    %7 = arith.index_cast %6 : i32 to index
    %c0 = arith.constant 0 : index
    %8 = vector.load %arg10[%7, %c0] : memref<256x4xf32, #tpu.memory_space<vmem>>, vector<256x4xf32>
    %c0_1 = arith.constant 0 : index
    %c0_2 = arith.constant 0 : index
    %9 = vector.load %arg11[%c0_1, %c0_2] : memref<9x256xf32, #tpu.memory_space<vmem>>, vector<4x256xf32>
    %c4 = arith.constant 4 : index
    %c0_3 = arith.constant 0 : index
    %10 = vector.load %arg11[%c4, %c0_3] : memref<9x256xf32, #tpu.memory_space<vmem>>, vector<5x256xf32>
    %cst = arith.constant dense<0.000000e+00> : vector<256x256xf32>
    %11 = tpu.matmul %8, %9, %cst {dimension_numbers = #tpu.dot_dimension_numbers<[1], [0], [0], [1], [0, 0, 1, 1], [], []>} : vector<256x4xf32>, vector<4x256xf32>, vector<256x256xf32> -> vector<256x256xf32>
    %cst_4 = arith.constant dense<0xFF800000> : vector<256xf32>
    %12 = vector.multi_reduction <maximumf>, %11, %cst_4 [1] : vector<256x256xf32> to vector<256xf32>
    %13 = vector.shape_cast %12 : vector<256xf32> to vector<256x1xf32>
    %14 = vector.broadcast %13 : vector<256x1xf32> to vector<256x256xf32>
    %15 = arith.subf %11, %14 : vector<256x256xf32>
    %16 = math.exp %15 : vector<256x256xf32>
    %cst_5 = arith.constant dense<0.000000e+00> : vector<5x256xf32>
    %17 = tpu.matmul %10, %16, %cst_5 {dimension_numbers = #tpu.dot_dimension_numbers<[1], [1], [0], [0], [0, 0, 1, 0], [], []>} : vector<5x256xf32>, vector<256x256xf32>, vector<5x256xf32> -> vector<5x256xf32>
    %18 = vector.extract_strided_slice %17 {offsets = [4, 0], sizes = [1, 256], strides = [1, 1]} : vector<5x256xf32> to vector<1x256xf32>
    %19 = vector.extract_strided_slice %17 {offsets = [0, 0], sizes = [4, 256], strides = [1, 1]} : vector<5x256xf32> to vector<4x256xf32>
    %20 = tpu.reciprocal %18 : vector<1x256xf32> -> vector<1x256xf32>
    %21 = vector.broadcast %20 : vector<1x256xf32> to vector<4x256xf32>
    %22 = arith.mulf %19, %21 : vector<4x256xf32>
    %c0_6 = arith.constant 0 : index
    %c0_7 = arith.constant 0 : index
    %23 = arith.index_cast %6 : i32 to index
    %24 = vector.load %arg3[%c0_6, %c0_7, %23] : memref<1x4x256xf32, #tpu.memory_space<vmem>>, vector<1x4x256xf32>
    %25 = vector.shape_cast %24 : vector<1x4x256xf32> to vector<4x256xf32>
    %26 = arith.addf %22, %25 : vector<4x256xf32>
    %cst_8 = arith.constant dense<0xFF800000> : vector<4xf32>
    %27 = vector.multi_reduction <maximumf>, %26, %cst_8 [1] : vector<4x256xf32> to vector<4xf32>
    %28 = vector.shape_cast %27 : vector<4xf32> to vector<4x1xf32>
    %29 = vector.broadcast %28 : vector<4x1xf32> to vector<4x256xf32>
    %30 = arith.subf %26, %29 : vector<4x256xf32>
    %31 = math.exp %30 : vector<4x256xf32>
    %c0_9 = arith.constant 0 : index
    %c0_10 = arith.constant 0 : index
    %32 = vector.load %arg8[%c0_9, %c0_10] : memref<256x16xf32, #tpu.memory_space<vmem>>, vector<256x16xf32>
    %cst_11 = arith.constant dense<0.000000e+00> : vector<4x16xf32>
    %33 = tpu.matmul %31, %32, %cst_11 {dimension_numbers = #tpu.dot_dimension_numbers<[1], [0], [0], [1], [0, 0, 1, 1], [], []>} : vector<4x256xf32>, vector<256x16xf32>, vector<4x16xf32> -> vector<4x16xf32>
    %34 = tpu.reciprocal %33 : vector<4x16xf32> -> vector<4x16xf32>
    %cst_12 = arith.constant dense<0.000000e+00> : vector<4x256xf32>
    %35 = tpu.matmul %34, %32, %cst_12 {dimension_numbers = #tpu.dot_dimension_numbers<[1], [1], [0], [0], [0, 0, 1, 0], [], []>} : vector<4x16xf32>, vector<256x16xf32>, vector<4x256xf32> -> vector<4x256xf32>
    %36 = arith.mulf %31, %35 : vector<4x256xf32>
    %c0_13 = arith.constant 0 : index
    %c0_14 = arith.constant 0 : index
    %c0_15 = arith.constant 0 : index
    %37 = vector.load %arg9[%c0_13, %c0_14, %c0_15] : memref<1x4x256xf32, #tpu.memory_space<vmem>>, vector<1x4x256xf32>
    %38 = vector.shape_cast %37 : vector<1x4x256xf32> to vector<4x256xf32>
    %39 = vector.shape_cast %36 : vector<4x256xf32> to vector<1x4x256xf32>
    tpu.vector_store %arg9[%c0_13, %c0_14, %c0_15], %39 {strides = array<i32>} : memref<1x4x256xf32, #tpu.memory_space<vmem>>, vector<1x4x256xf32>,
    return
  }
  func.func @transform_0(%arg0: i32, %arg1: i32, %arg2: i32) -> (i32, i32, i32) {
    %c0_i32 = arith.constant 0 : i32
    %c0_i32_0 = arith.constant 0 : i32
    %c0_i32_1 = arith.constant 0 : i32
    return %arg0, %c0_i32, %c0_i32_0 : i32, i32, i32
  }
  func.func @transform_1(%arg0: i32, %arg1: i32, %arg2: i32) -> (i32, i32) {
    %c0_i32 = arith.constant 0 : i32
    %c0_i32_0 = arith.constant 0 : i32
    %c0_i32_1 = arith.constant 0 : i32
    return %c0_i32, %c0_i32_0 : i32, i32
  }
  func.func @transform_2(%arg0: i32, %arg1: i32, %arg2: i32) -> (i32, i32) {
    %c0_i32 = arith.constant 0 : i32
    %c0_i32_0 = arith.constant 0 : i32
    %c0_i32_1 = arith.constant 0 : i32
    return %c0_i32, %c0_i32_0 : i32, i32
  }
  func.func @transform_3(%arg0: i32, %arg1: i32, %arg2: i32) -> (i32, i32) {
    %c0_i32 = arith.constant 0 : i32
    %c0_i32_0 = arith.constant 0 : i32
    %c0_i32_1 = arith.constant 0 : i32
    return %c0_i32, %c0_i32_0 : i32, i32
  }
  func.func @transform_4(%arg0: i32, %arg1: i32, %arg2: i32) -> (i32, i32) {
    %c0_i32 = arith.constant 0 : i32
    %c0_i32_0 = arith.constant 0 : i32
    %c0_i32_1 = arith.constant 0 : i32
    return %c0_i32, %c0_i32_0 : i32, i32
  }
  func.func @transform_5(%arg0: i32, %arg1: i32, %arg2: i32) -> (i32, i32) {
    %c0_i32 = arith.constant 0 : i32
    %c0_i32_0 = arith.constant 0 : i32
    %c0_i32_1 = arith.constant 0 : i32
    return %c0_i32, %c0_i32_0 : i32, i32
  }
  func.func @transform_6(%arg0: i32, %arg1: i32, %arg2: i32) -> (i32, i32, i32) {
    %c1_i32 = arith.constant 1 : i32
    %0 = arith.muli %arg1, %c1_i32 : i32
    %1 = arith.addi %0, %arg2 : i32
    %c0_i32 = arith.constant 0 : i32
    %c0_i32_0 = arith.constant 0 : i32
    return %arg0, %c0_i32, %1 : i32, i32, i32
  }
}

module attributes {stable_mosaic.version = 11 : i64} {
  func.func @_fused_self_attention_kernel(%arg0: i32, %arg1: i32, %arg2: i32, %arg3: memref<1x4x256xf32, #tpu.memory_space<vmem>>, %arg4: memref<4x4xf32, #tpu.memory_space<vmem>>, %arg5: memref<1x4xf32, #tpu.memory_space<vmem>>, %arg6: memref<8x4xf32, #tpu.memory_space<vmem>>, %arg7: memref<8x1xf32, #tpu.memory_space<vmem>>, %arg8: memref<256x16xf32, #tpu.memory_space<vmem>>, %arg9: memref<1x4x256xf32, #tpu.memory_space<vmem>>, %arg10: memref<256x4xf32, #tpu.memory_space<vmem>>, %arg11: memref<9x256xf32, #tpu.memory_space<vmem>>) attributes {dimension_semantics = [#tpu.dimension_semantics<parallel>, #tpu.dimension_semantics<parallel>, #tpu.dimension_semantics<arbitrary>], iteration_bounds = array<i64: 2, 1, 1>, scalar_prefetch = 0 : i64, scratch_operands = 2 : i64, tpu.core_type = #tpu.core_type<tc>, window_params = [{transform_indices = @transform_0, window_bounds = array<i64: 1, 4, 256>}, {pipeline_mode = #tpu.pipeline_mode<synchronous>, transform_indices = @transform_1, window_bounds = array<i64: 4, 4>}, {pipeline_mode = #tpu.pipeline_mode<synchronous>, transform_indices = @transform_2, window_bounds = array<i64: 1, 4>}, {pipeline_mode = #tpu.pipeline_mode<synchronous>, transform_indices = @transform_3, window_bounds = array<i64: 8, 4>}, {pipeline_mode = #tpu.pipeline_mode<synchronous>, transform_indices = @transform_4, window_bounds = array<i64: 8, 1>}, {pipeline_mode = #tpu.pipeline_mode<synchronous>, transform_indices = @transform_5, window_bounds = array<i64: 256, 16>}, {transform_indices = @transform_6, window_bounds = array<i64: 1, 4, 256>}]} {
    %c1_i32 = arith.constant 1 : i32
    %0 = arith.muli %arg1, %c1_i32 : i32
    %1 = arith.addi %0, %arg2 : i32
    %c0_i32 = arith.constant 0 : i32
    %2 = arith.cmpi eq, %arg2, %c0_i32 : i32
    %3 = arith.extui %2 : i1 to i32
    %c0_i32_0 = arith.constant 0 : i32
    %4 = arith.cmpi ne, %3, %c0_i32_0 : i32
    scf.if %4 {
      %c0_16 = arith.constant 0 : index
      %c0_17 = arith.constant 0 : index
      %c0_18 = arith.constant 0 : index
      %40 = vector.load %arg3[%c0_16, %c0_17, %c0_18] : memref<1x4x256xf32, #tpu.memory_space<vmem>>, vector<1x4x256xf32>
      %41 = vector.shape_cast %40 : vector<1x4x256xf32> to vector<4x256xf32>
      %c0_19 = arith.constant 0 : index
      %c0_20 = arith.constant 0 : index
      %42 = vector.load %arg6[%c0_19, %c0_20] : memref<8x4xf32, #tpu.memory_space<vmem>>, vector<8x4xf32>
      %cst_21 = arith.constant dense<0.000000e+00> : vector<8x256xf32>
      %43 = tpu.matmul %42, %41, %cst_21 {dimension_numbers = #tpu.dot_dimension_numbers<[1], [0], [0], [1], [0, 0, 1, 1], [], []>} : vector<8x4xf32>, vector<4x256xf32>, vector<8x256xf32> -> vector<8x256xf32>
      %c0_22 = arith.constant 0 : index
      %c0_23 = arith.constant 0 : index
      %44 = vector.load %arg7[%c0_22, %c0_23] : memref<8x1xf32, #tpu.memory_space<vmem>>, vector<8x1xf32>
      %45 = vector.broadcast %44 : vector<8x1xf32> to vector<8x256xf32>
      %46 = arith.addf %43, %45 : vector<8x256xf32>
      %c0_24 = arith.constant 0 : index
      %c0_25 = arith.constant 0 : index
      %47 = vector.load %arg11[%c0_24, %c0_25] : memref<9x256xf32, #tpu.memory_space<vmem>>, vector<8x256xf32>
      tpu.vector_store %arg11[%c0_24, %c0_25], %46 {strides = array<i32>} : memref<9x256xf32, #tpu.memory_space<vmem>>, vector<8x256xf32>,
      %cst_26 = arith.constant 1.000000e+00 : f32
      %48 = vector.broadcast %cst_26 : f32 to vector<1x256xf32>
      %c8 = arith.constant 8 : index
      %c0_27 = arith.constant 0 : index
      %49 = vector.load %arg11[%c8, %c0_27] : memref<9x256xf32, #tpu.memory_space<vmem>>, vector<1x256xf32>
      tpu.vector_store %arg11[%c8, %c0_27], %48 {strides = array<i32>} : memref<9x256xf32, #tpu.memory_space<vmem>>, vector<1x256xf32>,
      %c0_28 = arith.constant 0 : index
      %c0_29 = arith.constant 0 : index
      %50 = vector.load %arg4[%c0_28, %c0_29] : memref<4x4xf32, #tpu.memory_space<vmem>>, vector<4x4xf32>
      %cst_30 = arith.constant dense<0.000000e+00> : vector<256x4xf32>
      %51 = tpu.matmul %41, %50, %cst_30 {dimension_numbers = #tpu.dot_dimension_numbers<[0], [1], [1], [0], [0, 1, 1, 0], [], []>} : vector<4x256xf32>, vector<4x4xf32>, vector<256x4xf32> -> vector<256x4xf32>
      %c0_31 = arith.constant 0 : index
      %c0_32 = arith.constant 0 : index
      %52 = vector.load %arg5[%c0_31, %c0_32] : memref<1x4xf32, #tpu.memory_space<vmem>>, vector<1x4xf32>
      %53 = vector.broadcast %52 : vector<1x4xf32> to vector<256x4xf32>
      %54 = arith.addf %51, %53 : vector<256x4xf32>
      %c0_33 = arith.constant 0 : index
      %c0_34 = arith.constant 0 : index
      %55 = vector.load %arg10[%c0_33, %c0_34] : memref<256x4xf32, #tpu.memory_space<vmem>>, vector<256x4xf32>
      tpu.vector_store %arg10[%c0_33, %c0_34], %54 {strides = array<i32>} : memref<256x4xf32, #tpu.memory_space<vmem>>, vector<256x4xf32>,
    } else {
    }
    %c256_i32 = arith.constant 256 : i32
    %5 = arith.muli %1, %c256_i32 : i32
    %6 = tpu.assume_multiple %5, 256 : i32
    %7 = arith.index_cast %6 : i32 to index
    %c0 = arith.constant 0 : index
    %8 = vector.load %arg10[%7, %c0] : memref<256x4xf32, #tpu.memory_space<vmem>>, vector<256x4xf32>
    %c0_1 = arith.constant 0 : index
    %c0_2 = arith.constant 0 : index
    %9 = vector.load %arg11[%c0_1, %c0_2] : memref<9x256xf32, #tpu.memory_space<vmem>>, vector<4x256xf32>
    %c4 = arith.constant 4 : index
    %c0_3 = arith.constant 0 : index
    %10 = vector.load %arg11[%c4, %c0_3] : memref<9x256xf32, #tpu.memory_space<vmem>>, vector<5x256xf32>
    %cst = arith.constant dense<0.000000e+00> : vector<256x256xf32>
    %11 = tpu.matmul %8, %9, %cst {dimension_numbers = #tpu.dot_dimension_numbers<[1], [0], [0], [1], [0, 0, 1, 1], [], []>} : vector<256x4xf32>, vector<4x256xf32>, vector<256x256xf32> -> vector<256x256xf32>
    %cst_4 = arith.constant dense<0xFF800000> : vector<256xf32>
    %12 = vector.multi_reduction <maximumf>, %11, %cst_4 [1] : vector<256x256xf32> to vector<256xf32>
    %13 = vector.shape_cast %12 : vector<256xf32> to vector<256x1xf32>
    %14 = vector.broadcast %13 : vector<256x1xf32> to vector<256x256xf32>
    %15 = arith.subf %11, %14 : vector<256x256xf32>
    %16 = math.exp %15 : vector<256x256xf32>
    %cst_5 = arith.constant dense<0.000000e+00> : vector<5x256xf32>
    %17 = tpu.matmul %10, %16, %cst_5 {dimension_numbers = #tpu.dot_dimension_numbers<[1], [1], [0], [0], [0, 0, 1, 0], [], []>} : vector<5x256xf32>, vector<256x256xf32>, vector<5x256xf32> -> vector<5x256xf32>
    %18 = vector.extract_strided_slice %17 {offsets = [4, 0], sizes = [1, 256], strides = [1, 1]} : vector<5x256xf32> to vector<1x256xf32>
    %19 = vector.extract_strided_slice %17 {offsets = [0, 0], sizes = [4, 256], strides = [1, 1]} : vector<5x256xf32> to vector<4x256xf32>
    %20 = tpu.reciprocal %18 : vector<1x256xf32> -> vector<1x256xf32>
    %21 = vector.broadcast %20 : vector<1x256xf32> to vector<4x256xf32>
    %22 = arith.mulf %19, %21 : vector<4x256xf32>
    %c0_6 = arith.constant 0 : index
    %c0_7 = arith.constant 0 : index
    %23 = arith.index_cast %6 : i32 to index
    %24 = vector.load %arg3[%c0_6, %c0_7, %23] : memref<1x4x256xf32, #tpu.memory_space<vmem>>, vector<1x4x256xf32>
    %25 = vector.shape_cast %24 : vector<1x4x256xf32> to vector<4x256xf32>
    %26 = arith.addf %22, %25 : vector<4x256xf32>
    %cst_8 = arith.constant dense<0xFF800000> : vector<4xf32>
    %27 = vector.multi_reduction <maximumf>, %26, %cst_8 [1] : vector<4x256xf32> to vector<4xf32>
    %28 = vector.shape_cast %27 : vector<4xf32> to vector<4x1xf32>
    %29 = vector.broadcast %28 : vector<4x1xf32> to vector<4x256xf32>
    %30 = arith.subf %26, %29 : vector<4x256xf32>
    %31 = math.exp %30 : vector<4x256xf32>
    %c0_9 = arith.constant 0 : index
    %c0_10 = arith.constant 0 : index
    %32 = vector.load %arg8[%c0_9, %c0_10] : memref<256x16xf32, #tpu.memory_space<vmem>>, vector<256x16xf32>
    %cst_11 = arith.constant dense<0.000000e+00> : vector<4x16xf32>
    %33 = tpu.matmul %31, %32, %cst_11 {dimension_numbers = #tpu.dot_dimension_numbers<[1], [0], [0], [1], [0, 0, 1, 1], [], []>} : vector<4x256xf32>, vector<256x16xf32>, vector<4x16xf32> -> vector<4x16xf32>
    %34 = tpu.reciprocal %33 : vector<4x16xf32> -> vector<4x16xf32>
    %cst_12 = arith.constant dense<0.000000e+00> : vector<4x256xf32>
    %35 = tpu.matmul %34, %32, %cst_12 {dimension_numbers = #tpu.dot_dimension_numbers<[1], [1], [0], [0], [0, 0, 1, 0], [], []>} : vector<4x16xf32>, vector<256x16xf32>, vector<4x256xf32> -> vector<4x256xf32>
    %36 = arith.mulf %31, %35 : vector<4x256xf32>
    %c0_13 = arith.constant 0 : index
    %c0_14 = arith.constant 0 : index
    %c0_15 = arith.constant 0 : index
    %37 = vector.load %arg9[%c0_13, %c0_14, %c0_15] : memref<1x4x256xf32, #tpu.memory_space<vmem>>, vector<1x4x256xf32>
    %38 = vector.shape_cast %37 : vector<1x4x256xf32> to vector<4x256xf32>
    %39 = vector.shape_cast %36 : vector<4x256xf32> to vector<1x4x256xf32>
    tpu.vector_store %arg9[%c0_13, %c0_14, %c0_15], %39 {strides = array<i32>} : memref<1x4x256xf32, #tpu.memory_space<vmem>>, vector<1x4x256xf32>,
    return
  }
  func.func @transform_0(%arg0: i32, %arg1: i32, %arg2: i32) -> (i32, i32, i32) {
    %c0_i32 = arith.constant 0 : i32
    %c0_i32_0 = arith.constant 0 : i32
    %c0_i32_1 = arith.constant 0 : i32
    return %arg0, %c0_i32, %c0_i32_0 : i32, i32, i32
  }
  func.func @transform_1(%arg0: i32, %arg1: i32, %arg2: i32) -> (i32, i32) {
    %c0_i32 = arith.constant 0 : i32
    %c0_i32_0 = arith.constant 0 : i32
    %c0_i32_1 = arith.constant 0 : i32
    return %c0_i32, %c0_i32_0 : i32, i32
  }
  func.func @transform_2(%arg0: i32, %arg1: i32, %arg2: i32) -> (i32, i32) {
    %c0_i32 = arith.constant 0 : i32
    %c0_i32_0 = arith.constant 0 : i32
    %c0_i32_1 = arith.constant 0 : i32
    return %c0_i32, %c0_i32_0 : i32, i32
  }
  func.func @transform_3(%arg0: i32, %arg1: i32, %arg2: i32) -> (i32, i32) {
    %c0_i32 = arith.constant 0 : i32
    %c0_i32_0 = arith.constant 0 : i32
    %c0_i32_1 = arith.constant 0 : i32
    return %c0_i32, %c0_i32_0 : i32, i32
  }
  func.func @transform_4(%arg0: i32, %arg1: i32, %arg2: i32) -> (i32, i32) {
    %c0_i32 = arith.constant 0 : i32
    %c0_i32_0 = arith.constant 0 : i32
    %c0_i32_1 = arith.constant 0 : i32
    return %c0_i32, %c0_i32_0 : i32, i32
  }
  func.func @transform_5(%arg0: i32, %arg1: i32, %arg2: i32) -> (i32, i32) {
    %c0_i32 = arith.constant 0 : i32
    %c0_i32_0 = arith.constant 0 : i32
    %c0_i32_1 = arith.constant 0 : i32
    return %c0_i32, %c0_i32_0 : i32, i32
  }
  func.func @transform_6(%arg0: i32, %arg1: i32, %arg2: i32) -> (i32, i32, i32) {
    %c1_i32 = arith.constant 1 : i32
    %0 = arith.muli %arg1, %c1_i32 : i32
    %1 = arith.addi %0, %arg2 : i32
    %c0_i32 = arith.constant 0 : i32
    %c0_i32_0 = arith.constant 0 : i32
    return %arg0, %c0_i32, %1 : i32, i32, i32
  }
}

</mosaic_0001>

<bundles_post_ra>
// kernel: tpu_custom_call.1
= control target key start
LH: loop header
LB: loop body
LE: loop exit
PB: predicated region body
PF: predicated region fallthrough
CT: control target
= control target key end

     0   :  { %11 = vsyncpa [#allocation5], 0  ;;  %s3469_s0 = inlined_call_operand.vmem [shape: f32[2,4,256], index: 0, kind: input, shape index: {}]   ;;  %s3470_s1 = inlined_call_operand.vmem [shape: f32[4,4], index: 1, kind: input, shape index: {}]   ;;  %s3471_s2 = inlined_call_operand.vmem [shape: f32[1,4], index: 2, kind: input, shape index: {}]   ;;  %s3472_s3 = inlined_call_operand.vmem [shape: f32[8,4], index: 3, kind: input, shape index: {}]   ;;  %s3473_s4 = inlined_call_operand.vmem [shape: f32[8,1], index: 4, kind: input, shape index: {}]   ;;  %s3474_s5 = inlined_call_operand.vmem [shape: f32[256,16], index: 5, kind: input, shape index: {}]   ;;  %s3475_s6 = inlined_call_operand.hbm [shape: f32[2,4,256], index: 6, kind: output, shape index: {}]  }
   0x1   :  { %13 = vsyncpa [#allocation5 + $0x1], 0  ;;  %s2725_s21 = smov 0   ;;  %s2727_s22 = smov 0  }
   0x2   :  { %s2729_s23 = smov 0   ;;  %s2731_s24 = smov 0  }
   0x3   :  { %s2733_s25 = smov 0   ;;  %s2735_s26 = smov 0  }
   0x4 LB: > { %s1991_s27 = sadd.s32 4294967295, %s2684_s26   ;;  %s1992_s28 = sadd.s32 4294967294, %s2684_s26   ;;  %s2684_s26 = sphi %s2735_s26, %s19_s26   ;;  %s2680_s25 = sphi %s2733_s25, %s3525_s25   ;;  %s2676_s24 = sphi %s2731_s24, %s3524_s24   ;;  %s2672_s23 = sphi %s2729_s23, %s3523_s23   ;;  %s2668_s22 = sphi %s2727_s22, %s3522_s22   ;;  %s2664_s21 = sphi %s2725_s21, %s3521_s21  }
   0x5   : > { %s38_s29 = sadd.s32 1, %s2680_s25  ;;  %s180_s30 = sadd.s32 1, %s2672_s23 }
   0x6   : > { %p40_p0 = scmp.ge.s32.totalorder %s38_s29, 2  ;;  %p190_p1 = scmp.ne.s32.totalorder %s2672_s23, %s2668_s22 }
   0x7   : > { %p191_p2 = scmp.eq.s32.totalorder %s1991_s27, 1  ;;  %p196_p3 = scmp.ne.s32.totalorder %s2668_s22, %s2664_s21 }
   0x8   : > { %s3527_s29 = smov (%p40_p0, %s38_s29), 0  ;;  %p197_p5 = scmp.eq.s32.totalorder %s1992_s28, 1 }
   0x9   : > { %p2765_p4 = por %p191_p2, %p190_p1  ;;  %s175_s8 = ssub.s32 %s2680_s25, %s3527_s29 }
   0xa   : > { %p1995_p6 = scmp.ge.s32.totalorder %s2684_s26, 1  ;;  %p178_p7 = scmp.eq.s32.totalorder %s175_s8, 0 }
   0xb   : > { %p2772_p8 = por %p197_p5, %p196_p3  ;;  %p238_p9 = scmp.lt.s32.totalorder %s2684_s26, 3 }
   0xc   : > { %s2778_s10 = scalar_select %p178_p7, %s2672_s23, %s180_s30  }
   0xd   : > { %p239_p10 = pnand %p1995_p6, %p238_p9 }
   0xf   : > { %242 = sbr.rel (%p239_p10) target bundleno = 1742 (0x6ce), region = 44 }
  0x16   : > { %p268_p11 = scmp.lt.s32.totalorder %s2676_s24, 1  ;;  %v2686_v0 = vmov 0.0   ;;  %vm290_vm0 = vcmask 31744   ;;  %vm294_vm1 = vcmask 1043456   ;;  %v379_v3 = vld [vmem:[%s3470_s1] sm:$0xf]  ;;  %v3476_v30 = vlaneseq }
  0x17   : > { %363 = vmatprep.mubr.f32.mxu0 %v2686_v0  ;;  %v281_v4 = vld [vmem:[%s3472_s3] sm:$0xff]  ;;  %2212 = vmatprep.subr.msk.mxu1 %vm290_vm0, %v379_v3  ;;  %v2687_v6 = vmov 0   ;;  %v2688_v36 = vmov 1.0   ;;  %vm1716_vm3 = vcmask 130048   ;;  %s265_s28 = sand.u32 1, %s2668_s22  }
  0x18   : > { %s269_s11 = scalar_select %p268_p11, %s2676_s24, 1  ;;  %2213 = vmatpush3.xpose.msk.msra.mxu1 %vm290_vm0, %v379_v3  ;;  %v282_v5 = vld [vmem:[%s3473_s4] sm:$0xff]  ;;  %2464 = vset.pattern.permute.xlu1 %v2687_v6  ;;  %vm374_vm2 = vcmp.lt.s32.totalorder %v3476_v30, 256  ;;  %vm3367_vm4 = vmpackc.low %vm1716_vm3, %vm1716_vm3 }
  0x19   : > { %285 = vperm.xlu1 %2464, %v282_v5   ;;  %377 = vst.msk [vmem:[#allocation3 + $0x10] ss:$8 sm:$0x3] %vm374_vm2, %v2688_v36  ;;  %v2842_v48 = vld [vmem:[%s3471_s2] ss:$0 sm:$0xff]  ;;  %s1996_s30 = sshll.u32 %s265_s28, 3 }
  0x1a   : > { %s2108_s12 = sshll.u32 %s269_s11, 3  ;;  %s267_s8 = scalar_lea.vmem [#allocation4], %s1996_s30 }
  0x1b   : > { %s2786_s15 = scalar_lea.vmem %s3469_s0, %s2108_s12  ;;  %s1912_s11 = sshll.u32 %s267_s8, 4  ;;  %s3424_s11 = int_to_ptr.vmem [resolvable:$true] %s1912_s11 }
  0x1c   : > { %v280_v1 = vld [vmem:[%s2786_s15] sm:$0xff]  ;;  %s1895_s16 = scalar_lea.sflag [#allocation5], %s265_s28  ;;  %s2606_s17 = scalar_lea.vmem %s3424_s11, 128 }
  0x1d   : > { %388 = vxpose.xlu0.b32.start.end [1/1] (short) %v280_v1, 128  ;;  %v289_v2 = vcombine.high %v280_v1, %v280_v1  ;;  %p2607_p12 = scmp.ne.s32.totalorder %s3424_s11, %s2606_s17 }
  0x1f   : > { %1999 = vmatprep.subr.msk.mxu0 %vm294_vm1, %v289_v2  ;;  %p2608_p13 = pnand %p2607_p12, %p2765_p4 }
  0x20   : > { %2000 = vmatpush1.msk.msra.mxu0 %vm294_vm1, %v280_v1 }
  0x21   : > { %2001 = vmatmul.mubr.msk.f32.vlgmr.msra.gmra.mrb[0].mxu0 %vm290_vm0, %v281_v4  ;;  %p2609_p0 = pneg %p2608_p13 }
  0x22   : > { %1016 = vmatprep.mubr.f32.mxu0 %v2686_v0 }
  0x5a   : > { %420 = vxpose.xlu0.b32.start.end [1/1] (short) %v289_v2, 128 }
  0x83   : > { %2465 = vset.pattern.permute.xlu0 %v2687_v6 }
  0x98   : > { %v286_v29 = vpop.permute.xlu1 %285 }
  0x9d   : > { %v404_v7 = vpop.trf.xlu0 }
  0x9e   : > { %2214 = vmatprep.mubr.msk.f32.mxu1 %vm290_vm0, %v404_v7 }
  0xa1   : > { %v405_v8 = vpop.trf.xlu0 }
  0xa2   : > { %2215 = vmatmul.mubr.msk.f32.vlgmr.msra.gmra.mrb[0].mxu1 %vm290_vm0, %v405_v8 }
  0xa5   : > { %v406_v9 = vpop.trf.xlu0 }
  0xa6   : > { %2217 = vmatprep.mubr.msk.f32.mxu1 %vm290_vm0, %v406_v9 }
  0xa9   : > { %v407_v10 = vpop.trf.xlu0 }
  0xaa   : > { %2218 = vmatmul.mubr.msk.f32.gmra.mrb[2].mxu1 %vm290_vm0, %v407_v10 }
  0xad   : > { %v408_v11 = vpop.trf.xlu0 }
  0xae   : > { %2220 = vmatprep.mubr.msk.f32.mxu1 %vm290_vm0, %v408_v11 }
  0xb1   : > { %v409_v12 = vpop.trf.xlu0 }
  0xb2   : > { %2221 = vmatmul.mubr.msk.f32.gmra.mrb[4].mxu1 %vm290_vm0, %v409_v12 }
  0xb5   : > { %v410_v13 = vpop.trf.xlu0 }
  0xb6   : > { %2223 = vmatprep.mubr.msk.f32.mxu1 %vm290_vm0, %v410_v13 }
  0xb9   : > { %v411_v14 = vpop.trf.xlu0 }
  0xba   : > { %2224 = vmatmul.mubr.msk.f32.gmra.mrb[6].mxu1 %vm290_vm0, %v411_v14 }
  0xbd   : > { %v412_v15 = vpop.trf.xlu0 }
  0xbe   : > { %2226 = vmatprep.mubr.msk.f32.mxu1 %vm290_vm0, %v412_v15 }
  0xc1   : > { %v413_v16 = vpop.trf.xlu0 }
  0xc2   : > { %2227 = vmatmul.mubr.msk.f32.gmra.mrb[8].mxu1 %vm290_vm0, %v413_v16 }
  0xc5   : > { %v414_v17 = vpop.trf.xlu0 }
  0xc6   : > { %2229 = vmatprep.mubr.msk.f32.mxu1 %vm290_vm0, %v414_v17 }
  0xc9   : > { %v415_v18 = vpop.trf.xlu0 }
  0xca   : > { %2230 = vmatmul.mubr.msk.f32.gmra.mrb[10].mxu1 %vm290_vm0, %v415_v18 }
  0xcd   : > { %v416_v19 = vpop.trf.xlu0 }
  0xce   : > { %2232 = vmatprep.mubr.msk.f32.mxu1 %vm290_vm0, %v416_v19 }
  0xd1   : > { %v417_v20 = vpop.trf.xlu0 }
  0xd2   : > { %2233 = vmatmul.mubr.msk.f32.gmra.mrb[12].mxu1 %vm290_vm0, %v417_v20 }
  0xd5   : > { %v418_v21 = vpop.trf.xlu0 }
  0xd6   : > { %2235 = vmatprep.mubr.msk.f32.mxu1 %vm290_vm0, %v418_v21 }
  0xd9   : > { %v419_v22 = vpop.trf.xlu0 }
  0xda   : > { %2236 = vmatmul.mubr.msk.f32.gmra.mrb[14].mxu1 %vm290_vm0, %v419_v22 }
  0xdd   : > { %v436_v23 = vpop.trf.xlu0 }
  0xde   : > { %2238 = vmatprep.mubr.msk.f32.mxu1 %vm290_vm0, %v436_v23 }
  0xe1   : > { %v437_v24 = vpop.trf.xlu0 }
  0xe2   : > { %2239 = vmatmul.mubr.msk.f32.gmra.mrb[16].mxu1 %vm290_vm0, %v437_v24 }
  0xe5   : > { %v438_v25 = vpop.trf.xlu0 }
  0xe6   : > { %2241 = vmatprep.mubr.msk.f32.mxu1 %vm290_vm0, %v438_v25 }
  0xe9   : > { %v439_v26 = vpop.trf.xlu0 }
  0xea   : > { %2242 = vmatmul.mubr.msk.f32.gmra.mrb[18].mxu1 %vm290_vm0, %v439_v26 }
  0xed   : > { %v440_v27 = vpop.trf.xlu0 }
  0xee   : > { %2244 = vmatprep.mubr.msk.f32.mxu1 %vm290_vm0, %v440_v27 }
  0xf1   : > { %v441_v28 = vpop.trf.xlu0 }
  0xf2   : > { %2245 = vmatmul.mubr.msk.f32.gmra.mrb[20].mxu1 %vm290_vm0, %v441_v28 }
  0xf4   : > { %v365_v31 = vpop.f32.mrb[0].mxu0 }
  0xf5   : > { %v442_v32 = vpop.trf.xlu0  ;;  %v366_v33 = vadd.f32 %v365_v31, %v286_v29  ;;  %v367_v34 = vpop.f32.mrb[1].mxu0 }
  0xf6   : > { %2247 = vmatprep.mubr.msk.f32.mxu1 %vm290_vm0, %v442_v32  ;;  %v368_v35 = vadd.f32 %v367_v34, %v286_v29 }
  0xf7   : > { %370 = vst [vmem:[#allocation3] sm:$0xff] %v366_v33 }
  0xf8   : > { %371 = vst [vmem:[#allocation3 + $0x8] sm:$0xff] %v368_v35 }
  0xf9   : > { %v443_v37 = vpop.trf.xlu0 }
  0xfa   : > { %2248 = vmatmul.mubr.msk.f32.gmra.mrb[22].mxu1 %vm290_vm0, %v443_v37 }
  0xfd   : > { %v444_v38 = vpop.trf.xlu0 }
  0xfe   : > { %2250 = vmatprep.mubr.msk.f32.mxu1 %vm290_vm0, %v444_v38  ;;  %v842_v39 = vld [vmem:[#allocation3] sm:$0xf] }
  0xff   : > { %v843_v40 = vld [vmem:[#allocation3 + $0x8] sm:$0xf] }
 0x100   : > { %2036 = vmatprep.subr.msk.mxu0 %vm294_vm1, %v843_v40 }
 0x101   : > { %v445_v41 = vpop.trf.xlu0  ;;  %2037 = vmatpush1.msk.msra.mxu0 %vm294_vm1, %v842_v39 }
 0x102   : > { %2251 = vmatmul.mubr.msk.f32.gmra.mrb[24].mxu1 %vm290_vm0, %v445_v41 }
 0x105   : > { %v446_v42 = vpop.trf.xlu0 }
 0x106   : > { %2253 = vmatprep.mubr.msk.f32.mxu1 %vm290_vm0, %v446_v42 }
 0x109   : > { %v447_v43 = vpop.trf.xlu0 }
 0x10a   : > { %2254 = vmatmul.mubr.msk.f32.gmra.mrb[26].mxu1 %vm290_vm0, %v447_v43 }
 0x10d   : > { %v448_v44 = vpop.trf.xlu0 }
 0x10e   : > { %2256 = vmatprep.mubr.msk.f32.mxu1 %vm290_vm0, %v448_v44 }
 0x111   : > { %v449_v45 = vpop.trf.xlu0 }
 0x112   : > { %2257 = vmatmul.mubr.msk.f32.gmra.mrb[28].mxu1 %vm290_vm0, %v449_v45 }
 0x115   : > { %v450_v46 = vpop.trf.xlu0 }
 0x116   : > { %2259 = vmatprep.mubr.msk.f32.mxu1 %vm290_vm0, %v450_v46 }
 0x119   : > { %v451_v47 = vpop.trf.xlu0 }
 0x11a   : > { %2260 = vmatmul.mubr.msk.f32.gmra.mrb[30].mxu1 %vm290_vm0, %v451_v47 }
 0x175   : > { %v2216_v49 = vpop.f32.mrb[0].mxu1 }
 0x176   : > { %v623_v50 = vadd.f32 %v2216_v49, %v2842_v48  ;;  %v617_v51 = vpop.f32.mrb[1].mxu1 }
 0x177   : > { %v618_v52 = vadd.f32 %v2842_v48, %v617_v51 }
 0x178   : > { %777 = vst.msk [vmem:[#allocation2 + $0x8] sm:$0xff] %vm290_vm0, %v623_v50 }
 0x179   : > { %776 = vst.msk [vmem:[#allocation2] sm:$0xff] %vm290_vm0, %v618_v52 }
 0x17d   : > { %v2219_v53 = vpop.f32.mrb[2].mxu1 }
 0x17e   : > { %v633_v54 = vadd.f32 %v2219_v53, %v2842_v48  ;;  %v627_v55 = vpop.f32.mrb[3].mxu1 }
 0x17f   : > { %v628_v56 = vadd.f32 %v2842_v48, %v627_v55  ;;  %v811_v58 = vld [vmem:[#allocation2 + $0x8] sm:$0xff] }
 0x180   : > { %779 = vst.msk [vmem:[#allocation2 + $0x18] sm:$0xff] %vm290_vm0, %v633_v54  ;;  %v810_v57 = vld [vmem:[#allocation2] sm:$0xff] }
 0x181   : > { %778 = vst.msk [vmem:[#allocation2 + $0x10] sm:$0xff] %vm290_vm0, %v628_v56  ;;  %2038 = vmatmul.mubr.msk.f32.vlgmr.msra.gmra.mrb[2].mxu0 %vm290_vm0, %v810_v57 }
 0x182   : > { %1022 = vmatprep.mubr.f32.mxu0 %v2686_v0 }
 0x185   : > { %v2222_v59 = vpop.f32.mrb[4].mxu1  ;;  %2039 = vmatmul.mubr.msk.f32.gmra.mrb[4].mxu0 %vm290_vm0, %v811_v58 }
 0x186   : > { %v643_v60 = vadd.f32 %v2222_v59, %v2842_v48  ;;  %v637_v61 = vpop.f32.mrb[5].mxu1  ;;  %1028 = vmatprep.mubr.f32.mxu0 %v2686_v0 }
 0x187   : > { %v638_v62 = vadd.f32 %v2842_v48, %v637_v61  ;;  %v813_v1 = vld [vmem:[#allocation2 + $0x18] sm:$0xff] }
 0x188   : > { %781 = vst.msk [vmem:[#allocation2 + $0x28] sm:$0xff] %vm290_vm0, %v643_v60  ;;  %v812_v63 = vld [vmem:[#allocation2 + $0x10] sm:$0xff] }
 0x189   : > { %780 = vst.msk [vmem:[#allocation2 + $0x20] sm:$0xff] %vm290_vm0, %v638_v62  ;;  %2040 = vmatmul.mubr.msk.f32.gmra.mrb[6].mxu0 %vm290_vm0, %v812_v63 }
 0x18a   : > { %1034 = vmatprep.mubr.f32.mxu0 %v2686_v0 }
 0x18d   : > { %v2225_v2 = vpop.f32.mrb[6].mxu1  ;;  %2041 = vmatmul.mubr.msk.f32.gmra.mrb[8].mxu0 %vm290_vm0, %v813_v1 }
 0x18e   : > { %v653_v3 = vadd.f32 %v2225_v2, %v2842_v48  ;;  %v647_v4 = vpop.f32.mrb[7].mxu1  ;;  %1040 = vmatprep.mubr.f32.mxu0 %v2686_v0 }
 0x18f   : > { %v648_v5 = vadd.f32 %v2842_v48, %v647_v4  ;;  %v815_v7 = vld [vmem:[#allocation2 + $0x28] sm:$0xff] }
 0x190   : > { %783 = vst.msk [vmem:[#allocation2 + $0x38] sm:$0xff] %vm290_vm0, %v653_v3  ;;  %v814_v6 = vld [vmem:[#allocation2 + $0x20] sm:$0xff] }
 0x191   : > { %782 = vst.msk [vmem:[#allocation2 + $0x30] sm:$0xff] %vm290_vm0, %v648_v5  ;;  %2042 = vmatmul.mubr.msk.f32.gmra.mrb[10].mxu0 %vm290_vm0, %v814_v6 }
 0x192   : > { %1046 = vmatprep.mubr.f32.mxu0 %v2686_v0 }
 0x195   : > { %v2228_v8 = vpop.f32.mrb[8].mxu1  ;;  %2043 = vmatmul.mubr.msk.f32.gmra.mrb[12].mxu0 %vm290_vm0, %v815_v7 }
 0x196   : > { %v663_v9 = vadd.f32 %v2228_v8, %v2842_v48  ;;  %v657_v10 = vpop.f32.mrb[9].mxu1  ;;  %1052 = vmatprep.mubr.f32.mxu0 %v2686_v0 }
 0x197   : > { %v658_v11 = vadd.f32 %v2842_v48, %v657_v10  ;;  %v817_v13 = vld [vmem:[#allocation2 + $0x38] sm:$0xff] }
 0x198   : > { %785 = vst.msk [vmem:[#allocation2 + $0x48] sm:$0xff] %vm290_vm0, %v663_v9  ;;  %v816_v12 = vld [vmem:[#allocation2 + $0x30] sm:$0xff] }
 0x199   : > { %784 = vst.msk [vmem:[#allocation2 + $0x40] sm:$0xff] %vm290_vm0, %v658_v11  ;;  %2044 = vmatmul.mubr.msk.f32.gmra.mrb[14].mxu0 %vm290_vm0, %v816_v12 }
 0x19a   : > { %1058 = vmatprep.mubr.f32.mxu0 %v2686_v0 }
 0x19d   : > { %v2231_v14 = vpop.f32.mrb[10].mxu1  ;;  %2045 = vmatmul.mubr.msk.f32.gmra.mrb[16].mxu0 %vm290_vm0, %v817_v13 }
 0x19e   : > { %v673_v15 = vadd.f32 %v2231_v14, %v2842_v48  ;;  %v667_v16 = vpop.f32.mrb[11].mxu1  ;;  %1064 = vmatprep.mubr.f32.mxu0 %v2686_v0 }
 0x19f   : > { %v668_v17 = vadd.f32 %v2842_v48, %v667_v16  ;;  %v819_v19 = vld [vmem:[#allocation2 + $0x48] sm:$0xff] }
 0x1a0   : > { %787 = vst.msk [vmem:[#allocation2 + $0x58] sm:$0xff] %vm290_vm0, %v673_v15  ;;  %v818_v18 = vld [vmem:[#allocation2 + $0x40] sm:$0xff] }
 0x1a1   : > { %786 = vst.msk [vmem:[#allocation2 + $0x50] sm:$0xff] %vm290_vm0, %v668_v17  ;;  %2046 = vmatmul.mubr.msk.f32.gmra.mrb[18].mxu0 %vm290_vm0, %v818_v18 }
 0x1a2   : > { %1070 = vmatprep.mubr.f32.mxu0 %v2686_v0 }
 0x1a5   : > { %v2234_v20 = vpop.f32.mrb[12].mxu1  ;;  %2047 = vmatmul.mubr.msk.f32.gmra.mrb[20].mxu0 %vm290_vm0, %v819_v19  ;;  %v845_v19 = vld [vmem:[#allocation3 + $0x8] sm:$0xf0] }
 0x1a6   : > { %v683_v21 = vadd.f32 %v2234_v20, %v2842_v48  ;;  %v677_v22 = vpop.f32.mrb[13].mxu1  ;;  %1076 = vmatprep.mubr.f32.mxu0 %v2686_v0  ;;  %v847_v20 = vld [vmem:[#allocation3 + $0x18] sm:$0x1] }
 0x1a7   : > { %v678_v23 = vadd.f32 %v2842_v48, %v677_v22  ;;  %v821_v25 = vld [vmem:[#allocation2 + $0x58] sm:$0xff]  ;;  %v1505_v22 = vrot.slane %v847_v20, 4 }
 0x1a8   : > { %789 = vst.msk [vmem:[#allocation2 + $0x68] sm:$0xff] %vm290_vm0, %v683_v21  ;;  %v820_v24 = vld [vmem:[#allocation2 + $0x50] sm:$0xff] }
 0x1a9   : > { %788 = vst.msk [vmem:[#allocation2 + $0x60] sm:$0xff] %vm290_vm0, %v678_v23  ;;  %2048 = vmatmul.mubr.msk.f32.gmra.mrb[22].mxu0 %vm290_vm0, %v820_v24 }
 0x1aa   : > { %1082 = vmatprep.mubr.f32.mxu0 %v2686_v0 }
 0x1ad   : > { %v2237_v26 = vpop.f32.mrb[14].mxu1  ;;  %2049 = vmatmul.mubr.msk.f32.gmra.mrb[24].mxu0 %vm290_vm0, %v821_v25 }
 0x1ae   : > { %v693_v27 = vadd.f32 %v2237_v26, %v2842_v48  ;;  %v687_v28 = vpop.f32.mrb[15].mxu1  ;;  %1088 = vmatprep.mubr.f32.mxu0 %v2686_v0 }
 0x1af   : > { %v688_v29 = vadd.f32 %v2842_v48, %v687_v28  ;;  %v823_v32 = vld [vmem:[#allocation2 + $0x68] sm:$0xff] }
 0x1b0   : > { %791 = vst.msk [vmem:[#allocation2 + $0x78] sm:$0xff] %vm290_vm0, %v693_v27  ;;  %v822_v31 = vld [vmem:[#allocation2 + $0x60] sm:$0xff] }
 0x1b1   : > { %790 = vst.msk [vmem:[#allocation2 + $0x70] sm:$0xff] %vm290_vm0, %v688_v29  ;;  %2050 = vmatmul.mubr.msk.f32.gmra.mrb[26].mxu0 %vm290_vm0, %v822_v31 }
 0x1b2   : > { %1094 = vmatprep.mubr.f32.mxu0 %v2686_v0 }
 0x1b5   : > { %v2240_v33 = vpop.f32.mrb[16].mxu1  ;;  %2051 = vmatmul.mubr.msk.f32.gmra.mrb[28].mxu0 %vm290_vm0, %v823_v32 }
 0x1b6   : > { %v703_v34 = vadd.f32 %v2240_v33, %v2842_v48  ;;  %v697_v35 = vpop.f32.mrb[17].mxu1  ;;  %1100 = vmatprep.mubr.f32.mxu0 %v2686_v0 }
 0x1b7   : > { %v698_v36 = vadd.f32 %v2842_v48, %v697_v35  ;;  %v825_v38 = vld [vmem:[#allocation2 + $0x78] sm:$0xff] }
 0x1b8   : > { %793 = vst.msk [vmem:[#allocation2 + $0x88] sm:$0xff] %vm290_vm0, %v703_v34  ;;  %v824_v37 = vld [vmem:[#allocation2 + $0x70] sm:$0xff] }
 0x1b9   : > { %792 = vst.msk [vmem:[#allocation2 + $0x80] sm:$0xff] %vm290_vm0, %v698_v36  ;;  %2052 = vmatmul.mubr.msk.f32.gmra.mrb[30].mxu0 %vm290_vm0, %v824_v37 }
 0x1ba   : > { %1106 = vmatprep.mubr.f32.mxu0 %v2686_v0 }
 0x1bd   : > { %v2243_v39 = vpop.f32.mrb[18].mxu1  ;;  %2053 = vmatmul.mubr.msk.f32.gmra.mrb[32].mxu0 %vm290_vm0, %v825_v38 }
 0x1be   : > { %v713_v40 = vadd.f32 %v2243_v39, %v2842_v48  ;;  %v707_v41 = vpop.f32.mrb[19].mxu1  ;;  %1112 = vmatprep.mubr.f32.mxu0 %v2686_v0 }
 0x1bf   : > { %v708_v42 = vadd.f32 %v2842_v48, %v707_v41  ;;  %v827_v44 = vld [vmem:[#allocation2 + $0x88] sm:$0xff] }
 0x1c0   : > { %795 = vst.msk [vmem:[#allocation2 + $0x98] sm:$0xff] %vm290_vm0, %v713_v40  ;;  %v826_v43 = vld [vmem:[#allocation2 + $0x80] sm:$0xff] }
 0x1c1   : > { %794 = vst.msk [vmem:[#allocation2 + $0x90] sm:$0xff] %vm290_vm0, %v708_v42  ;;  %2054 = vmatmul.mubr.msk.f32.gmra.mrb[34].mxu0 %vm290_vm0, %v826_v43 }
 0x1c2   : > { %1118 = vmatprep.mubr.f32.mxu0 %v2686_v0 }
 0x1c5   : > { %v2246_v45 = vpop.f32.mrb[20].mxu1  ;;  %2055 = vmatmul.mubr.msk.f32.gmra.mrb[36].mxu0 %vm290_vm0, %v827_v44 }
 0x1c6   : > { %v723_v46 = vadd.f32 %v2246_v45, %v2842_v48  ;;  %v717_v47 = vpop.f32.mrb[21].mxu1  ;;  %1124 = vmatprep.mubr.f32.mxu0 %v2686_v0 }
 0x1c7   : > { %v718_v49 = vadd.f32 %v2842_v48, %v717_v47  ;;  %v829_v51 = vld [vmem:[#allocation2 + $0x98] sm:$0xff] }
 0x1c8   : > { %797 = vst.msk [vmem:[#allocation2 + $0xa8] sm:$0xff] %vm290_vm0, %v723_v46  ;;  %v828_v50 = vld [vmem:[#allocation2 + $0x90] sm:$0xff] }
 0x1c9   : > { %796 = vst.msk [vmem:[#allocation2 + $0xa0] sm:$0xff] %vm290_vm0, %v718_v49  ;;  %2056 = vmatmul.mubr.msk.f32.gmra.mrb[38].mxu0 %vm290_vm0, %v828_v50 }
 0x1ca   : > { %1130 = vmatprep.mubr.f32.mxu0 %v2686_v0 }
 0x1cd   : > { %v2249_v52 = vpop.f32.mrb[22].mxu1  ;;  %2057 = vmatmul.mubr.msk.f32.gmra.mrb[40].mxu0 %vm290_vm0, %v829_v51 }
 0x1ce   : > { %v733_v53 = vadd.f32 %v2249_v52, %v2842_v48  ;;  %v727_v54 = vpop.f32.mrb[23].mxu1  ;;  %1136 = vmatprep.mubr.f32.mxu0 %v2686_v0 }
 0x1cf   : > { %v728_v55 = vadd.f32 %v2842_v48, %v727_v54  ;;  %v831_v57 = vld [vmem:[#allocation2 + $0xa8] sm:$0xff] }
 0x1d0   : > { %799 = vst.msk [vmem:[#allocation2 + $0xb8] sm:$0xff] %vm290_vm0, %v733_v53  ;;  %v830_v56 = vld [vmem:[#allocation2 + $0xa0] sm:$0xff] }
 0x1d1   : > { %798 = vst.msk [vmem:[#allocation2 + $0xb0] sm:$0xff] %vm290_vm0, %v728_v55  ;;  %2058 = vmatmul.mubr.msk.f32.gmra.mrb[42].mxu0 %vm290_vm0, %v830_v56 }
 0x1d2   : > { %1142 = vmatprep.mubr.f32.mxu0 %v2686_v0 }
 0x1d5   : > { %v2252_v58 = vpop.f32.mrb[24].mxu1  ;;  %2059 = vmatmul.mubr.msk.f32.gmra.mrb[44].mxu0 %vm290_vm0, %v831_v57 }
 0x1d6   : > { %v743_v59 = vadd.f32 %v2252_v58, %v2842_v48  ;;  %v737_v60 = vpop.f32.mrb[25].mxu1  ;;  %1148 = vmatprep.mubr.f32.mxu0 %v2686_v0 }
 0x1d7   : > { %v738_v61 = vadd.f32 %v2842_v48, %v737_v60  ;;  %v833_v63 = vld [vmem:[#allocation2 + $0xb8] sm:$0xff] }
 0x1d8   : > { %801 = vst.msk [vmem:[#allocation2 + $0xc8] sm:$0xff] %vm290_vm0, %v743_v59  ;;  %v832_v62 = vld [vmem:[#allocation2 + $0xb0] sm:$0xff] }
 0x1d9   : > { %800 = vst.msk [vmem:[#allocation2 + $0xc0] sm:$0xff] %vm290_vm0, %v738_v61  ;;  %2060 = vmatmul.mubr.msk.f32.gmra.mrb[46].mxu0 %vm290_vm0, %v832_v62 }
 0x1da   : > { %1154 = vmatprep.mubr.f32.mxu0 %v2686_v0 }
 0x1dd   : > { %v2255_v1 = vpop.f32.mrb[26].mxu1  ;;  %2061 = vmatmul.mubr.msk.f32.gmra.mrb[48].mxu0 %vm290_vm0, %v833_v63 }
 0x1de   : > { %v753_v2 = vadd.f32 %v2255_v1, %v2842_v48  ;;  %v747_v3 = vpop.f32.mrb[27].mxu1  ;;  %1160 = vmatprep.mubr.f32.mxu0 %v2686_v0 }
 0x1df   : > { %v748_v4 = vadd.f32 %v2842_v48, %v747_v3  ;;  %v835_v6 = vld [vmem:[#allocation2 + $0xc8] sm:$0xff] }
 0x1e0   : > { %803 = vst.msk [vmem:[#allocation2 + $0xd8] sm:$0xff] %vm290_vm0, %v753_v2  ;;  %v834_v5 = vld [vmem:[#allocation2 + $0xc0] sm:$0xff] }
 0x1e1   : > { %802 = vst.msk [vmem:[#allocation2 + $0xd0] sm:$0xff] %vm290_vm0, %v748_v4  ;;  %2062 = vmatmul.mubr.msk.f32.gmra.mrb[50].mxu0 %vm290_vm0, %v834_v5 }
 0x1e2   : > { %1166 = vmatprep.mubr.f32.mxu0 %v2686_v0 }
 0x1e5   : > { %v2258_v7 = vpop.f32.mrb[28].mxu1  ;;  %2063 = vmatmul.mubr.msk.f32.gmra.mrb[52].mxu0 %vm290_vm0, %v835_v6 }
 0x1e6   : > { %v763_v8 = vadd.f32 %v2258_v7, %v2842_v48  ;;  %v757_v9 = vpop.f32.mrb[29].mxu1  ;;  %1172 = vmatprep.mubr.f32.mxu0 %v2686_v0 }
 0x1e7   : > { %v758_v10 = vadd.f32 %v2842_v48, %v757_v9  ;;  %v837_v12 = vld [vmem:[#allocation2 + $0xd8] sm:$0xff] }
 0x1e8   : > { %805 = vst.msk [vmem:[#allocation2 + $0xe8] sm:$0xff] %vm290_vm0, %v763_v8  ;;  %v836_v11 = vld [vmem:[#allocation2 + $0xd0] sm:$0xff] }
 0x1e9   : > { %804 = vst.msk [vmem:[#allocation2 + $0xe0] sm:$0xff] %vm290_vm0, %v758_v10  ;;  %2064 = vmatmul.mubr.msk.f32.gmra.mrb[54].mxu0 %vm290_vm0, %v836_v11 }
 0x1ea   : > { %1178 = vmatprep.mubr.f32.mxu0 %v2686_v0 }
 0x1ed   : > { %v2261_v13 = vpop.f32.mrb[30].mxu1  ;;  %2065 = vmatmul.mubr.msk.f32.gmra.mrb[56].mxu0 %vm290_vm0, %v837_v12 }
 0x1ee   : > { %v773_v14 = vadd.f32 %v2261_v13, %v2842_v48  ;;  %v767_v15 = vpop.f32.mrb[31].mxu1  ;;  %1184 = vmatprep.mubr.f32.mxu0 %v2686_v0 }
 0x1ef   : > { %v768_v16 = vadd.f32 %v2842_v48, %v767_v15  ;;  %v839_v18 = vld [vmem:[#allocation2 + $0xe8] sm:$0xff]  ;;  %v1504_v48 = vrot.slane %v845_v19, 4 }
 0x1f0   : > { %807 = vst.msk [vmem:[#allocation2 + $0xf8] sm:$0xff] %vm290_vm0, %v773_v14  ;;  %v838_v17 = vld [vmem:[#allocation2 + $0xe0] sm:$0xff] }
 0x1f1   : > { %806 = vst.msk [vmem:[#allocation2 + $0xf0] sm:$0xff] %vm290_vm0, %v768_v16  ;;  %2066 = vmatmul.mubr.msk.f32.gmra.mrb[58].mxu0 %vm290_vm0, %v838_v17  ;;  %v1506_v24 = vsel %vm294_vm1, %v1504_v48, %v1505_v22 }
 0x1f2   : > { %1190 = vmatprep.mubr.f32.mxu0 %v2686_v0 }
 0x1f5   : > { %2067 = vmatmul.mubr.msk.f32.gmra.mrb[60].mxu0 %vm290_vm0, %v839_v18 }
 0x1f6   : > { %1196 = vmatprep.mubr.f32.mxu0 %v2686_v0 }
 0x1f7   : > { %v841_v23 = vld [vmem:[#allocation2 + $0xf8] sm:$0xff] }
 0x1f8   : > { %v840_v21 = vld [vmem:[#allocation2 + $0xf0] sm:$0xff] }
 0x1f9   : > { %2068 = vmatmul.mubr.msk.f32.gmra.mrb[62].mxu0 %vm290_vm0, %v840_v21 }
 0x1fa   : > { %1202 = vmatprep.mubr.f32.mxu0 %v2686_v0 }
 0x1fd   : > { %2069 = vmatmul.mubr.msk.f32.gmra.mrb[64].mxu0 %vm290_vm0, %v841_v23 }
 0x1fe   : > { %1573 = vmatprep.mubr.f32.mxu0 %v1506_v24 }
 0x254   : > { %v2972_v25 = vpop.f32.mrb[2].mxu0 }
 0x255   : > { %v2974_v26 = vpop.f32.mrb[3].mxu0 }
 0x256   : > { %v1209_v27 = vmax.f32 %v2972_v25, %v2974_v26 }
 0x258   : > { %1210 = vmax.xlane.f32.xlu1 %v1209_v27  ;;  %v2978_v28 = vpop.f32.mrb[4].mxu0 }
 0x259   : > { %v2980_v29 = vpop.f32.mrb[5].mxu0 }
 0x25a   : > { %v1212_v0 = vmax.f32 %v2978_v28, %v2980_v29 }
 0x25c   : > { %1213 = vmax.xlane.f32.xlu1 %v1212_v0  ;;  %v2984_v31 = vpop.f32.mrb[6].mxu0 }
 0x25d   : > { %v2986_v32 = vpop.f32.mrb[7].mxu0 }
 0x25e   : > { %v1215_v33 = vmax.f32 %v2984_v31, %v2986_v32 }
 0x260   : > { %1216 = vmax.xlane.f32.xlu1 %v1215_v33  ;;  %v2990_v34 = vpop.f32.mrb[8].mxu0 }
 0x261   : > { %v2992_v35 = vpop.f32.mrb[9].mxu0 }
 0x262   : > { %v1218_v36 = vmax.f32 %v2990_v34, %v2992_v35 }
 0x264   : > { %1219 = vmax.xlane.f32.xlu1 %v1218_v36  ;;  %v2996_v37 = vpop.f32.mrb[10].mxu0 }
 0x265   : > { %v2998_v38 = vpop.f32.mrb[11].mxu0 }
 0x266   : > { %v1221_v39 = vmax.f32 %v2996_v37, %v2998_v38 }
 0x268   : > { %1222 = vmax.xlane.f32.xlu1 %v1221_v39  ;;  %v3002_v40 = vpop.f32.mrb[12].mxu0 }
 0x269   : > { %v3004_v41 = vpop.f32.mrb[13].mxu0 }
 0x26a   : > { %v1224_v42 = vmax.f32 %v3002_v40, %v3004_v41 }
 0x26c   : > { %1225 = vmax.xlane.f32.xlu1 %v1224_v42  ;;  %v3008_v43 = vpop.f32.mrb[14].mxu0 }
 0x26d   : > { %v3010_v44 = vpop.f32.mrb[15].mxu0 }
 0x26e   : > { %v1227_v45 = vmax.f32 %v3008_v43, %v3010_v44 }
 0x270   : > { %1228 = vmax.xlane.f32.xlu1 %v1227_v45  ;;  %v3014_v46 = vpop.f32.mrb[16].mxu0 }
 0x271   : > { %v3016_v47 = vpop.f32.mrb[17].mxu0 }
 0x272   : > { %v1230_v49 = vmax.f32 %v3014_v46, %v3016_v47 }
 0x274   : > { %1231 = vmax.xlane.f32.xlu1 %v1230_v49  ;;  %v3020_v50 = vpop.f32.mrb[18].mxu0 }
 0x275   : > { %v3022_v51 = vpop.f32.mrb[19].mxu0 }
 0x276   : > { %v1233_v52 = vmax.f32 %v3020_v50, %v3022_v51 }
 0x278   : > { %1234 = vmax.xlane.f32.xlu0 %v1233_v52  ;;  %v3026_v53 = vpop.f32.mrb[20].mxu0 }
 0x279   : > { %v3028_v54 = vpop.f32.mrb[21].mxu0 }
 0x27a   : > { %v1236_v55 = vmax.f32 %v3026_v53, %v3028_v54 }
 0x27c   : > { %1237 = vmax.xlane.f32.xlu1 %v1236_v55  ;;  %v3032_v56 = vpop.f32.mrb[22].mxu0 }
 0x27d   : > { %v3034_v57 = vpop.f32.mrb[23].mxu0 }
 0x27e   : > { %v1239_v58 = vmax.f32 %v3032_v56, %v3034_v57 }
 0x280   : > { %1240 = vmax.xlane.f32.xlu1 %v1239_v58  ;;  %v3038_v59 = vpop.f32.mrb[24].mxu0 }
 0x281   : > { %v3040_v60 = vpop.f32.mrb[25].mxu0 }
 0x282   : > { %v1242_v61 = vmax.f32 %v3038_v59, %v3040_v60 }
 0x284   : > { %1243 = vmax.xlane.f32.xlu1 %v1242_v61  ;;  %v3044_v62 = vpop.f32.mrb[26].mxu0 }
 0x285   : > { %v3046_v63 = vpop.f32.mrb[27].mxu0 }
 0x286   : > { %v1245_v1 = vmax.f32 %v3044_v62, %v3046_v63 }
 0x288   : > { %1246 = vmax.xlane.f32.xlu1 %v1245_v1  ;;  %v3050_v2 = vpop.f32.mrb[28].mxu0 }
 0x289   : > { %v3052_v3 = vpop.f32.mrb[29].mxu0 }
 0x28a   : > { %v1248_v4 = vmax.f32 %v3050_v2, %v3052_v3 }
 0x28c   : > { %1249 = vmax.xlane.f32.xlu1 %v1248_v4  ;;  %v3056_v5 = vpop.f32.mrb[30].mxu0 }
 0x28d   : > { %v3058_v6 = vpop.f32.mrb[31].mxu0 }
 0x28e   : > { %v1251_v7 = vmax.f32 %v3056_v5, %v3058_v6 }
 0x290   : > { %1252 = vmax.xlane.f32.xlu1 %v1251_v7  ;;  %v3062_v8 = vpop.f32.mrb[32].mxu0 }
 0x291   : > { %v3064_v9 = vpop.f32.mrb[33].mxu0 }
 0x292   : > { %v1254_v10 = vmax.f32 %v3062_v8, %v3064_v9 }
 0x294   : > { %1255 = vmax.xlane.f32.xlu1 %v1254_v10  ;;  %v3068_v11 = vpop.f32.mrb[34].mxu0 }
 0x295   : > { %v3070_v12 = vpop.f32.mrb[35].mxu0 }
 0x296   : > { %v1257_v13 = vmax.f32 %v3068_v11, %v3070_v12 }
 0x298   : > { %1258 = vmax.xlane.f32.xlu1 %v1257_v13  ;;  %v3074_v14 = vpop.f32.mrb[36].mxu0 }
 0x299   : > { %v3076_v15 = vpop.f32.mrb[37].mxu0 }
 0x29a   : > { %v1260_v16 = vmax.f32 %v3074_v14, %v3076_v15 }
 0x29c   : > { %1261 = vmax.xlane.f32.xlu1 %v1260_v16  ;;  %v3080_v17 = vpop.f32.mrb[38].mxu0 }
 0x29d   : > { %v3082_v18 = vpop.f32.mrb[39].mxu0 }
 0x29e   : > { %v1263_v19 = vmax.f32 %v3080_v17, %v3082_v18 }
 0x2a0   : > { %1264 = vmax.xlane.f32.xlu1 %v1263_v19  ;;  %v3086_v20 = vpop.f32.mrb[40].mxu0 }
 0x2a1   : > { %v3088_v21 = vpop.f32.mrb[41].mxu0 }
 0x2a2   : > { %v1266_v48 = vmax.f32 %v3086_v20, %v3088_v21 }
 0x2a4   : > { %1267 = vmax.xlane.f32.xlu1 %v1266_v48  ;;  %v3092_v22 = vpop.f32.mrb[42].mxu0 }
 0x2a5   : > { %v3094_v23 = vpop.f32.mrb[43].mxu0 }
 0x2a6   : > { %v1269_v24 = vmax.f32 %v3092_v22, %v3094_v23 }
 0x2a8   : > { %1270 = vmax.xlane.f32.xlu1 %v1269_v24  ;;  %v3098_v27 = vpop.f32.mrb[44].mxu0 }
 0x2a9   : > { %v3100_v0 = vpop.f32.mrb[45].mxu0 }
 0x2aa   : > { %v1272_v33 = vmax.f32 %v3098_v27, %v3100_v0 }
 0x2ac   : > { %1273 = vmax.xlane.f32.xlu1 %v1272_v33  ;;  %v3104_v36 = vpop.f32.mrb[46].mxu0 }
 0x2ad   : > { %v3106_v39 = vpop.f32.mrb[47].mxu0 }
 0x2ae   : > { %v1275_v42 = vmax.f32 %v3104_v36, %v3106_v39 }
 0x2b0   : > { %1276 = vmax.xlane.f32.xlu1 %v1275_v42  ;;  %v3110_v45 = vpop.f32.mrb[48].mxu0 }
 0x2b1   : > { %v3112_v49 = vpop.f32.mrb[49].mxu0 }
 0x2b2   : > { %v1278_v52 = vmax.f32 %v3110_v45, %v3112_v49 }
 0x2b4   : > { %1279 = vmax.xlane.f32.xlu1 %v1278_v52  ;;  %v3116_v55 = vpop.f32.mrb[50].mxu0 }
 0x2b5   : > { %v3118_v58 = vpop.f32.mrb[51].mxu0 }
 0x2b6   : > { %v1281_v61 = vmax.f32 %v3116_v55, %v3118_v58 }
 0x2b8   : > { %1282 = vmax.xlane.f32.xlu1 %v1281_v61  ;;  %v3122_v1 = vpop.f32.mrb[52].mxu0 }
 0x2b9   : > { %3492 = vst [vmem:[#allocation7_spill] sm:$0xff] %v3122_v1  ;;  %v3124_v4 = vpop.f32.mrb[53].mxu0 }
 0x2ba   : > { %3493 = vst [vmem:[#allocation8_spill] sm:$0xff] %v3124_v4  ;;  %v1284_v7 = vmax.f32 %v3122_v1, %v3124_v4 }
 0x2bc   : > { %1285 = vmax.xlane.f32.xlu1 %v1284_v7  ;;  %v3128_v10 = vpop.f32.mrb[54].mxu0 }
 0x2bd   : > { %3494 = vst [vmem:[#allocation9_spill] sm:$0xff] %v3128_v10  ;;  %v3130_v13 = vpop.f32.mrb[55].mxu0 }
 0x2be   : > { %3495 = vst [vmem:[#allocation10_spill] sm:$0xff] %v3130_v13  ;;  %v1287_v16 = vmax.f32 %v3128_v10, %v3130_v13 }
 0x2c0   : > { %1288 = vmax.xlane.f32.xlu1 %v1287_v16  ;;  %v3134_v19 = vpop.f32.mrb[56].mxu0 }
 0x2c1   : > { %3496 = vst [vmem:[#allocation11_spill] sm:$0xff] %v3134_v19  ;;  %v3136_v48 = vpop.f32.mrb[57].mxu0 }
 0x2c2   : > { %3497 = vst [vmem:[#allocation12_spill] sm:$0xff] %v3136_v48  ;;  %v1290_v24 = vmax.f32 %v3134_v19, %v3136_v48 }
 0x2c4   : > { %1291 = vmax.xlane.f32.xlu1 %v1290_v24  ;;  %v3140_v33 = vpop.f32.mrb[58].mxu0 }
 0x2c5   : > { %3498 = vst [vmem:[#allocation13_spill] sm:$0xff] %v3140_v33  ;;  %v3142_v42 = vpop.f32.mrb[59].mxu0 }
 0x2c6   : > { %3499 = vst [vmem:[#allocation14_spill] sm:$0xff] %v3142_v42  ;;  %v1293_v52 = vmax.f32 %v3140_v33, %v3142_v42 }
 0x2c8   : > { %1294 = vmax.xlane.f32.xlu1 %v1293_v52  ;;  %v3146_v61 = vpop.f32.mrb[60].mxu0 }
 0x2c9   : > { %3500 = vst [vmem:[#allocation15_spill] sm:$0xff] %v3146_v61  ;;  %v3148_v7 = vpop.f32.mrb[61].mxu0 }
 0x2ca   : > { %3501 = vst [vmem:[#allocation16_spill] sm:$0xff] %v3148_v7  ;;  %v1296_v16 = vmax.f32 %v3146_v61, %v3148_v7 }
 0x2cc   : > { %1297 = vmax.xlane.f32.xlu1 %v1296_v16  ;;  %v3152_v30 = vpop.f32.mrb[62].mxu0 }
 0x2cd   : > { %3502 = vst [vmem:[#allocation17_spill] sm:$0xff] %v3152_v30  ;;  %v3154_v48 = vpop.f32.mrb[63].mxu0 }
 0x2ce   : > { %3503 = vst [vmem:[#allocation18_spill] sm:$0xff] %v3154_v48  ;;  %v1299_v24 = vmax.f32 %v3152_v30, %v3154_v48 }
 0x2d0   : > { %1300 = vmax.xlane.f32.xlu1 %v1299_v24  ;;  %v3158_v19 = vpop.f32.mrb[64].mxu0 }
 0x2d1   : > { %v3160_v42 = vpop.f32.mrb[65].mxu0 }
 0x2d2   : > { %3504 = vst [vmem:[#allocation19_spill] sm:$0xff] %v3160_v42  ;;  %v1302_v52 = vmax.f32 %v3158_v19, %v3160_v42 }
 0x2d4   : > { %1303 = vmax.xlane.f32.xlu1 %v1302_v52 }
 0x2e5   : > { %v1211_v33 = vpop.xlane.xlu1 %1210 }
 0x2e6   : > { %v1305_v7 = vsub.f32 %v2972_v25, %v1211_v33  ;;  %v1306_v16 = vsub.f32 %v2974_v26, %v1211_v33 }
 0x2e8   : > { %v1369_v61 = vmul.f32 1.442695, %v1305_v7  ;;  %v1371_v13 = vmul.f32 1.442695, %v1306_v16 }
 0x2e9   : > { %v1214_v10 = vpop.xlane.xlu1 %1213 }
 0x2ea   : > { %v1307_v4 = vsub.f32 %v2978_v28, %v1214_v10  ;;  %v1308_v24 = vsub.f32 %v2980_v29, %v1214_v10  ;;  %2467 = vpow2.f32 %v1369_v61 }
 0x2eb   : > { %2469 = vpow2.f32 %v1371_v13 }
 0x2ec   : > { %v1373_v48 = vmul.f32 1.442695, %v1307_v4  ;;  %v1375_v30 = vmul.f32 1.442695, %v1308_v24 }
 0x2ed   : > { %v1217_v1 = vpop.xlane.xlu1 %1216 }
 0x2ee   : > { %2471 = vpow2.f32 %v1373_v48  ;;  %v1309_v52 = vsub.f32 %v2984_v31, %v1217_v1  ;;  %v1310_v42 = vsub.f32 %v2986_v32, %v1217_v1 }
 0x2ef   : > { %2473 = vpow2.f32 %v1375_v30 }
 0x2f0   : > { %v1377_v25 = vmul.f32 1.442695, %v1309_v52  ;;  %v1379_v26 = vmul.f32 1.442695, %v1310_v42 }
 0x2f1   : > { %v1220_v33 = vpop.xlane.xlu1 %1219 }
 0x2f2   : > { %v1311_v7 = vsub.f32 %v2990_v34, %v1220_v33  ;;  %v1312_v28 = vsub.f32 %v2992_v35, %v1220_v33  ;;  %2475 = vpow2.f32 %v1377_v25 }
 0x2f3   : > { %2477 = vpow2.f32 %v1379_v26 }
 0x2f4   : > { %v1381_v29 = vmul.f32 1.442695, %v1311_v7  ;;  %v1383_v10 = vmul.f32 1.442695, %v1312_v28  ;;  %v2468_v13 = vpop.eup %2467 }
 0x2f5   : > { %v1223_v4 = vpop.xlane.xlu1 %1222  ;;  %v2470_v32 = vpop.eup %2469 }
 0x2f6   : > { %2479 = vpow2.f32 %v1381_v29  ;;  %v1313_v48 = vsub.f32 %v2996_v37, %v1223_v4  ;;  %v1314_v31 = vsub.f32 %v2998_v38, %v1223_v4 }
 0x2f7   : > { %2481 = vpow2.f32 %v1383_v10 }
 0x2f8   : > { %v2472_v30 = vpop.eup %2471  ;;  %v1385_v1 = vmul.f32 1.442695, %v1313_v48  ;;  %v1387_v61 = vmul.f32 1.442695, %v1314_v31 }
 0x2f9   : > { %v2474_v42 = vpop.eup %2473  ;;  %v1226_v34 = vpop.xlane.xlu1 %1225  ;;  %v2264_v16 = vpack.c.bf16 %v2472_v30, %v2468_v13 }
 0x2fa   : > { %v1315_v35 = vsub.f32 %v3002_v40, %v1226_v34  ;;  %v1316_v24 = vsub.f32 %v3004_v41, %v1226_v34  ;;  %v2262_v52 = vpack.c.bf16 %v2474_v42, %v2470_v32  ;;  %2483 = vpow2.f32 %v1385_v1 }
 0x2fb   : > { %2485 = vpow2.f32 %v1387_v61 }
 0x2fc   : > { %v1389_v25 = vmul.f32 1.442695, %v1315_v35  ;;  %v1391_v26 = vmul.f32 1.442695, %v1316_v24  ;;  %2263 = vmatprep.subr.bf16.mxu0 %v2262_v52  ;;  %v2476_v38 = vpop.eup %2475 }
 0x2fd   : > { %2265 = vmatpush1.bf16.xpose.msra.mxu0 %v2264_v16  ;;  %v1229_v37 = vpop.xlane.xlu1 %1228  ;;  %v2478_v28 = vpop.eup %2477 }
 0x2fe   : > { %2487 = vpow2.f32 %v1389_v25  ;;  %v1317_v33 = vsub.f32 %v3008_v43, %v1229_v37  ;;  %v1318_v7 = vsub.f32 %v3010_v44, %v1229_v37 }
 0x2ff   : > { %2489 = vpow2.f32 %v1391_v26 }
 0x300   : > { %v2480_v29 = vpop.eup %2479  ;;  %v1393_v40 = vmul.f32 1.442695, %v1317_v33  ;;  %v1395_v41 = vmul.f32 1.442695, %v1318_v7 }
 0x301   : > { %v2482_v10 = vpop.eup %2481  ;;  %v1232_v4 = vpop.xlane.xlu1 %1231  ;;  %v2268_v13 = vpack.c.bf16 %v2480_v29, %v2476_v38 }
 0x302   : > { %v1319_v48 = vsub.f32 %v3014_v46, %v1232_v4  ;;  %v1320_v31 = vsub.f32 %v3016_v47, %v1232_v4  ;;  %v2266_v32 = vpack.c.bf16 %v2482_v10, %v2478_v28  ;;  %2491 = vpow2.f32 %v1393_v40 }
 0x303   : > { %2493 = vpow2.f32 %v1395_v41 }
 0x304   : > { %v1397_v30 = vmul.f32 1.442695, %v1319_v48  ;;  %v1399_v1 = vmul.f32 1.442695, %v1320_v31  ;;  %2267 = vmatprep.subr.bf16.mxu0 %v2266_v32  ;;  %v2484_v44 = vpop.eup %2483 }
 0x305   : > { %2269 = vmatpush1.bf16.xpose.msra.mxu0 %v2268_v13  ;;  %v1235_v43 = vpop.xlane.xlu0 %1234  ;;  %v2486_v34 = vpop.eup %2485 }
 0x306   : > { %2495 = vpow2.f32 %v1397_v30  ;;  %v1321_v42 = vsub.f32 %v3020_v50, %v1235_v43  ;;  %v1322_v61 = vsub.f32 %v3022_v51, %v1235_v43 }
 0x307   : > { %2497 = vpow2.f32 %v1399_v1 }
 0x308   : > { %v2488_v16 = vpop.eup %2487  ;;  %v1401_v46 = vmul.f32 1.442695, %v1321_v42  ;;  %v1403_v47 = vmul.f32 1.442695, %v1322_v61 }
 0x309   : > { %v2490_v35 = vpop.eup %2489  ;;  %v1238_v24 = vpop.xlane.xlu1 %1237  ;;  %v2272_v52 = vpack.c.bf16 %v2488_v16, %v2484_v44 }
 0x30a   : > { %v1323_v25 = vsub.f32 %v3026_v53, %v1238_v24  ;;  %v1324_v26 = vsub.f32 %v3028_v54, %v1238_v24  ;;  %v2270_v37 = vpack.c.bf16 %v2490_v35, %v2486_v34  ;;  %2499 = vpow2.f32 %v1401_v46 }
 0x30b   : > { %2501 = vpow2.f32 %v1403_v47 }
 0x30c   : > { %v1405_v38 = vmul.f32 1.442695, %v1323_v25  ;;  %v1407_v33 = vmul.f32 1.442695, %v1324_v26  ;;  %2271 = vmatprep.subr.bf16.mxu0 %v2270_v37  ;;  %v2492_v51 = vpop.eup %2491 }
 0x30d   : > { %2273 = vmatpush1.bf16.xpose.msra.mxu0 %v2272_v52  ;;  %v1241_v50 = vpop.xlane.xlu1 %1240  ;;  %v2494_v29 = vpop.eup %2493 }
 0x30e   : > { %2503 = vpow2.f32 %v1405_v38  ;;  %v1325_v7 = vsub.f32 %v3032_v56, %v1241_v50  ;;  %v1326_v28 = vsub.f32 %v3034_v57, %v1241_v50 }
 0x30f   : > { %2505 = vpow2.f32 %v1407_v33 }
 0x310   : > { %v2496_v40 = vpop.eup %2495  ;;  %v1409_v53 = vmul.f32 1.442695, %v1325_v7  ;;  %v1411_v54 = vmul.f32 1.442695, %v1326_v28 }
 0x311   : > { %v2498_v10 = vpop.eup %2497  ;;  %v1244_v41 = vpop.xlane.xlu1 %1243  ;;  %v2276_v4 = vpack.c.bf16 %v2496_v40, %v2492_v51 }
 0x312   : > { %v1327_v13 = vsub.f32 %v3038_v59, %v1244_v41  ;;  %v1328_v48 = vsub.f32 %v3040_v60, %v1244_v41  ;;  %v2274_v31 = vpack.c.bf16 %v2498_v10, %v2494_v29  ;;  %2507 = vpow2.f32 %v1409_v53 }
 0x313   : > { %2509 = vpow2.f32 %v1411_v54 }
 0x314   : > { %v1413_v32 = vmul.f32 1.442695, %v1327_v13  ;;  %v1415_v30 = vmul.f32 1.442695, %v1328_v48  ;;  %2275 = vmatprep.subr.bf16.mxu0 %v2274_v31  ;;  %v2500_v57 = vpop.eup %2499 }
 0x315   : > { %2277 = vmatpush1.bf16.xpose.msra.mxu0 %v2276_v4  ;;  %v1247_v56 = vpop.xlane.xlu1 %1246  ;;  %v2502_v44 = vpop.eup %2501 }
 0x316   : > { %2511 = vpow2.f32 %v1413_v32  ;;  %v1329_v1 = vsub.f32 %v3044_v62, %v1247_v56  ;;  %v1330_v43 = vsub.f32 %v3046_v63, %v1247_v56 }
 0x317   : > { %2513 = vpow2.f32 %v1415_v30 }
 0x318   : > { %v2504_v42 = vpop.eup %2503  ;;  %v1417_v59 = vmul.f32 1.442695, %v1329_v1  ;;  %v1419_v60 = vmul.f32 1.442695, %v1330_v43 }
 0x319   : > { %v2506_v61 = vpop.eup %2505  ;;  %v1250_v34 = vpop.xlane.xlu1 %1249  ;;  %v2280_v16 = vpack.c.bf16 %v2504_v42, %v2500_v57 }
 0x31a   : > { %v1331_v46 = vsub.f32 %v3050_v2, %v1250_v34  ;;  %v1332_v35 = vsub.f32 %v3052_v3, %v1250_v34  ;;  %v2278_v47 = vpack.c.bf16 %v2506_v61, %v2502_v44  ;;  %2515 = vpow2.f32 %v1417_v59 }
 0x31b   : > { %2517 = vpow2.f32 %v1419_v60 }
 0x31c   : > { %v1421_v24 = vmul.f32 1.442695, %v1331_v46  ;;  %v1423_v52 = vmul.f32 1.442695, %v1332_v35  ;;  %2279 = vmatprep.subr.bf16.mxu0 %v2278_v47  ;;  %v2508_v63 = vpop.eup %2507 }
 0x31d   : > { %2281 = vmatpush1.bf16.xpose.msra.mxu0 %v2280_v16  ;;  %v1253_v62 = vpop.xlane.xlu1 %1252  ;;  %v2510_v37 = vpop.eup %2509 }
 0x31e   : > { %2519 = vpow2.f32 %v1421_v24  ;;  %v1333_v25 = vsub.f32 %v3056_v5, %v1253_v62  ;;  %v1334_v26 = vsub.f32 %v3058_v6, %v1253_v62 }
 0x31f   : > { %2521 = vpow2.f32 %v1423_v52 }
 0x320   : > { %v2512_v38 = vpop.eup %2511  ;;  %v1425_v2 = vmul.f32 1.442695, %v1333_v25  ;;  %v1427_v3 = vmul.f32 1.442695, %v1334_v26 }
 0x321   : > { %v2514_v33 = vpop.eup %2513  ;;  %v1256_v50 = vpop.xlane.xlu1 %1255  ;;  %v2284_v51 = vpack.c.bf16 %v2512_v38, %v2508_v63 }
 0x322   : > { %v1335_v7 = vsub.f32 %v3062_v8, %v1256_v50  ;;  %v1336_v28 = vsub.f32 %v3064_v9, %v1256_v50  ;;  %v2282_v29 = vpack.c.bf16 %v2514_v33, %v2510_v37  ;;  %2523 = vpow2.f32 %v1425_v2 }
 0x323   : > { %2525 = vpow2.f32 %v1427_v3 }
 0x324   : > { %v1429_v40 = vmul.f32 1.442695, %v1335_v7  ;;  %v1431_v53 = vmul.f32 1.442695, %v1336_v28  ;;  %2283 = vmatprep.subr.bf16.mxu0 %v2282_v29  ;;  %v2516_v6 = vpop.eup %2515 }
 0x325   : > { %2285 = vmatpush1.bf16.xpose.msra.mxu0 %v2284_v51  ;;  %v1259_v5 = vpop.xlane.xlu1 %1258  ;;  %v2518_v41 = vpop.eup %2517 }
 0x326   : > { %2527 = vpow2.f32 %v1429_v40  ;;  %v1337_v10 = vsub.f32 %v3068_v11, %v1259_v5  ;;  %v1338_v54 = vsub.f32 %v3070_v12, %v1259_v5 }
 0x327   : > { %2529 = vpow2.f32 %v1431_v53 }
 0x328   : > { %v2520_v4 = vpop.eup %2519  ;;  %v1433_v8 = vmul.f32 1.442695, %v1337_v10  ;;  %v1435_v9 = vmul.f32 1.442695, %v1338_v54 }
 0x329   : > { %v2522_v13 = vpop.eup %2521  ;;  %v1262_v48 = vpop.xlane.xlu1 %1261  ;;  %v2288_v31 = vpack.c.bf16 %v2520_v4, %v2516_v6 }
 0x32a   : > { %v1339_v32 = vsub.f32 %v3074_v14, %v1262_v48  ;;  %v1340_v30 = vsub.f32 %v3076_v15, %v1262_v48  ;;  %v2286_v56 = vpack.c.bf16 %v2522_v13, %v2518_v41  ;;  %2531 = vpow2.f32 %v1433_v8 }
 0x32b   : > { %2533 = vpow2.f32 %v1435_v9 }
 0x32c   : > { %v1437_v57 = vmul.f32 1.442695, %v1339_v32  ;;  %v1439_v1 = vmul.f32 1.442695, %v1340_v30  ;;  %2287 = vmatprep.subr.bf16.mxu0 %v2286_v56  ;;  %v2524_v12 = vpop.eup %2523 }
 0x32d   : > { %2289 = vmatpush1.bf16.xpose.msra.mxu0 %v2288_v31  ;;  %v1265_v11 = vpop.xlane.xlu1 %1264  ;;  %v2526_v42 = vpop.eup %2525 }
 0x32e   : > { %2535 = vpow2.f32 %v1437_v57  ;;  %v1341_v43 = vsub.f32 %v3080_v17, %v1265_v11  ;;  %v1342_v44 = vsub.f32 %v3082_v18, %v1265_v11  ;;  %v3505_v57 = vld [vmem:[#allocation7_spill] sm:$0xff]  ;;  %v3506_v11 = vld [vmem:[#allocation8_spill] sm:$0xff] }
 0x32f   : > { %2537 = vpow2.f32 %v1439_v1 }
 0x330   : > { %v2528_v59 = vpop.eup %2527  ;;  %v1441_v14 = vmul.f32 1.442695, %v1341_v43  ;;  %v1443_v15 = vmul.f32 1.442695, %v1342_v44 }
 0x331   : > { %v2530_v61 = vpop.eup %2529  ;;  %v1268_v60 = vpop.xlane.xlu1 %1267  ;;  %v2292_v34 = vpack.c.bf16 %v2528_v59, %v2524_v12  ;;  %v3507_v59 = vld [vmem:[#allocation9_spill] sm:$0xff] }
 0x332   : > { %v1343_v16 = vsub.f32 %v3086_v20, %v1268_v60  ;;  %v1344_v46 = vsub.f32 %v3088_v21, %v1268_v60  ;;  %v2290_v35 = vpack.c.bf16 %v2530_v61, %v2526_v42  ;;  %2539 = vpow2.f32 %v1441_v14  ;;  %v3508_v61 = vld [vmem:[#allocation10_spill] sm:$0xff] }
 0x333   : > { %2541 = vpow2.f32 %v1443_v15 }
 0x334   : > { %v1445_v47 = vmul.f32 1.442695, %v1343_v16  ;;  %v1447_v24 = vmul.f32 1.442695, %v1344_v46  ;;  %2291 = vmatprep.subr.bf16.mxu0 %v2290_v35  ;;  %v2532_v18 = vpop.eup %2531 }
 0x335   : > { %2293 = vmatpush1.bf16.xpose.msra.mxu0 %v2292_v34  ;;  %v1271_v17 = vpop.xlane.xlu1 %1270  ;;  %v2534_v63 = vpop.eup %2533 }
 0x336   : > { %2543 = vpow2.f32 %v1445_v47  ;;  %v1345_v52 = vsub.f32 %v3092_v22, %v1271_v17  ;;  %v1346_v62 = vsub.f32 %v3094_v23, %v1271_v17  ;;  %v3509_v17 = vld [vmem:[#allocation11_spill] sm:$0xff] }
 0x337   : > { %2545 = vpow2.f32 %v1447_v24 }
 0x338   : > { %v2536_v25 = vpop.eup %2535  ;;  %v1449_v20 = vmul.f32 1.442695, %v1345_v52  ;;  %v1451_v21 = vmul.f32 1.442695, %v1346_v62  ;;  %v3510_v52 = vld [vmem:[#allocation12_spill] sm:$0xff] }
 0x339   : > { %v2538_v26 = vpop.eup %2537  ;;  %v1274_v37 = vpop.xlane.xlu1 %1273  ;;  %v2296_v38 = vpack.c.bf16 %v2536_v25, %v2532_v18 }
 0x33a   : > { %v1347_v2 = vsub.f32 %v3098_v27, %v1274_v37  ;;  %v1348_v33 = vsub.f32 %v3100_v0, %v1274_v37  ;;  %v2294_v3 = vpack.c.bf16 %v2538_v26, %v2534_v63  ;;  %2547 = vpow2.f32 %v1449_v20  ;;  %v3511_v37 = vld [vmem:[#allocation13_spill] sm:$0xff] }
 0x33b   : > { %2549 = vpow2.f32 %v1451_v21 }
 0x33c   : > { %v1453_v50 = vmul.f32 1.442695, %v1347_v2  ;;  %v1455_v51 = vmul.f32 1.442695, %v1348_v33  ;;  %2295 = vmatprep.subr.bf16.mxu0 %v2294_v3  ;;  %v2540_v23 = vpop.eup %2539  ;;  %v3512_v2 = vld [vmem:[#allocation14_spill] sm:$0xff] }
 0x33d   : > { %2297 = vmatpush1.bf16.xpose.msra.mxu0 %v2296_v38  ;;  %v1277_v22 = vpop.xlane.xlu1 %1276  ;;  %v2542_v29 = vpop.eup %2541 }
 0x33e   : > { %2551 = vpow2.f32 %v1453_v50  ;;  %v1349_v7 = vsub.f32 %v3104_v36, %v1277_v22  ;;  %v1350_v28 = vsub.f32 %v3106_v39, %v1277_v22 }
 0x33f   : > { %2553 = vpow2.f32 %v1455_v51 }
 0x340   : > { %v2544_v40 = vpop.eup %2543  ;;  %v1457_v27 = vmul.f32 1.442695, %v1349_v7  ;;  %v1459_v0 = vmul.f32 1.442695, %v1350_v28 }
 0x341   : > { %v2546_v53 = vpop.eup %2545  ;;  %v1280_v5 = vpop.xlane.xlu1 %1279  ;;  %v2300_v6 = vpack.c.bf16 %v2544_v40, %v2540_v23 }
 0x342   : > { %v1351_v10 = vsub.f32 %v3110_v45, %v1280_v5  ;;  %v1352_v54 = vsub.f32 %v3112_v49, %v1280_v5  ;;  %v2298_v41 = vpack.c.bf16 %v2546_v53, %v2542_v29  ;;  %2555 = vpow2.f32 %v1457_v27  ;;  %v3513_v29 = vld [vmem:[#allocation15_spill] sm:$0xff]  ;;  %v3514_v27 = vld [vmem:[#allocation16_spill] sm:$0xff] }
 0x343   : > { %2557 = vpow2.f32 %v1459_v0 }
 0x344   : > { %v1461_v4 = vmul.f32 1.442695, %v1351_v10  ;;  %v1463_v8 = vmul.f32 1.442695, %v1352_v54  ;;  %2299 = vmatprep.subr.bf16.mxu0 %v2298_v41  ;;  %v2548_v39 = vpop.eup %2547  ;;  %v3515_v41 = vld [vmem:[#allocation17_spill] sm:$0xff] }
 0x345   : > { %2301 = vmatpush1.bf16.xpose.msra.mxu0 %v2300_v6  ;;  %v1283_v36 = vpop.xlane.xlu1 %1282  ;;  %v2550_v48 = vpop.eup %2549 }
 0x346   : > { %2559 = vpow2.f32 %v1461_v4  ;;  %v1353_v13 = vsub.f32 %v3116_v55, %v1283_v36  ;;  %v1354_v9 = vsub.f32 %v3118_v58, %v1283_v36 }
 0x347   : > { %2561 = vpow2.f32 %v1463_v8  ;;  %v3516_v8 = vld [vmem:[#allocation18_spill] sm:$0xff] }
 0x348   : > { %v2552_v31 = vpop.eup %2551  ;;  %v1465_v45 = vmul.f32 1.442695, %v1353_v13  ;;  %v1467_v49 = vmul.f32 1.442695, %v1354_v9 }
 0x349   : > { %v2554_v32 = vpop.eup %2553  ;;  %v1286_v30 = vpop.xlane.xlu1 %1285  ;;  %v2304_v56 = vpack.c.bf16 %v2552_v31, %v2548_v39 }
 0x34a   : > { %v1355_v1 = vsub.f32 %v3505_v57, %v1286_v30  ;;  %v1356_v12 = vsub.f32 %v3506_v11, %v1286_v30  ;;  %v2302_v43 = vpack.c.bf16 %v2554_v32, %v2550_v48  ;;  %2563 = vpow2.f32 %v1465_v45  ;;  %v3517_v30 = vld [vmem:[#allocation19_spill] sm:$0xff] }
 0x34b   : > { %2565 = vpow2.f32 %v1467_v49 }
 0x34c   : > { %v1469_v44 = vmul.f32 1.442695, %v1355_v1  ;;  %v1471_v42 = vmul.f32 1.442695, %v1356_v12  ;;  %2303 = vmatprep.subr.bf16.mxu0 %v2302_v43  ;;  %v2556_v58 = vpop.eup %2555 }
 0x34d   : > { %2305 = vmatpush1.bf16.xpose.msra.mxu0 %v2304_v56  ;;  %v1289_v55 = vpop.xlane.xlu1 %1288  ;;  %v2558_v60 = vpop.eup %2557 }
 0x34e   : > { %2567 = vpow2.f32 %v1469_v44  ;;  %v1357_v14 = vsub.f32 %v3507_v59, %v1289_v55  ;;  %v1358_v15 = vsub.f32 %v3508_v61, %v1289_v55 }
 0x34f   : > { %2569 = vpow2.f32 %v1471_v42 }
 0x350   : > { %v2560_v34 = vpop.eup %2559  ;;  %v1473_v16 = vmul.f32 1.442695, %v1357_v14  ;;  %v1475_v35 = vmul.f32 1.442695, %v1358_v15 }
 0x351   : > { %v2562_v46 = vpop.eup %2561  ;;  %v1292_v47 = vpop.xlane.xlu1 %1291  ;;  %v2308_v24 = vpack.c.bf16 %v2560_v34, %v2556_v58  ;;  %v844_v34 = vld [vmem:[#allocation3] sm:$0xf0] }
 0x352   : > { %v1359_v18 = vsub.f32 %v3509_v17, %v1292_v47  ;;  %v1360_v62 = vsub.f32 %v3510_v52, %v1292_v47  ;;  %v2306_v63 = vpack.c.bf16 %v2562_v46, %v2558_v60  ;;  %2571 = vpow2.f32 %v1473_v16  ;;  %v846_v16 = vld [vmem:[#allocation3 + $0x10] sm:$0x1]  ;;  %v1630_v17 = vld [vmem:[%s3474_s5 + $0x88] sm:$0xff] }
 0x353   : > { %2573 = vpow2.f32 %v1475_v35  ;;  %v1501_v46 = vrot.slane %v844_v34, 4  ;;  %v1502_v35 = vrot.slane %v846_v16, 4  ;;  %v1643_v34 = vld [vmem:[%s3474_s5 + $0xf0] sm:$0xff]  ;;  %v1644_v16 = vld [vmem:[%s3474_s5 + $0xf8] sm:$0xff] }
 0x354   : > { %v1477_v25 = vmul.f32 1.442695, %v1359_v18  ;;  %v1479_v20 = vmul.f32 1.442695, %v1360_v62  ;;  %2307 = vmatprep.subr.bf16.mxu0 %v2306_v63  ;;  %v2564_v21 = vpop.eup %2563  ;;  %v1613_v18 = vld [vmem:[%s3474_s5] sm:$0xff]  ;;  %v1614_v62 = vld [vmem:[%s3474_s5 + $0x8] sm:$0xff] }
 0x355   : > { %2309 = vmatpush1.bf16.xpose.msra.mxu0 %v2308_v24  ;;  %v1295_v26 = vpop.xlane.xlu1 %1294  ;;  %v2566_v3 = vpop.eup %2565  ;;  %v1503_v47 = vsel %vm294_vm1, %v1501_v46, %v1502_v35  ;;  %v1629_v24 = vld [vmem:[%s3474_s5 + $0x80] sm:$0xff]  ;;  %v1631_v63 = vld [vmem:[%s3474_s5 + $0x90] sm:$0xff]  ;;  %v2354_v35 = vpack.c.bf16 %v1644_v16, %v1643_v34 }
 0x356   : > { %2575 = vpow2.f32 %v1477_v25  ;;  %v1361_v38 = vsub.f32 %v3511_v37, %v1295_v26  ;;  %v1362_v33 = vsub.f32 %v3512_v2, %v1295_v26  ;;  %v3238_v52 = vpack.c.bf16 %v1630_v17, %v1629_v24  ;;  %v1632_v25 = vld [vmem:[%s3474_s5 + $0x98] sm:$0xff]  ;;  %v1634_v2 = vld [vmem:[%s3474_s5 + $0xa8] sm:$0xff] }
 0x357   : > { %2577 = vpow2.f32 %v1479_v20  ;;  %v3249_v20 = vpack.c.bf16 %v1614_v62, %v1613_v18  ;;  %v3251_v26 = vpack.c.bf16 %v1632_v25, %v1631_v63  ;;  %v1616_v37 = vld [vmem:[%s3474_s5 + $0x18] sm:$0xff] }
 0x358   : > { %v2568_v50 = vpop.eup %2567  ;;  %v1481_v51 = vmul.f32 1.442695, %v1361_v38  ;;  %v1483_v23 = vmul.f32 1.442695, %v1362_v33  ;;  %v1633_v38 = vld [vmem:[%s3474_s5 + $0xa0] sm:$0xff]  ;;  %2327 = vmatprep.subr.bf16.mxu1 %v3238_v52  ;;  %v1628_v24 = vld [vmem:[%s3474_s5 + $0x78] sm:$0xff] }
 0x359   : > { %v2570_v22 = vpop.eup %2569  ;;  %v1298_v7 = vpop.xlane.xlu1 %1297  ;;  %v2312_v28 = vpack.c.bf16 %v2568_v50, %v2564_v21  ;;  %v1615_v21 = vld [vmem:[%s3474_s5 + $0x10] sm:$0xff]  ;;  %2329 = vmatpush3.bf16.msra.mxu1 %v3249_v20  ;;  %v1617_v50 = vld [vmem:[%s3474_s5 + $0x20] sm:$0xff] }
 0x35a   : > { %v1363_v40 = vsub.f32 %v3513_v29, %v1298_v7  ;;  %v1364_v53 = vsub.f32 %v3514_v27, %v1298_v7  ;;  %v2310_v0 = vpack.c.bf16 %v2570_v22, %v2566_v3  ;;  %2579 = vpow2.f32 %v1481_v51  ;;  %2331 = vmatprep.subr.bf16.mxu1 %v3251_v26  ;;  %v1618_v51 = vld [vmem:[%s3474_s5 + $0x28] sm:$0xff]  ;;  %v1635_v22 = vld [vmem:[%s3474_s5 + $0xb0] sm:$0xff]  ;;  %v1637_v27 = vld [vmem:[%s3474_s5 + $0xc0] sm:$0xff] }
 0x35b   : > { %2581 = vpow2.f32 %v1483_v23  ;;  %v3267_v33 = vpack.c.bf16 %v1616_v37, %v1615_v21  ;;  %v3270_v3 = vpack.c.bf16 %v1634_v2, %v1633_v38  ;;  %v1636_v23 = vld [vmem:[%s3474_s5 + $0xb8] sm:$0xff]  ;;  %v3285_v7 = vpack.c.bf16 %v1618_v51, %v1617_v50  ;;  %v1619_v29 = vld [vmem:[%s3474_s5 + $0x30] sm:$0xff] }
 0x35c   : > { %v1485_v5 = vmul.f32 1.442695, %v1363_v40  ;;  %v1487_v6 = vmul.f32 1.442695, %v1364_v53  ;;  %2311 = vmatprep.subr.bf16.mxu0 %v2310_v0  ;;  %v2572_v54 = vpop.eup %2571  ;;  %v1620_v40 = vld [vmem:[%s3474_s5 + $0x38] sm:$0xff]  ;;  %v1638_v53 = vld [vmem:[%s3474_s5 + $0xc8] sm:$0xff] }
 0x35d   : > { %2313 = vmatpush1.bf16.xpose.msra.mxu0 %v2312_v28  ;;  %v1301_v10 = vpop.xlane.xlu1 %1300  ;;  %v2574_v39 = vpop.eup %2573  ;;  %2333 = vmatpush3.bf16.msra.mxu1 %v3267_v33  ;;  %v3288_v28 = vpack.c.bf16 %v1636_v23, %v1635_v22  ;;  %v3303_v0 = vpack.c.bf16 %v1620_v40, %v1619_v29 }
 0x35e   : > { %2583 = vpow2.f32 %v1485_v5  ;;  %v1365_v4 = vsub.f32 %v3515_v41, %v1301_v10  ;;  %v1366_v36 = vsub.f32 %v3516_v8, %v1301_v10  ;;  %2335 = vmatprep.subr.bf16.mxu1 %v3270_v3  ;;  %v3306_v5 = vpack.c.bf16 %v1638_v53, %v1637_v27  ;;  %v1622_v10 = vld [vmem:[%s3474_s5 + $0x48] sm:$0xff]  ;;  %v1640_v41 = vld [vmem:[%s3474_s5 + $0xd8] sm:$0xff] }
 0x35f   : > { %2585 = vpow2.f32 %v1487_v6  ;;  %v1621_v6 = vld [vmem:[%s3474_s5 + $0x40] sm:$0xff] }
 0x360   : > { %v2576_v13 = vpop.eup %2575  ;;  %v1489_v9 = vmul.f32 1.442695, %v1365_v4  ;;  %v1491_v31 = vmul.f32 1.442695, %v1366_v36  ;;  %v3321_v4 = vpack.c.bf16 %v1622_v10, %v1621_v6  ;;  %v1623_v36 = vld [vmem:[%s3474_s5 + $0x50] sm:$0xff] }
 0x361   : > { %v2578_v48 = vpop.eup %2577  ;;  %v1304_v45 = vpop.xlane.xlu1 %1303  ;;  %v2316_v32 = vpack.c.bf16 %v2576_v13, %v2572_v54  ;;  %2337 = vmatpush3.bf16.msra.mxu1 %v3285_v7  ;;  %v1639_v54 = vld [vmem:[%s3474_s5 + $0xd0] sm:$0xff] }
 0x362   : > { %v1367_v49 = vsub.f32 %v3158_v19, %v1304_v45  ;;  %v1368_v56 = vsub.f32 %v3517_v30, %v1304_v45  ;;  %v2314_v57 = vpack.c.bf16 %v2578_v48, %v2574_v39  ;;  %2587 = vpow2.f32 %v1489_v9  ;;  %2339 = vmatprep.subr.bf16.mxu1 %v3288_v28  ;;  %v1624_v39 = vld [vmem:[%s3474_s5 + $0x58] sm:$0xff] }
 0x363   : > { %2589 = vpow2.f32 %v1491_v31  ;;  %v3324_v8 = vpack.c.bf16 %v1640_v41, %v1639_v54  ;;  %v3333_v13 = vpack.c.bf16 %v1624_v39, %v1623_v36  ;;  %v3518_v31 = vlaneseq }
 0x364   : > { %v1493_v1 = vmul.f32 1.442695, %v1367_v49  ;;  %v1495_v11 = vmul.f32 1.442695, %v1368_v56  ;;  %2315 = vmatprep.subr.bf16.mxu0 %v2314_v57  ;;  %v2580_v12 = vpop.eup %2579 }
 0x365   : > { %2317 = vmatpush1.bf16.xpose.msra.mxu0 %v2316_v32  ;;  %v2582_v43 = vpop.eup %2581  ;;  %2341 = vmatpush3.bf16.msra.mxu1 %v3303_v0  ;;  %v1583_v45 = vshrl.u32 %v3518_v31, 7 }
 0x366   : > { %2591 = vpow2.f32 %v1493_v1  ;;  %2343 = vmatprep.subr.bf16.mxu1 %v3306_v5  ;;  %v2605_v1 = vld [vmem:[%s2786_s15] sm:$0xff]  ;;  %s2109_s15 = sshll.u32 %s2676_s24, 7  ;;  %s2689_s24 = smov [#allocation4]  }
 0x367   : > { %2593 = vpow2.f32 %v1495_v11  ;;  %v1584_v32 = vsub.s32 4, %v1583_v45  ;;  %v1598_v11 = vcombine.high %v2605_v1, %v2605_v1  ;;  %s3422_s14 = scalar_lea.hbm %s3475_s6, %s2109_s15  ;;  %s2610_s18 = sshll.u32 %s2689_s24, 4  ;;  %s2611_s18 = int_to_ptr.vmem [resolvable:$false] %s2610_s18 }
 0x368   : > { %v2584_v44 = vpop.eup %2583  ;;  %s2612_s19 = scalar_lea.vmem %s2611_s18, 256  ;;  %p2613_p1 = scmp.lt.s32.totalorder %s3424_s11, %s2611_s18 }
 0x369   : > { %v2586_v42 = vpop.eup %2585  ;;  %v2320_v55 = vpack.c.bf16 %v2584_v44, %v2580_v12  ;;  %2345 = vmatpush3.bf16.msra.mxu1 %v3321_v4  ;;  %p2614_p2 = scmp.lt.s32.totalorder %s2612_s19, %s2606_s17 }
 0x36a   : > { %v2318_v58 = vpack.c.bf16 %v2586_v42, %v2582_v43  ;;  %2347 = vmatprep.subr.bf16.mxu1 %v3324_v8 }
 0x36b   : > { %p2615_p3 = por %p2614_p2, %p2613_p1 }
 0x36c   : > { %2319 = vmatprep.subr.bf16.mxu0 %v2318_v58  ;;  %v2588_v19 = vpop.eup %2587 }
 0x36d   : > { %2321 = vmatpush1.bf16.xpose.msra.mxu0 %v2320_v55  ;;  %v2590_v59 = vpop.eup %2589  ;;  %2349 = vmatpush3.bf16.msra.mxu1 %v3333_v13  ;;  %p2616_p5 = pnand %p2615_p3, %p2609_p0 }
 0x370   : > { %v2592_v14 = vpop.eup %2591 }
 0x371   : > { %v2594_v61 = vpop.eup %2593  ;;  %v2324_v15 = vpack.c.bf16 %v2592_v14, %v2588_v19  ;;  %v1642_v14 = vld [vmem:[%s3474_s5 + $0xe8] sm:$0xff] }
 0x372   : > { %v2322_v60 = vpack.c.bf16 %v2594_v61, %v2590_v59  ;;  %v1641_v59 = vld [vmem:[%s3474_s5 + $0xe0] sm:$0xff] }
 0x373   : > { %v1625_v61 = vld [vmem:[%s3474_s5 + $0x60] sm:$0xff] }
 0x374   : > { %2323 = vmatprep.subr.bf16.mxu0 %v2322_v60  ;;  %v1626_v60 = vld [vmem:[%s3474_s5 + $0x68] sm:$0xff] }
 0x375   : > { %2325 = vmatpush1.bf16.xpose.msra.mxu0 %v2324_v15  ;;  %v2350_v15 = vpack.c.bf16 %v1642_v14, %v1641_v59  ;;  %v2352_v46 = vpack.c.bf16 %v1626_v60, %v1625_v61 }
 0x377   : > { %2351 = vmatprep.subr.bf16.mxu1 %v2350_v15 }
 0x378   : > { %2353 = vmatpush3.bf16.msra.mxu1 %v2352_v46 }
 0x379   : > { %2355 = vmatprep.subr.bf16.mxu1 %v2354_v35 }
 0x37c   : > { %1574 = vmatmul.mubr.f32.vlgmr.msra.gmra.mrb[66].mxu0 %v1503_v47  ;;  %v1627_v47 = vld [vmem:[%s3474_s5 + $0x70] sm:$0xff] }
 0x37d   : > { %v2356_v17 = vpack.c.bf16 %v1628_v24, %v1627_v47 }
 0x37f   : > { %2357 = vmatpush3.bf16.msra.mxu1 %v2356_v17 }
 0x380   : > { %2360 = vmatprep.subr.msk.bf16.mxu1 %vm3367_vm4, %v3238_v52 }
 0x44f   : > { %v1575_v9 = vpop.f32.mrb[66].mxu0 }
 0x450   : > { %2595 = vrcp.f32 %v1575_v9  ;;  %v1577_v48 = vpop.f32.mrb[67].mxu0 }
 0x451   : > { %2597 = vrcp.f32 %v1577_v48 }
 0x45a   : > { %v2596_v49 = vpop.eup %2595 }
 0x45b   : > { %v2598_v30 = vpop.eup %2597  ;;  %v1585_v56 = vrot.slane %v2596_v49, %v1584_v32 }
 0x45c   : > { %v1589_v57 = vrot.slane %v2598_v30, %v1584_v32 }
 0x45d   : > { %v1590_v12 = vmul.f32 %v1585_v56, %v1575_v9 }
 0x45e   : > { %v1591_v43 = vmul.f32 %v1589_v57, %v1577_v48 }
 0x45f   : > { %v1600_v44 = vadd.f32 %v2605_v1, %v1590_v12 }
 0x460   : > { %v1601_v42 = vadd.f32 %v1598_v11, %v1591_v43 }
 0x461   : > { %v1602_v55 = vsel %vm294_vm1, %v1600_v44, -inf }
 0x462   : > { %v1603_v58 = vsel %vm294_vm1, %v1601_v42, -inf }
 0x463   : > { %v1604_v19 = vmax.f32 %v1602_v55, %v1603_v58 }
 0x465   : > { %1605 = vmax.xlane.f32.xlu1 %v1604_v19 }
 0x4f2   : > { %v1606_v62 = vpop.xlane.xlu1 %1605 }
 0x4f3   : > { %v1607_v63 = vsub.f32 %v1600_v44, %v1606_v62  ;;  %v1608_v25 = vsub.f32 %v1601_v42, %v1606_v62 }
 0x4f5   : > { %v1609_v21 = vmul.f32 1.442695, %v1607_v63  ;;  %v1611_v37 = vmul.f32 1.442695, %v1608_v25 }
 0x4f7   : > { %2599 = vpow2.f32 %v1609_v21 }
 0x4f8   : > { %2601 = vpow2.f32 %v1611_v37 }
 0x501   : > { %v2600_v38 = vpop.eup %2599 }
 0x502   : > { %v2602_v2 = vpop.eup %2601 }
 0x503   : > { %1709 = vmatprep.mubr.f32.mxu1 %v2602_v2 }
 0x504   : > { %1710 = vmatmul.mubr.f32.vlgmr.msra.gmra.mrb[32].mxu1 %v2600_v38 }
 0x505   : > { %2363 = vmatpush3.bf16.xpose.msk.msra.mxu1 %vm3367_vm4, %v3249_v20 }
 0x506   : > { %2366 = vmatprep.subr.msk.bf16.mxu1 %vm3367_vm4, %v3251_v26 }
 0x50d   : > { %2369 = vmatpush3.bf16.xpose.msk.msra.mxu1 %vm3367_vm4, %v3267_v33 }
 0x50e   : > { %2372 = vmatprep.subr.msk.bf16.mxu1 %vm3367_vm4, %v3270_v3 }
 0x515   : > { %2375 = vmatpush3.bf16.xpose.msk.msra.mxu1 %vm3367_vm4, %v3285_v7 }
 0x516   : > { %2378 = vmatprep.subr.msk.bf16.mxu1 %vm3367_vm4, %v3288_v28 }
 0x51d   : > { %2381 = vmatpush3.bf16.xpose.msk.msra.mxu1 %vm3367_vm4, %v3303_v0 }
 0x51e   : > { %2384 = vmatprep.subr.msk.bf16.mxu1 %vm3367_vm4, %v3306_v5 }
 0x525   : > { %2387 = vmatpush3.bf16.xpose.msk.msra.mxu1 %vm3367_vm4, %v3321_v4 }
 0x526   : > { %2390 = vmatprep.subr.msk.bf16.mxu1 %vm3367_vm4, %v3324_v8 }
 0x52d   : > { %2393 = vmatpush3.bf16.xpose.msk.msra.mxu1 %vm3367_vm4, %v3333_v13 }
 0x52e   : > { %2396 = vmatprep.subr.msk.bf16.mxu1 %vm3367_vm4, %v2350_v15 }
 0x535   : > { %2399 = vmatpush3.bf16.xpose.msk.msra.mxu1 %vm3367_vm4, %v2352_v46 }
 0x536   : > { %2402 = vmatprep.subr.msk.bf16.mxu1 %vm3367_vm4, %v2354_v35 }
 0x53d   : > { %2405 = vmatpush3.bf16.xpose.msk.msra.mxu1 %vm3367_vm4, %v2356_v17 }
 0x5d7   : > { %v2175_v52 = vpop.f32.mrb[32].mxu1 }
 0x5d8   : > { %v2176_v20 = vpop.f32.mrb[33].mxu1 }
 0x5d9   : > { %v2177_v26 = vadd.f32 %v2176_v20, %v2175_v52 }
 0x5db   : > { %2603 = vrcp.f32 %v2177_v26 }
 0x5e5   : > { %v2604_v33 = vpop.eup %2603 }
 0x5e6   : > { %2210 = vmatprep.mubr.msk.f32.mxu1 %vm1716_vm3, %v2604_v33 }
 0x5e7   : > { %2211 = vmatmul.mubr.msk.f32.vlgmr.msra.gmra.mrb[34].mxu1 %vm1716_vm3, %v2604_v33 }
 0x6ba   : > { %v1882_v3 = vpop.f32.mrb[34].mxu1 }
 0x6bb   : > { %v1887_v50 = vmul.f32 %v2600_v38, %v1882_v3  ;;  %v1884_v51 = vpop.f32.mrb[35].mxu1 }
 0x6bc   : > { %v1888_v22 = vmul.f32 %v2602_v2, %v1884_v51 }
 0x6be   : > { %v1891_v23 = vcombine.low %v1887_v50, %v1888_v22 }
 0x6c0   : > { %1893 = vst [vmem:[%s267_s8] sm:$0xff] %v1891_v23 }
 0x6c1   : > { %2619 = shalt.err (!%p2616_p5)
}
 0x6c2   : > { %s2620_s20 = scalar_lea.hbm %s3422_s14, 128  ;;  %s2624_s30 = scalar_lea.hbm %s3475_s6, 256 }
 0x6c3   : > { %p2621_p6 = scmp.ne.s32.totalorder %s3422_s14, %s2620_s20  ;;  %p2625_p10 = scmp.lt.u32.totalorder %s3422_s14, %s3475_s6 }
 0x6c4   : > { %p2626_p11 = scmp.lt.u32.totalorder %s2624_s30, %s2620_s20  ;;  %p2628_p13 = scmp.lt.u32.totalorder %s2620_s20, %s3422_s14 }
 0x6c5   : > { %p2622_p7 = pnand %p2621_p6, %p2765_p4 }
 0x6c6   : > { %p2627_p12 = por %p2626_p11, %p2625_p10 }
 0x6c7   : > { %p2623_p9 = pneg %p2622_p7 }
 0x6c8   : > { %p2629_p0 = por %p2628_p13, %p2627_p12 }
 0x6ca   : > { %p2630_p1 = pnand %p2629_p0, %p2623_p9 }
 0x6cc   : > { %2633 = shalt.err (!%p2630_p1)
}
 0x6cd   : > { %2406 = dma.vmem_to_hbm [thread:$0]  (%p2765_p4), %s3424_s11, 128, %s3422_s14, %s1895_s16  }
 0x6ce PF: > { %p2412_p2 = scmp.ge.s32.totalorder %s2684_s26, 2  ;;  %s1924_s12 = sand.u32 1, %s2664_s21  }
 0x6cf   : > { %s1925_s13 = scalar_lea.sflag [#allocation5], %s1924_s12 }
 0x6d0   : > { %p2409_p3 = pnand %p2412_p2, %p2772_p8 }
 0x6d2   : > { %2659 = dma.done.wait (!%p2409_p3), %s1925_s13, 128  }
 0x6d3   : > { %2661 = vsyncadd (!%p2409_p3), %s1925_s13, 4294967168  ;;  %s19_s26 = sadd.s32 1, %s2684_s26   ;;  %s3521_s21 = smov %s2668_s22 }
 0x6d4   : > { %p16_p5 = scmp.ge.s32.totalorder %s19_s26, 4   ;;  %s3522_s22 = smov %s2672_s23 }
 0x6d5   : > { %s3523_s23 = smov %s2778_s10  ;;  %s3524_s24 = smov %s2680_s25 }
 0x6d6   : > { %s3525_s25 = smov %s3527_s29  ;;  %18 = sbr.rel (!%p16_p5) target bundleno = 4 (0x4), region = 86 }
 0x6dd   :  { %1930 = vsyncpa [#allocation5], 1 }
 0x6de   :  { %1932 = vsyncpa [#allocation5 + $0x1], 1 }

// kernel: tpu_custom_call.1
= control target key start
LH: loop header
LB: loop body
LE: loop exit
PB: predicated region body
PF: predicated region fallthrough
CT: control target
= control target key end

     0   :  { %11 = vsyncpa [#allocation5], 0  ;;  %s3469_s0 = inlined_call_operand.vmem [shape: f32[2,4,256], index: 0, kind: input, shape index: {}]   ;;  %s3470_s1 = inlined_call_operand.vmem [shape: f32[4,4], index: 1, kind: input, shape index: {}]   ;;  %s3471_s2 = inlined_call_operand.vmem [shape: f32[1,4], index: 2, kind: input, shape index: {}]   ;;  %s3472_s3 = inlined_call_operand.vmem [shape: f32[8,4], index: 3, kind: input, shape index: {}]   ;;  %s3473_s4 = inlined_call_operand.vmem [shape: f32[8,1], index: 4, kind: input, shape index: {}]   ;;  %s3474_s5 = inlined_call_operand.vmem [shape: f32[256,16], index: 5, kind: input, shape index: {}]   ;;  %s3475_s6 = inlined_call_operand.hbm [shape: f32[2,4,256], index: 6, kind: output, shape index: {}]  }
   0x1   :  { %13 = vsyncpa [#allocation5 + $0x1], 0  ;;  %s2725_s21 = smov 0   ;;  %s2727_s22 = smov 0  }
   0x2   :  { %s2729_s23 = smov 0   ;;  %s2731_s24 = smov 0  }
   0x3   :  { %s2733_s25 = smov 0   ;;  %s2735_s26 = smov 0  }
   0x4 LB: > { %s1991_s27 = sadd.s32 4294967295, %s2684_s26   ;;  %s1992_s28 = sadd.s32 4294967294, %s2684_s26   ;;  %s2684_s26 = sphi %s2735_s26, %s19_s26   ;;  %s2680_s25 = sphi %s2733_s25, %s3525_s25   ;;  %s2676_s24 = sphi %s2731_s24, %s3524_s24   ;;  %s2672_s23 = sphi %s2729_s23, %s3523_s23   ;;  %s2668_s22 = sphi %s2727_s22, %s3522_s22   ;;  %s2664_s21 = sphi %s2725_s21, %s3521_s21  }
   0x5   : > { %s38_s29 = sadd.s32 1, %s2680_s25  ;;  %s180_s30 = sadd.s32 1, %s2672_s23 }
   0x6   : > { %p40_p0 = scmp.ge.s32.totalorder %s38_s29, 2  ;;  %p190_p1 = scmp.ne.s32.totalorder %s2672_s23, %s2668_s22 }
   0x7   : > { %p191_p2 = scmp.eq.s32.totalorder %s1991_s27, 1  ;;  %p196_p3 = scmp.ne.s32.totalorder %s2668_s22, %s2664_s21 }
   0x8   : > { %s3527_s29 = smov (%p40_p0, %s38_s29), 0  ;;  %p197_p5 = scmp.eq.s32.totalorder %s1992_s28, 1 }
   0x9   : > { %p2765_p4 = por %p191_p2, %p190_p1  ;;  %s175_s8 = ssub.s32 %s2680_s25, %s3527_s29 }
   0xa   : > { %p1995_p6 = scmp.ge.s32.totalorder %s2684_s26, 1  ;;  %p178_p7 = scmp.eq.s32.totalorder %s175_s8, 0 }
   0xb   : > { %p2772_p8 = por %p197_p5, %p196_p3  ;;  %p238_p9 = scmp.lt.s32.totalorder %s2684_s26, 3 }
   0xc   : > { %s2778_s10 = scalar_select %p178_p7, %s2672_s23, %s180_s30  }
   0xd   : > { %p239_p10 = pnand %p1995_p6, %p238_p9 }
   0xf   : > { %242 = sbr.rel (%p239_p10) target bundleno = 1742 (0x6ce), region = 44 }
  0x16   : > { %p268_p11 = scmp.lt.s32.totalorder %s2676_s24, 1  ;;  %v2686_v0 = vmov 0.0   ;;  %vm290_vm0 = vcmask 31744   ;;  %vm294_vm1 = vcmask 1043456   ;;  %v379_v3 = vld [vmem:[%s3470_s1] sm:$0xf]  ;;  %v3476_v30 = vlaneseq }
  0x17   : > { %363 = vmatprep.mubr.f32.mxu0 %v2686_v0  ;;  %v281_v4 = vld [vmem:[%s3472_s3] sm:$0xff]  ;;  %2212 = vmatprep.subr.msk.mxu1 %vm290_vm0, %v379_v3  ;;  %v2687_v6 = vmov 0   ;;  %v2688_v36 = vmov 1.0   ;;  %vm1716_vm3 = vcmask 130048   ;;  %s265_s28 = sand.u32 1, %s2668_s22  }
  0x18   : > { %s269_s11 = scalar_select %p268_p11, %s2676_s24, 1  ;;  %2213 = vmatpush3.xpose.msk.msra.mxu1 %vm290_vm0, %v379_v3  ;;  %v282_v5 = vld [vmem:[%s3473_s4] sm:$0xff]  ;;  %2464 = vset.pattern.permute.xlu1 %v2687_v6  ;;  %vm374_vm2 = vcmp.lt.s32.totalorder %v3476_v30, 256  ;;  %vm3367_vm4 = vmpackc.low %vm1716_vm3, %vm1716_vm3 }
  0x19   : > { %285 = vperm.xlu1 %2464, %v282_v5   ;;  %377 = vst.msk [vmem:[#allocation3 + $0x10] ss:$8 sm:$0x3] %vm374_vm2, %v2688_v36  ;;  %v2842_v48 = vld [vmem:[%s3471_s2] ss:$0 sm:$0xff]  ;;  %s1996_s30 = sshll.u32 %s265_s28, 3 }
  0x1a   : > { %s2108_s12 = sshll.u32 %s269_s11, 3  ;;  %s267_s8 = scalar_lea.vmem [#allocation4], %s1996_s30 }
  0x1b   : > { %s2786_s15 = scalar_lea.vmem %s3469_s0, %s2108_s12  ;;  %s1912_s11 = sshll.u32 %s267_s8, 4  ;;  %s3424_s11 = int_to_ptr.vmem [resolvable:$true] %s1912_s11 }
  0x1c   : > { %v280_v1 = vld [vmem:[%s2786_s15] sm:$0xff]  ;;  %s1895_s16 = scalar_lea.sflag [#allocation5], %s265_s28  ;;  %s2606_s17 = scalar_lea.vmem %s3424_s11, 128 }
  0x1d   : > { %388 = vxpose.xlu0.b32.start.end [1/1] (short) %v280_v1, 128  ;;  %v289_v2 = vcombine.high %v280_v1, %v280_v1  ;;  %p2607_p12 = scmp.ne.s32.totalorder %s3424_s11, %s2606_s17 }
  0x1f   : > { %1999 = vmatprep.subr.msk.mxu0 %vm294_vm1, %v289_v2  ;;  %p2608_p13 = pnand %p2607_p12, %p2765_p4 }
  0x20   : > { %2000 = vmatpush1.msk.msra.mxu0 %vm294_vm1, %v280_v1 }
  0x21   : > { %2001 = vmatmul.mubr.msk.f32.vlgmr.msra.gmra.mrb[0].mxu0 %vm290_vm0, %v281_v4  ;;  %p2609_p0 = pneg %p2608_p13 }
  0x22   : > { %1016 = vmatprep.mubr.f32.mxu0 %v2686_v0 }
  0x5a   : > { %420 = vxpose.xlu0.b32.start.end [1/1] (short) %v289_v2, 128 }
  0x83   : > { %2465 = vset.pattern.permute.xlu0 %v2687_v6 }
  0x98   : > { %v286_v29 = vpop.permute.xlu1 %285 }
  0x9d   : > { %v404_v7 = vpop.trf.xlu0 }
  0x9e   : > { %2214 = vmatprep.mubr.msk.f32.mxu1 %vm290_vm0, %v404_v7 }
  0xa1   : > { %v405_v8 = vpop.trf.xlu0 }
  0xa2   : > { %2215 = vmatmul.mubr.msk.f32.vlgmr.msra.gmra.mrb[0].mxu1 %vm290_vm0, %v405_v8 }
  0xa5   : > { %v406_v9 = vpop.trf.xlu0 }
  0xa6   : > { %2217 = vmatprep.mubr.msk.f32.mxu1 %vm290_vm0, %v406_v9 }
  0xa9   : > { %v407_v10 = vpop.trf.xlu0 }
  0xaa   : > { %2218 = vmatmul.mubr.msk.f32.gmra.mrb[2].mxu1 %vm290_vm0, %v407_v10 }
  0xad   : > { %v408_v11 = vpop.trf.xlu0 }
  0xae   : > { %2220 = vmatprep.mubr.msk.f32.mxu1 %vm290_vm0, %v408_v11 }
  0xb1   : > { %v409_v12 = vpop.trf.xlu0 }
  0xb2   : > { %2221 = vmatmul.mubr.msk.f32.gmra.mrb[4].mxu1 %vm290_vm0, %v409_v12 }
  0xb5   : > { %v410_v13 = vpop.trf.xlu0 }
  0xb6   : > { %2223 = vmatprep.mubr.msk.f32.mxu1 %vm290_vm0, %v410_v13 }
  0xb9   : > { %v411_v14 = vpop.trf.xlu0 }
  0xba   : > { %2224 = vmatmul.mubr.msk.f32.gmra.mrb[6].mxu1 %vm290_vm0, %v411_v14 }
  0xbd   : > { %v412_v15 = vpop.trf.xlu0 }
  0xbe   : > { %2226 = vmatprep.mubr.msk.f32.mxu1 %vm290_vm0, %v412_v15 }
  0xc1   : > { %v413_v16 = vpop.trf.xlu0 }
  0xc2   : > { %2227 = vmatmul.mubr.msk.f32.gmra.mrb[8].mxu1 %vm290_vm0, %v413_v16 }
  0xc5   : > { %v414_v17 = vpop.trf.xlu0 }
  0xc6   : > { %2229 = vmatprep.mubr.msk.f32.mxu1 %vm290_vm0, %v414_v17 }
  0xc9   : > { %v415_v18 = vpop.trf.xlu0 }
  0xca   : > { %2230 = vmatmul.mubr.msk.f32.gmra.mrb[10].mxu1 %vm290_vm0, %v415_v18 }
  0xcd   : > { %v416_v19 = vpop.trf.xlu0 }
  0xce   : > { %2232 = vmatprep.mubr.msk.f32.mxu1 %vm290_vm0, %v416_v19 }
  0xd1   : > { %v417_v20 = vpop.trf.xlu0 }
  0xd2   : > { %2233 = vmatmul.mubr.msk.f32.gmra.mrb[12].mxu1 %vm290_vm0, %v417_v20 }
  0xd5   : > { %v418_v21 = vpop.trf.xlu0 }
  0xd6   : > { %2235 = vmatprep.mubr.msk.f32.mxu1 %vm290_vm0, %v418_v21 }
  0xd9   : > { %v419_v22 = vpop.trf.xlu0 }
  0xda   : > { %2236 = vmatmul.mubr.msk.f32.gmra.mrb[14].mxu1 %vm290_vm0, %v419_v22 }
  0xdd   : > { %v436_v23 = vpop.trf.xlu0 }
  0xde   : > { %2238 = vmatprep.mubr.msk.f32.mxu1 %vm290_vm0, %v436_v23 }
  0xe1   : > { %v437_v24 = vpop.trf.xlu0 }
  0xe2   : > { %2239 = vmatmul.mubr.msk.f32.gmra.mrb[16].mxu1 %vm290_vm0, %v437_v24 }
  0xe5   : > { %v438_v25 = vpop.trf.xlu0 }
  0xe6   : > { %2241 = vmatprep.mubr.msk.f32.mxu1 %vm290_vm0, %v438_v25 }
  0xe9   : > { %v439_v26 = vpop.trf.xlu0 }
  0xea   : > { %2242 = vmatmul.mubr.msk.f32.gmra.mrb[18].mxu1 %vm290_vm0, %v439_v26 }
  0xed   : > { %v440_v27 = vpop.trf.xlu0 }
  0xee   : > { %2244 = vmatprep.mubr.msk.f32.mxu1 %vm290_vm0, %v440_v27 }
  0xf1   : > { %v441_v28 = vpop.trf.xlu0 }
  0xf2   : > { %2245 = vmatmul.mubr.msk.f32.gmra.mrb[20].mxu1 %vm290_vm0, %v441_v28 }
  0xf4   : > { %v365_v31 = vpop.f32.mrb[0].mxu0 }
  0xf5   : > { %v442_v32 = vpop.trf.xlu0  ;;  %v366_v33 = vadd.f32 %v365_v31, %v286_v29  ;;  %v367_v34 = vpop.f32.mrb[1].mxu0 }
  0xf6   : > { %2247 = vmatprep.mubr.msk.f32.mxu1 %vm290_vm0, %v442_v32  ;;  %v368_v35 = vadd.f32 %v367_v34, %v286_v29 }
  0xf7   : > { %370 = vst [vmem:[#allocation3] sm:$0xff] %v366_v33 }
  0xf8   : > { %371 = vst [vmem:[#allocation3 + $0x8] sm:$0xff] %v368_v35 }
  0xf9   : > { %v443_v37 = vpop.trf.xlu0 }
  0xfa   : > { %2248 = vmatmul.mubr.msk.f32.gmra.mrb[22].mxu1 %vm290_vm0, %v443_v37 }
  0xfd   : > { %v444_v38 = vpop.trf.xlu0 }
  0xfe   : > { %2250 = vmatprep.mubr.msk.f32.mxu1 %vm290_vm0, %v444_v38  ;;  %v842_v39 = vld [vmem:[#allocation3] sm:$0xf] }
  0xff   : > { %v843_v40 = vld [vmem:[#allocation3 + $0x8] sm:$0xf] }
 0x100   : > { %2036 = vmatprep.subr.msk.mxu0 %vm294_vm1, %v843_v40 }
 0x101   : > { %v445_v41 = vpop.trf.xlu0  ;;  %2037 = vmatpush1.msk.msra.mxu0 %vm294_vm1, %v842_v39 }
 0x102   : > { %2251 = vmatmul.mubr.msk.f32.gmra.mrb[24].mxu1 %vm290_vm0, %v445_v41 }
 0x105   : > { %v446_v42 = vpop.trf.xlu0 }
 0x106   : > { %2253 = vmatprep.mubr.msk.f32.mxu1 %vm290_vm0, %v446_v42 }
 0x109   : > { %v447_v43 = vpop.trf.xlu0 }
 0x10a   : > { %2254 = vmatmul.mubr.msk.f32.gmra.mrb[26].mxu1 %vm290_vm0, %v447_v43 }
 0x10d   : > { %v448_v44 = vpop.trf.xlu0 }
 0x10e   : > { %2256 = vmatprep.mubr.msk.f32.mxu1 %vm290_vm0, %v448_v44 }
 0x111   : > { %v449_v45 = vpop.trf.xlu0 }
 0x112   : > { %2257 = vmatmul.mubr.msk.f32.gmra.mrb[28].mxu1 %vm290_vm0, %v449_v45 }
 0x115   : > { %v450_v46 = vpop.trf.xlu0 }
 0x116   : > { %2259 = vmatprep.mubr.msk.f32.mxu1 %vm290_vm0, %v450_v46 }
 0x119   : > { %v451_v47 = vpop.trf.xlu0 }
 0x11a   : > { %2260 = vmatmul.mubr.msk.f32.gmra.mrb[30].mxu1 %vm290_vm0, %v451_v47 }
 0x175   : > { %v2216_v49 = vpop.f32.mrb[0].mxu1 }
 0x176   : > { %v623_v50 = vadd.f32 %v2216_v49, %v2842_v48  ;;  %v617_v51 = vpop.f32.mrb[1].mxu1 }
 0x177   : > { %v618_v52 = vadd.f32 %v2842_v48, %v617_v51 }
 0x178   : > { %777 = vst.msk [vmem:[#allocation2 + $0x8] sm:$0xff] %vm290_vm0, %v623_v50 }
 0x179   : > { %776 = vst.msk [vmem:[#allocation2] sm:$0xff] %vm290_vm0, %v618_v52 }
 0x17d   : > { %v2219_v53 = vpop.f32.mrb[2].mxu1 }
 0x17e   : > { %v633_v54 = vadd.f32 %v2219_v53, %v2842_v48  ;;  %v627_v55 = vpop.f32.mrb[3].mxu1 }
 0x17f   : > { %v628_v56 = vadd.f32 %v2842_v48, %v627_v55  ;;  %v811_v58 = vld [vmem:[#allocation2 + $0x8] sm:$0xff] }
 0x180   : > { %779 = vst.msk [vmem:[#allocation2 + $0x18] sm:$0xff] %vm290_vm0, %v633_v54  ;;  %v810_v57 = vld [vmem:[#allocation2] sm:$0xff] }
 0x181   : > { %778 = vst.msk [vmem:[#allocation2 + $0x10] sm:$0xff] %vm290_vm0, %v628_v56  ;;  %2038 = vmatmul.mubr.msk.f32.vlgmr.msra.gmra.mrb[2].mxu0 %vm290_vm0, %v810_v57 }
 0x182   : > { %1022 = vmatprep.mubr.f32.mxu0 %v2686_v0 }
 0x185   : > { %v2222_v59 = vpop.f32.mrb[4].mxu1  ;;  %2039 = vmatmul.mubr.msk.f32.gmra.mrb[4].mxu0 %vm290_vm0, %v811_v58 }
 0x186   : > { %v643_v60 = vadd.f32 %v2222_v59, %v2842_v48  ;;  %v637_v61 = vpop.f32.mrb[5].mxu1  ;;  %1028 = vmatprep.mubr.f32.mxu0 %v2686_v0 }
 0x187   : > { %v638_v62 = vadd.f32 %v2842_v48, %v637_v61  ;;  %v813_v1 = vld [vmem:[#allocation2 + $0x18] sm:$0xff] }
 0x188   : > { %781 = vst.msk [vmem:[#allocation2 + $0x28] sm:$0xff] %vm290_vm0, %v643_v60  ;;  %v812_v63 = vld [vmem:[#allocation2 + $0x10] sm:$0xff] }
 0x189   : > { %780 = vst.msk [vmem:[#allocation2 + $0x20] sm:$0xff] %vm290_vm0, %v638_v62  ;;  %2040 = vmatmul.mubr.msk.f32.gmra.mrb[6].mxu0 %vm290_vm0, %v812_v63 }
 0x18a   : > { %1034 = vmatprep.mubr.f32.mxu0 %v2686_v0 }
 0x18d   : > { %v2225_v2 = vpop.f32.mrb[6].mxu1  ;;  %2041 = vmatmul.mubr.msk.f32.gmra.mrb[8].mxu0 %vm290_vm0, %v813_v1 }
 0x18e   : > { %v653_v3 = vadd.f32 %v2225_v2, %v2842_v48  ;;  %v647_v4 = vpop.f32.mrb[7].mxu1  ;;  %1040 = vmatprep.mubr.f32.mxu0 %v2686_v0 }
 0x18f   : > { %v648_v5 = vadd.f32 %v2842_v48, %v647_v4  ;;  %v815_v7 = vld [vmem:[#allocation2 + $0x28] sm:$0xff] }
 0x190   : > { %783 = vst.msk [vmem:[#allocation2 + $0x38] sm:$0xff] %vm290_vm0, %v653_v3  ;;  %v814_v6 = vld [vmem:[#allocation2 + $0x20] sm:$0xff] }
 0x191   : > { %782 = vst.msk [vmem:[#allocation2 + $0x30] sm:$0xff] %vm290_vm0, %v648_v5  ;;  %2042 = vmatmul.mubr.msk.f32.gmra.mrb[10].mxu0 %vm290_vm0, %v814_v6 }
 0x192   : > { %1046 = vmatprep.mubr.f32.mxu0 %v2686_v0 }
 0x195   : > { %v2228_v8 = vpop.f32.mrb[8].mxu1  ;;  %2043 = vmatmul.mubr.msk.f32.gmra.mrb[12].mxu0 %vm290_vm0, %v815_v7 }
 0x196   : > { %v663_v9 = vadd.f32 %v2228_v8, %v2842_v48  ;;  %v657_v10 = vpop.f32.mrb[9].mxu1  ;;  %1052 = vmatprep.mubr.f32.mxu0 %v2686_v0 }
 0x197   : > { %v658_v11 = vadd.f32 %v2842_v48, %v657_v10  ;;  %v817_v13 = vld [vmem:[#allocation2 + $0x38] sm:$0xff] }
 0x198   : > { %785 = vst.msk [vmem:[#allocation2 + $0x48] sm:$0xff] %vm290_vm0, %v663_v9  ;;  %v816_v12 = vld [vmem:[#allocation2 + $0x30] sm:$0xff] }
 0x199   : > { %784 = vst.msk [vmem:[#allocation2 + $0x40] sm:$0xff] %vm290_vm0, %v658_v11  ;;  %2044 = vmatmul.mubr.msk.f32.gmra.mrb[14].mxu0 %vm290_vm0, %v816_v12 }
 0x19a   : > { %1058 = vmatprep.mubr.f32.mxu0 %v2686_v0 }
 0x19d   : > { %v2231_v14 = vpop.f32.mrb[10].mxu1  ;;  %2045 = vmatmul.mubr.msk.f32.gmra.mrb[16].mxu0 %vm290_vm0, %v817_v13 }
 0x19e   : > { %v673_v15 = vadd.f32 %v2231_v14, %v2842_v48  ;;  %v667_v16 = vpop.f32.mrb[11].mxu1  ;;  %1064 = vmatprep.mubr.f32.mxu0 %v2686_v0 }
 0x19f   : > { %v668_v17 = vadd.f32 %v2842_v48, %v667_v16  ;;  %v819_v19 = vld [vmem:[#allocation2 + $0x48] sm:$0xff] }
 0x1a0   : > { %787 = vst.msk [vmem:[#allocation2 + $0x58] sm:$0xff] %vm290_vm0, %v673_v15  ;;  %v818_v18 = vld [vmem:[#allocation2 + $0x40] sm:$0xff] }
 0x1a1   : > { %786 = vst.msk [vmem:[#allocation2 + $0x50] sm:$0xff] %vm290_vm0, %v668_v17  ;;  %2046 = vmatmul.mubr.msk.f32.gmra.mrb[18].mxu0 %vm290_vm0, %v818_v18 }
 0x1a2   : > { %1070 = vmatprep.mubr.f32.mxu0 %v2686_v0 }
 0x1a5   : > { %v2234_v20 = vpop.f32.mrb[12].mxu1  ;;  %2047 = vmatmul.mubr.msk.f32.gmra.mrb[20].mxu0 %vm290_vm0, %v819_v19  ;;  %v845_v19 = vld [vmem:[#allocation3 + $0x8] sm:$0xf0] }
 0x1a6   : > { %v683_v21 = vadd.f32 %v2234_v20, %v2842_v48  ;;  %v677_v22 = vpop.f32.mrb[13].mxu1  ;;  %1076 = vmatprep.mubr.f32.mxu0 %v2686_v0  ;;  %v847_v20 = vld [vmem:[#allocation3 + $0x18] sm:$0x1] }
 0x1a7   : > { %v678_v23 = vadd.f32 %v2842_v48, %v677_v22  ;;  %v821_v25 = vld [vmem:[#allocation2 + $0x58] sm:$0xff]  ;;  %v1505_v22 = vrot.slane %v847_v20, 4 }
 0x1a8   : > { %789 = vst.msk [vmem:[#allocation2 + $0x68] sm:$0xff] %vm290_vm0, %v683_v21  ;;  %v820_v24 = vld [vmem:[#allocation2 + $0x50] sm:$0xff] }
 0x1a9   : > { %788 = vst.msk [vmem:[#allocation2 + $0x60] sm:$0xff] %vm290_vm0, %v678_v23  ;;  %2048 = vmatmul.mubr.msk.f32.gmra.mrb[22].mxu0 %vm290_vm0, %v820_v24 }
 0x1aa   : > { %1082 = vmatprep.mubr.f32.mxu0 %v2686_v0 }
 0x1ad   : > { %v2237_v26 = vpop.f32.mrb[14].mxu1  ;;  %2049 = vmatmul.mubr.msk.f32.gmra.mrb[24].mxu0 %vm290_vm0, %v821_v25 }
 0x1ae   : > { %v693_v27 = vadd.f32 %v2237_v26, %v2842_v48  ;;  %v687_v28 = vpop.f32.mrb[15].mxu1  ;;  %1088 = vmatprep.mubr.f32.mxu0 %v2686_v0 }
 0x1af   : > { %v688_v29 = vadd.f32 %v2842_v48, %v687_v28  ;;  %v823_v32 = vld [vmem:[#allocation2 + $0x68] sm:$0xff] }
 0x1b0   : > { %791 = vst.msk [vmem:[#allocation2 + $0x78] sm:$0xff] %vm290_vm0, %v693_v27  ;;  %v822_v31 = vld [vmem:[#allocation2 + $0x60] sm:$0xff] }
 0x1b1   : > { %790 = vst.msk [vmem:[#allocation2 + $0x70] sm:$0xff] %vm290_vm0, %v688_v29  ;;  %2050 = vmatmul.mubr.msk.f32.gmra.mrb[26].mxu0 %vm290_vm0, %v822_v31 }
 0x1b2   : > { %1094 = vmatprep.mubr.f32.mxu0 %v2686_v0 }
 0x1b5   : > { %v2240_v33 = vpop.f32.mrb[16].mxu1  ;;  %2051 = vmatmul.mubr.msk.f32.gmra.mrb[28].mxu0 %vm290_vm0, %v823_v32 }
 0x1b6   : > { %v703_v34 = vadd.f32 %v2240_v33, %v2842_v48  ;;  %v697_v35 = vpop.f32.mrb[17].mxu1  ;;  %1100 = vmatprep.mubr.f32.mxu0 %v2686_v0 }
 0x1b7   : > { %v698_v36 = vadd.f32 %v2842_v48, %v697_v35  ;;  %v825_v38 = vld [vmem:[#allocation2 + $0x78] sm:$0xff] }
 0x1b8   : > { %793 = vst.msk [vmem:[#allocation2 + $0x88] sm:$0xff] %vm290_vm0, %v703_v34  ;;  %v824_v37 = vld [vmem:[#allocation2 + $0x70] sm:$0xff] }
 0x1b9   : > { %792 = vst.msk [vmem:[#allocation2 + $0x80] sm:$0xff] %vm290_vm0, %v698_v36  ;;  %2052 = vmatmul.mubr.msk.f32.gmra.mrb[30].mxu0 %vm290_vm0, %v824_v37 }
 0x1ba   : > { %1106 = vmatprep.mubr.f32.mxu0 %v2686_v0 }
 0x1bd   : > { %v2243_v39 = vpop.f32.mrb[18].mxu1  ;;  %2053 = vmatmul.mubr.msk.f32.gmra.mrb[32].mxu0 %vm290_vm0, %v825_v38 }
 0x1be   : > { %v713_v40 = vadd.f32 %v2243_v39, %v2842_v48  ;;  %v707_v41 = vpop.f32.mrb[19].mxu1  ;;  %1112 = vmatprep.mubr.f32.mxu0 %v2686_v0 }
 0x1bf   : > { %v708_v42 = vadd.f32 %v2842_v48, %v707_v41  ;;  %v827_v44 = vld [vmem:[#allocation2 + $0x88] sm:$0xff] }
 0x1c0   : > { %795 = vst.msk [vmem:[#allocation2 + $0x98] sm:$0xff] %vm290_vm0, %v713_v40  ;;  %v826_v43 = vld [vmem:[#allocation2 + $0x80] sm:$0xff] }
 0x1c1   : > { %794 = vst.msk [vmem:[#allocation2 + $0x90] sm:$0xff] %vm290_vm0, %v708_v42  ;;  %2054 = vmatmul.mubr.msk.f32.gmra.mrb[34].mxu0 %vm290_vm0, %v826_v43 }
 0x1c2   : > { %1118 = vmatprep.mubr.f32.mxu0 %v2686_v0 }
 0x1c5   : > { %v2246_v45 = vpop.f32.mrb[20].mxu1  ;;  %2055 = vmatmul.mubr.msk.f32.gmra.mrb[36].mxu0 %vm290_vm0, %v827_v44 }
 0x1c6   : > { %v723_v46 = vadd.f32 %v2246_v45, %v2842_v48  ;;  %v717_v47 = vpop.f32.mrb[21].mxu1  ;;  %1124 = vmatprep.mubr.f32.mxu0 %v2686_v0 }
 0x1c7   : > { %v718_v49 = vadd.f32 %v2842_v48, %v717_v47  ;;  %v829_v51 = vld [vmem:[#allocation2 + $0x98] sm:$0xff] }
 0x1c8   : > { %797 = vst.msk [vmem:[#allocation2 + $0xa8] sm:$0xff] %vm290_vm0, %v723_v46  ;;  %v828_v50 = vld [vmem:[#allocation2 + $0x90] sm:$0xff] }
 0x1c9   : > { %796 = vst.msk [vmem:[#allocation2 + $0xa0] sm:$0xff] %vm290_vm0, %v718_v49  ;;  %2056 = vmatmul.mubr.msk.f32.gmra.mrb[38].mxu0 %vm290_vm0, %v828_v50 }
 0x1ca   : > { %1130 = vmatprep.mubr.f32.mxu0 %v2686_v0 }
 0x1cd   : > { %v2249_v52 = vpop.f32.mrb[22].mxu1  ;;  %2057 = vmatmul.mubr.msk.f32.gmra.mrb[40].mxu0 %vm290_vm0, %v829_v51 }
 0x1ce   : > { %v733_v53 = vadd.f32 %v2249_v52, %v2842_v48  ;;  %v727_v54 = vpop.f32.mrb[23].mxu1  ;;  %1136 = vmatprep.mubr.f32.mxu0 %v2686_v0 }
 0x1cf   : > { %v728_v55 = vadd.f32 %v2842_v48, %v727_v54  ;;  %v831_v57 = vld [vmem:[#allocation2 + $0xa8] sm:$0xff] }
 0x1d0   : > { %799 = vst.msk [vmem:[#allocation2 + $0xb8] sm:$0xff] %vm290_vm0, %v733_v53  ;;  %v830_v56 = vld [vmem:[#allocation2 + $0xa0] sm:$0xff] }
 0x1d1   : > { %798 = vst.msk [vmem:[#allocation2 + $0xb0] sm:$0xff] %vm290_vm0, %v728_v55  ;;  %2058 = vmatmul.mubr.msk.f32.gmra.mrb[42].mxu0 %vm290_vm0, %v830_v56 }
 0x1d2   : > { %1142 = vmatprep.mubr.f32.mxu0 %v2686_v0 }
 0x1d5   : > { %v2252_v58 = vpop.f32.mrb[24].mxu1  ;;  %2059 = vmatmul.mubr.msk.f32.gmra.mrb[44].mxu0 %vm290_vm0, %v831_v57 }
 0x1d6   : > { %v743_v59 = vadd.f32 %v2252_v58, %v2842_v48  ;;  %v737_v60 = vpop.f32.mrb[25].mxu1  ;;  %1148 = vmatprep.mubr.f32.mxu0 %v2686_v0 }
 0x1d7   : > { %v738_v61 = vadd.f32 %v2842_v48, %v737_v60  ;;  %v833_v63 = vld [vmem:[#allocation2 + $0xb8] sm:$0xff] }
 0x1d8   : > { %801 = vst.msk [vmem:[#allocation2 + $0xc8] sm:$0xff] %vm290_vm0, %v743_v59  ;;  %v832_v62 = vld [vmem:[#allocation2 + $0xb0] sm:$0xff] }
 0x1d9   : > { %800 = vst.msk [vmem:[#allocation2 + $0xc0] sm:$0xff] %vm290_vm0, %v738_v61  ;;  %2060 = vmatmul.mubr.msk.f32.gmra.mrb[46].mxu0 %vm290_vm0, %v832_v62 }
 0x1da   : > { %1154 = vmatprep.mubr.f32.mxu0 %v2686_v0 }
 0x1dd   : > { %v2255_v1 = vpop.f32.mrb[26].mxu1  ;;  %2061 = vmatmul.mubr.msk.f32.gmra.mrb[48].mxu0 %vm290_vm0, %v833_v63 }
 0x1de   : > { %v753_v2 = vadd.f32 %v2255_v1, %v2842_v48  ;;  %v747_v3 = vpop.f32.mrb[27].mxu1  ;;  %1160 = vmatprep.mubr.f32.mxu0 %v2686_v0 }
 0x1df   : > { %v748_v4 = vadd.f32 %v2842_v48, %v747_v3  ;;  %v835_v6 = vld [vmem:[#allocation2 + $0xc8] sm:$0xff] }
 0x1e0   : > { %803 = vst.msk [vmem:[#allocation2 + $0xd8] sm:$0xff] %vm290_vm0, %v753_v2  ;;  %v834_v5 = vld [vmem:[#allocation2 + $0xc0] sm:$0xff] }
 0x1e1   : > { %802 = vst.msk [vmem:[#allocation2 + $0xd0] sm:$0xff] %vm290_vm0, %v748_v4  ;;  %2062 = vmatmul.mubr.msk.f32.gmra.mrb[50].mxu0 %vm290_vm0, %v834_v5 }
 0x1e2   : > { %1166 = vmatprep.mubr.f32.mxu0 %v2686_v0 }
 0x1e5   : > { %v2258_v7 = vpop.f32.mrb[28].mxu1  ;;  %2063 = vmatmul.mubr.msk.f32.gmra.mrb[52].mxu0 %vm290_vm0, %v835_v6 }
 0x1e6   : > { %v763_v8 = vadd.f32 %v2258_v7, %v2842_v48  ;;  %v757_v9 = vpop.f32.mrb[29].mxu1  ;;  %1172 = vmatprep.mubr.f32.mxu0 %v2686_v0 }
 0x1e7   : > { %v758_v10 = vadd.f32 %v2842_v48, %v757_v9  ;;  %v837_v12 = vld [vmem:[#allocation2 + $0xd8] sm:$0xff] }
 0x1e8   : > { %805 = vst.msk [vmem:[#allocation2 + $0xe8] sm:$0xff] %vm290_vm0, %v763_v8  ;;  %v836_v11 = vld [vmem:[#allocation2 + $0xd0] sm:$0xff] }
 0x1e9   : > { %804 = vst.msk [vmem:[#allocation2 + $0xe0] sm:$0xff] %vm290_vm0, %v758_v10  ;;  %2064 = vmatmul.mubr.msk.f32.gmra.mrb[54].mxu0 %vm290_vm0, %v836_v11 }
 0x1ea   : > { %1178 = vmatprep.mubr.f32.mxu0 %v2686_v0 }
 0x1ed   : > { %v2261_v13 = vpop.f32.mrb[30].mxu1  ;;  %2065 = vmatmul.mubr.msk.f32.gmra.mrb[56].mxu0 %vm290_vm0, %v837_v12 }
 0x1ee   : > { %v773_v14 = vadd.f32 %v2261_v13, %v2842_v48  ;;  %v767_v15 = vpop.f32.mrb[31].mxu1  ;;  %1184 = vmatprep.mubr.f32.mxu0 %v2686_v0 }
 0x1ef   : > { %v768_v16 = vadd.f32 %v2842_v48, %v767_v15  ;;  %v839_v18 = vld [vmem:[#allocation2 + $0xe8] sm:$0xff]  ;;  %v1504_v48 = vrot.slane %v845_v19, 4 }
 0x1f0   : > { %807 = vst.msk [vmem:[#allocation2 + $0xf8] sm:$0xff] %vm290_vm0, %v773_v14  ;;  %v838_v17 = vld [vmem:[#allocation2 + $0xe0] sm:$0xff] }
 0x1f1   : > { %806 = vst.msk [vmem:[#allocation2 + $0xf0] sm:$0xff] %vm290_vm0, %v768_v16  ;;  %2066 = vmatmul.mubr.msk.f32.gmra.mrb[58].mxu0 %vm290_vm0, %v838_v17  ;;  %v1506_v24 = vsel %vm294_vm1, %v1504_v48, %v1505_v22 }
 0x1f2   : > { %1190 = vmatprep.mubr.f32.mxu0 %v2686_v0 }
 0x1f5   : > { %2067 = vmatmul.mubr.msk.f32.gmra.mrb[60].mxu0 %vm290_vm0, %v839_v18 }
 0x1f6   : > { %1196 = vmatprep.mubr.f32.mxu0 %v2686_v0 }
 0x1f7   : > { %v841_v23 = vld [vmem:[#allocation2 + $0xf8] sm:$0xff] }
 0x1f8   : > { %v840_v21 = vld [vmem:[#allocation2 + $0xf0] sm:$0xff] }
 0x1f9   : > { %2068 = vmatmul.mubr.msk.f32.gmra.mrb[62].mxu0 %vm290_vm0, %v840_v21 }
 0x1fa   : > { %1202 = vmatprep.mubr.f32.mxu0 %v2686_v0 }
 0x1fd   : > { %2069 = vmatmul.mubr.msk.f32.gmra.mrb[64].mxu0 %vm290_vm0, %v841_v23 }
 0x1fe   : > { %1573 = vmatprep.mubr.f32.mxu0 %v1506_v24 }
 0x254   : > { %v2972_v25 = vpop.f32.mrb[2].mxu0 }
 0x255   : > { %v2974_v26 = vpop.f32.mrb[3].mxu0 }
 0x256   : > { %v1209_v27 = vmax.f32 %v2972_v25, %v2974_v26 }
 0x258   : > { %1210 = vmax.xlane.f32.xlu1 %v1209_v27  ;;  %v2978_v28 = vpop.f32.mrb[4].mxu0 }
 0x259   : > { %v2980_v29 = vpop.f32.mrb[5].mxu0 }
 0x25a   : > { %v1212_v0 = vmax.f32 %v2978_v28, %v2980_v29 }
 0x25c   : > { %1213 = vmax.xlane.f32.xlu1 %v1212_v0  ;;  %v2984_v31 = vpop.f32.mrb[6].mxu0 }
 0x25d   : > { %v2986_v32 = vpop.f32.mrb[7].mxu0 }
 0x25e   : > { %v1215_v33 = vmax.f32 %v2984_v31, %v2986_v32 }
 0x260   : > { %1216 = vmax.xlane.f32.xlu1 %v1215_v33  ;;  %v2990_v34 = vpop.f32.mrb[8].mxu0 }
 0x261   : > { %v2992_v35 = vpop.f32.mrb[9].mxu0 }
 0x262   : > { %v1218_v36 = vmax.f32 %v2990_v34, %v2992_v35 }
 0x264   : > { %1219 = vmax.xlane.f32.xlu1 %v1218_v36  ;;  %v2996_v37 = vpop.f32.mrb[10].mxu0 }
 0x265   : > { %v2998_v38 = vpop.f32.mrb[11].mxu0 }
 0x266   : > { %v1221_v39 = vmax.f32 %v2996_v37, %v2998_v38 }
 0x268   : > { %1222 = vmax.xlane.f32.xlu1 %v1221_v39  ;;  %v3002_v40 = vpop.f32.mrb[12].mxu0 }
 0x269   : > { %v3004_v41 = vpop.f32.mrb[13].mxu0 }
 0x26a   : > { %v1224_v42 = vmax.f32 %v3002_v40, %v3004_v41 }
 0x26c   : > { %1225 = vmax.xlane.f32.xlu1 %v1224_v42  ;;  %v3008_v43 = vpop.f32.mrb[14].mxu0 }
 0x26d   : > { %v3010_v44 = vpop.f32.mrb[15].mxu0 }
 0x26e   : > { %v1227_v45 = vmax.f32 %v3008_v43, %v3010_v44 }
 0x270   : > { %1228 = vmax.xlane.f32.xlu1 %v1227_v45  ;;  %v3014_v46 = vpop.f32.mrb[16].mxu0 }
 0x271   : > { %v3016_v47 = vpop.f32.mrb[17].mxu0 }
 0x272   : > { %v1230_v49 = vmax.f32 %v3014_v46, %v3016_v47 }
 0x274   : > { %1231 = vmax.xlane.f32.xlu1 %v1230_v49  ;;  %v3020_v50 = vpop.f32.mrb[18].mxu0 }
 0x275   : > { %v3022_v51 = vpop.f32.mrb[19].mxu0 }
 0x276   : > { %v1233_v52 = vmax.f32 %v3020_v50, %v3022_v51 }
 0x278   : > { %1234 = vmax.xlane.f32.xlu0 %v1233_v52  ;;  %v3026_v53 = vpop.f32.mrb[20].mxu0 }
 0x279   : > { %v3028_v54 = vpop.f32.mrb[21].mxu0 }
 0x27a   : > { %v1236_v55 = vmax.f32 %v3026_v53, %v3028_v54 }
 0x27c   : > { %1237 = vmax.xlane.f32.xlu1 %v1236_v55  ;;  %v3032_v56 = vpop.f32.mrb[22].mxu0 }
 0x27d   : > { %v3034_v57 = vpop.f32.mrb[23].mxu0 }
 0x27e   : > { %v1239_v58 = vmax.f32 %v3032_v56, %v3034_v57 }
 0x280   : > { %1240 = vmax.xlane.f32.xlu1 %v1239_v58  ;;  %v3038_v59 = vpop.f32.mrb[24].mxu0 }
 0x281   : > { %v3040_v60 = vpop.f32.mrb[25].mxu0 }
 0x282   : > { %v1242_v61 = vmax.f32 %v3038_v59, %v3040_v60 }
 0x284   : > { %1243 = vmax.xlane.f32.xlu1 %v1242_v61  ;;  %v3044_v62 = vpop.f32.mrb[26].mxu0 }
 0x285   : > { %v3046_v63 = vpop.f32.mrb[27].mxu0 }
 0x286   : > { %v1245_v1 = vmax.f32 %v3044_v62, %v3046_v63 }
 0x288   : > { %1246 = vmax.xlane.f32.xlu1 %v1245_v1  ;;  %v3050_v2 = vpop.f32.mrb[28].mxu0 }
 0x289   : > { %v3052_v3 = vpop.f32.mrb[29].mxu0 }
 0x28a   : > { %v1248_v4 = vmax.f32 %v3050_v2, %v3052_v3 }
 0x28c   : > { %1249 = vmax.xlane.f32.xlu1 %v1248_v4  ;;  %v3056_v5 = vpop.f32.mrb[30].mxu0 }
 0x28d   : > { %v3058_v6 = vpop.f32.mrb[31].mxu0 }
 0x28e   : > { %v1251_v7 = vmax.f32 %v3056_v5, %v3058_v6 }
 0x290   : > { %1252 = vmax.xlane.f32.xlu1 %v1251_v7  ;;  %v3062_v8 = vpop.f32.mrb[32].mxu0 }
 0x291   : > { %v3064_v9 = vpop.f32.mrb[33].mxu0 }
 0x292   : > { %v1254_v10 = vmax.f32 %v3062_v8, %v3064_v9 }
 0x294   : > { %1255 = vmax.xlane.f32.xlu1 %v1254_v10  ;;  %v3068_v11 = vpop.f32.mrb[34].mxu0 }
 0x295   : > { %v3070_v12 = vpop.f32.mrb[35].mxu0 }
 0x296   : > { %v1257_v13 = vmax.f32 %v3068_v11, %v3070_v12 }
 0x298   : > { %1258 = vmax.xlane.f32.xlu1 %v1257_v13  ;;  %v3074_v14 = vpop.f32.mrb[36].mxu0 }
 0x299   : > { %v3076_v15 = vpop.f32.mrb[37].mxu0 }
 0x29a   : > { %v1260_v16 = vmax.f32 %v3074_v14, %v3076_v15 }
 0x29c   : > { %1261 = vmax.xlane.f32.xlu1 %v1260_v16  ;;  %v3080_v17 = vpop.f32.mrb[38].mxu0 }
 0x29d   : > { %v3082_v18 = vpop.f32.mrb[39].mxu0 }
 0x29e   : > { %v1263_v19 = vmax.f32 %v3080_v17, %v3082_v18 }
 0x2a0   : > { %1264 = vmax.xlane.f32.xlu1 %v1263_v19  ;;  %v3086_v20 = vpop.f32.mrb[40].mxu0 }
 0x2a1   : > { %v3088_v21 = vpop.f32.mrb[41].mxu0 }
 0x2a2   : > { %v1266_v48 = vmax.f32 %v3086_v20, %v3088_v21 }
 0x2a4   : > { %1267 = vmax.xlane.f32.xlu1 %v1266_v48  ;;  %v3092_v22 = vpop.f32.mrb[42].mxu0 }
 0x2a5   : > { %v3094_v23 = vpop.f32.mrb[43].mxu0 }
 0x2a6   : > { %v1269_v24 = vmax.f32 %v3092_v22, %v3094_v23 }
 0x2a8   : > { %1270 = vmax.xlane.f32.xlu1 %v1269_v24  ;;  %v3098_v27 = vpop.f32.mrb[44].mxu0 }
 0x2a9   : > { %v3100_v0 = vpop.f32.mrb[45].mxu0 }
 0x2aa   : > { %v1272_v33 = vmax.f32 %v3098_v27, %v3100_v0 }
 0x2ac   : > { %1273 = vmax.xlane.f32.xlu1 %v1272_v33  ;;  %v3104_v36 = vpop.f32.mrb[46].mxu0 }
 0x2ad   : > { %v3106_v39 = vpop.f32.mrb[47].mxu0 }
 0x2ae   : > { %v1275_v42 = vmax.f32 %v3104_v36, %v3106_v39 }
 0x2b0   : > { %1276 = vmax.xlane.f32.xlu1 %v1275_v42  ;;  %v3110_v45 = vpop.f32.mrb[48].mxu0 }
 0x2b1   : > { %v3112_v49 = vpop.f32.mrb[49].mxu0 }
 0x2b2   : > { %v1278_v52 = vmax.f32 %v3110_v45, %v3112_v49 }
 0x2b4   : > { %1279 = vmax.xlane.f32.xlu1 %v1278_v52  ;;  %v3116_v55 = vpop.f32.mrb[50].mxu0 }
 0x2b5   : > { %v3118_v58 = vpop.f32.mrb[51].mxu0 }
 0x2b6   : > { %v1281_v61 = vmax.f32 %v3116_v55, %v3118_v58 }
 0x2b8   : > { %1282 = vmax.xlane.f32.xlu1 %v1281_v61  ;;  %v3122_v1 = vpop.f32.mrb[52].mxu0 }
 0x2b9   : > { %3492 = vst [vmem:[#allocation7_spill] sm:$0xff] %v3122_v1  ;;  %v3124_v4 = vpop.f32.mrb[53].mxu0 }
 0x2ba   : > { %3493 = vst [vmem:[#allocation8_spill] sm:$0xff] %v3124_v4  ;;  %v1284_v7 = vmax.f32 %v3122_v1, %v3124_v4 }
 0x2bc   : > { %1285 = vmax.xlane.f32.xlu1 %v1284_v7  ;;  %v3128_v10 = vpop.f32.mrb[54].mxu0 }
 0x2bd   : > { %3494 = vst [vmem:[#allocation9_spill] sm:$0xff] %v3128_v10  ;;  %v3130_v13 = vpop.f32.mrb[55].mxu0 }
 0x2be   : > { %3495 = vst [vmem:[#allocation10_spill] sm:$0xff] %v3130_v13  ;;  %v1287_v16 = vmax.f32 %v3128_v10, %v3130_v13 }
 0x2c0   : > { %1288 = vmax.xlane.f32.xlu1 %v1287_v16  ;;  %v3134_v19 = vpop.f32.mrb[56].mxu0 }
 0x2c1   : > { %3496 = vst [vmem:[#allocation11_spill] sm:$0xff] %v3134_v19  ;;  %v3136_v48 = vpop.f32.mrb[57].mxu0 }
 0x2c2   : > { %3497 = vst [vmem:[#allocation12_spill] sm:$0xff] %v3136_v48  ;;  %v1290_v24 = vmax.f32 %v3134_v19, %v3136_v48 }
 0x2c4   : > { %1291 = vmax.xlane.f32.xlu1 %v1290_v24  ;;  %v3140_v33 = vpop.f32.mrb[58].mxu0 }
 0x2c5   : > { %3498 = vst [vmem:[#allocation13_spill] sm:$0xff] %v3140_v33  ;;  %v3142_v42 = vpop.f32.mrb[59].mxu0 }
 0x2c6   : > { %3499 = vst [vmem:[#allocation14_spill] sm:$0xff] %v3142_v42  ;;  %v1293_v52 = vmax.f32 %v3140_v33, %v3142_v42 }
 0x2c8   : > { %1294 = vmax.xlane.f32.xlu1 %v1293_v52  ;;  %v3146_v61 = vpop.f32.mrb[60].mxu0 }
 0x2c9   : > { %3500 = vst [vmem:[#allocation15_spill] sm:$0xff] %v3146_v61  ;;  %v3148_v7 = vpop.f32.mrb[61].mxu0 }
 0x2ca   : > { %3501 = vst [vmem:[#allocation16_spill] sm:$0xff] %v3148_v7  ;;  %v1296_v16 = vmax.f32 %v3146_v61, %v3148_v7 }
 0x2cc   : > { %1297 = vmax.xlane.f32.xlu1 %v1296_v16  ;;  %v3152_v30 = vpop.f32.mrb[62].mxu0 }
 0x2cd   : > { %3502 = vst [vmem:[#allocation17_spill] sm:$0xff] %v3152_v30  ;;  %v3154_v48 = vpop.f32.mrb[63].mxu0 }
 0x2ce   : > { %3503 = vst [vmem:[#allocation18_spill] sm:$0xff] %v3154_v48  ;;  %v1299_v24 = vmax.f32 %v3152_v30, %v3154_v48 }
 0x2d0   : > { %1300 = vmax.xlane.f32.xlu1 %v1299_v24  ;;  %v3158_v19 = vpop.f32.mrb[64].mxu0 }
 0x2d1   : > { %v3160_v42 = vpop.f32.mrb[65].mxu0 }
 0x2d2   : > { %3504 = vst [vmem:[#allocation19_spill] sm:$0xff] %v3160_v42  ;;  %v1302_v52 = vmax.f32 %v3158_v19, %v3160_v42 }
 0x2d4   : > { %1303 = vmax.xlane.f32.xlu1 %v1302_v52 }
 0x2e5   : > { %v1211_v33 = vpop.xlane.xlu1 %1210 }
 0x2e6   : > { %v1305_v7 = vsub.f32 %v2972_v25, %v1211_v33  ;;  %v1306_v16 = vsub.f32 %v2974_v26, %v1211_v33 }
 0x2e8   : > { %v1369_v61 = vmul.f32 1.442695, %v1305_v7  ;;  %v1371_v13 = vmul.f32 1.442695, %v1306_v16 }
 0x2e9   : > { %v1214_v10 = vpop.xlane.xlu1 %1213 }
 0x2ea   : > { %v1307_v4 = vsub.f32 %v2978_v28, %v1214_v10  ;;  %v1308_v24 = vsub.f32 %v2980_v29, %v1214_v10  ;;  %2467 = vpow2.f32 %v1369_v61 }
 0x2eb   : > { %2469 = vpow2.f32 %v1371_v13 }
 0x2ec   : > { %v1373_v48 = vmul.f32 1.442695, %v1307_v4  ;;  %v1375_v30 = vmul.f32 1.442695, %v1308_v24 }
 0x2ed   : > { %v1217_v1 = vpop.xlane.xlu1 %1216 }
 0x2ee   : > { %2471 = vpow2.f32 %v1373_v48  ;;  %v1309_v52 = vsub.f32 %v2984_v31, %v1217_v1  ;;  %v1310_v42 = vsub.f32 %v2986_v32, %v1217_v1 }
 0x2ef   : > { %2473 = vpow2.f32 %v1375_v30 }
 0x2f0   : > { %v1377_v25 = vmul.f32 1.442695, %v1309_v52  ;;  %v1379_v26 = vmul.f32 1.442695, %v1310_v42 }
 0x2f1   : > { %v1220_v33 = vpop.xlane.xlu1 %1219 }
 0x2f2   : > { %v1311_v7 = vsub.f32 %v2990_v34, %v1220_v33  ;;  %v1312_v28 = vsub.f32 %v2992_v35, %v1220_v33  ;;  %2475 = vpow2.f32 %v1377_v25 }
 0x2f3   : > { %2477 = vpow2.f32 %v1379_v26 }
 0x2f4   : > { %v1381_v29 = vmul.f32 1.442695, %v1311_v7  ;;  %v1383_v10 = vmul.f32 1.442695, %v1312_v28  ;;  %v2468_v13 = vpop.eup %2467 }
 0x2f5   : > { %v1223_v4 = vpop.xlane.xlu1 %1222  ;;  %v2470_v32 = vpop.eup %2469 }
 0x2f6   : > { %2479 = vpow2.f32 %v1381_v29  ;;  %v1313_v48 = vsub.f32 %v2996_v37, %v1223_v4  ;;  %v1314_v31 = vsub.f32 %v2998_v38, %v1223_v4 }
 0x2f7   : > { %2481 = vpow2.f32 %v1383_v10 }
 0x2f8   : > { %v2472_v30 = vpop.eup %2471  ;;  %v1385_v1 = vmul.f32 1.442695, %v1313_v48  ;;  %v1387_v61 = vmul.f32 1.442695, %v1314_v31 }
 0x2f9   : > { %v2474_v42 = vpop.eup %2473  ;;  %v1226_v34 = vpop.xlane.xlu1 %1225  ;;  %v2264_v16 = vpack.c.bf16 %v2472_v30, %v2468_v13 }
 0x2fa   : > { %v1315_v35 = vsub.f32 %v3002_v40, %v1226_v34  ;;  %v1316_v24 = vsub.f32 %v3004_v41, %v1226_v34  ;;  %v2262_v52 = vpack.c.bf16 %v2474_v42, %v2470_v32  ;;  %2483 = vpow2.f32 %v1385_v1 }
 0x2fb   : > { %2485 = vpow2.f32 %v1387_v61 }
 0x2fc   : > { %v1389_v25 = vmul.f32 1.442695, %v1315_v35  ;;  %v1391_v26 = vmul.f32 1.442695, %v1316_v24  ;;  %2263 = vmatprep.subr.bf16.mxu0 %v2262_v52  ;;  %v2476_v38 = vpop.eup %2475 }
 0x2fd   : > { %2265 = vmatpush1.bf16.xpose.msra.mxu0 %v2264_v16  ;;  %v1229_v37 = vpop.xlane.xlu1 %1228  ;;  %v2478_v28 = vpop.eup %2477 }
 0x2fe   : > { %2487 = vpow2.f32 %v1389_v25  ;;  %v1317_v33 = vsub.f32 %v3008_v43, %v1229_v37  ;;  %v1318_v7 = vsub.f32 %v3010_v44, %v1229_v37 }
 0x2ff   : > { %2489 = vpow2.f32 %v1391_v26 }
 0x300   : > { %v2480_v29 = vpop.eup %2479  ;;  %v1393_v40 = vmul.f32 1.442695, %v1317_v33  ;;  %v1395_v41 = vmul.f32 1.442695, %v1318_v7 }
 0x301   : > { %v2482_v10 = vpop.eup %2481  ;;  %v1232_v4 = vpop.xlane.xlu1 %1231  ;;  %v2268_v13 = vpack.c.bf16 %v2480_v29, %v2476_v38 }
 0x302   : > { %v1319_v48 = vsub.f32 %v3014_v46, %v1232_v4  ;;  %v1320_v31 = vsub.f32 %v3016_v47, %v1232_v4  ;;  %v2266_v32 = vpack.c.bf16 %v2482_v10, %v2478_v28  ;;  %2491 = vpow2.f32 %v1393_v40 }
 0x303   : > { %2493 = vpow2.f32 %v1395_v41 }
 0x304   : > { %v1397_v30 = vmul.f32 1.442695, %v1319_v48  ;;  %v1399_v1 = vmul.f32 1.442695, %v1320_v31  ;;  %2267 = vmatprep.subr.bf16.mxu0 %v2266_v32  ;;  %v2484_v44 = vpop.eup %2483 }
 0x305   : > { %2269 = vmatpush1.bf16.xpose.msra.mxu0 %v2268_v13  ;;  %v1235_v43 = vpop.xlane.xlu0 %1234  ;;  %v2486_v34 = vpop.eup %2485 }
 0x306   : > { %2495 = vpow2.f32 %v1397_v30  ;;  %v1321_v42 = vsub.f32 %v3020_v50, %v1235_v43  ;;  %v1322_v61 = vsub.f32 %v3022_v51, %v1235_v43 }
 0x307   : > { %2497 = vpow2.f32 %v1399_v1 }
 0x308   : > { %v2488_v16 = vpop.eup %2487  ;;  %v1401_v46 = vmul.f32 1.442695, %v1321_v42  ;;  %v1403_v47 = vmul.f32 1.442695, %v1322_v61 }
 0x309   : > { %v2490_v35 = vpop.eup %2489  ;;  %v1238_v24 = vpop.xlane.xlu1 %1237  ;;  %v2272_v52 = vpack.c.bf16 %v2488_v16, %v2484_v44 }
 0x30a   : > { %v1323_v25 = vsub.f32 %v3026_v53, %v1238_v24  ;;  %v1324_v26 = vsub.f32 %v3028_v54, %v1238_v24  ;;  %v2270_v37 = vpack.c.bf16 %v2490_v35, %v2486_v34  ;;  %2499 = vpow2.f32 %v1401_v46 }
 0x30b   : > { %2501 = vpow2.f32 %v1403_v47 }
 0x30c   : > { %v1405_v38 = vmul.f32 1.442695, %v1323_v25  ;;  %v1407_v33 = vmul.f32 1.442695, %v1324_v26  ;;  %2271 = vmatprep.subr.bf16.mxu0 %v2270_v37  ;;  %v2492_v51 = vpop.eup %2491 }
 0x30d   : > { %2273 = vmatpush1.bf16.xpose.msra.mxu0 %v2272_v52  ;;  %v1241_v50 = vpop.xlane.xlu1 %1240  ;;  %v2494_v29 = vpop.eup %2493 }
 0x30e   : > { %2503 = vpow2.f32 %v1405_v38  ;;  %v1325_v7 = vsub.f32 %v3032_v56, %v1241_v50  ;;  %v1326_v28 = vsub.f32 %v3034_v57, %v1241_v50 }
 0x30f   : > { %2505 = vpow2.f32 %v1407_v33 }
 0x310   : > { %v2496_v40 = vpop.eup %2495  ;;  %v1409_v53 = vmul.f32 1.442695, %v1325_v7  ;;  %v1411_v54 = vmul.f32 1.442695, %v1326_v28 }
 0x311   : > { %v2498_v10 = vpop.eup %2497  ;;  %v1244_v41 = vpop.xlane.xlu1 %1243  ;;  %v2276_v4 = vpack.c.bf16 %v2496_v40, %v2492_v51 }
 0x312   : > { %v1327_v13 = vsub.f32 %v3038_v59, %v1244_v41  ;;  %v1328_v48 = vsub.f32 %v3040_v60, %v1244_v41  ;;  %v2274_v31 = vpack.c.bf16 %v2498_v10, %v2494_v29  ;;  %2507 = vpow2.f32 %v1409_v53 }
 0x313   : > { %2509 = vpow2.f32 %v1411_v54 }
 0x314   : > { %v1413_v32 = vmul.f32 1.442695, %v1327_v13  ;;  %v1415_v30 = vmul.f32 1.442695, %v1328_v48  ;;  %2275 = vmatprep.subr.bf16.mxu0 %v2274_v31  ;;  %v2500_v57 = vpop.eup %2499 }
 0x315   : > { %2277 = vmatpush1.bf16.xpose.msra.mxu0 %v2276_v4  ;;  %v1247_v56 = vpop.xlane.xlu1 %1246  ;;  %v2502_v44 = vpop.eup %2501 }
 0x316   : > { %2511 = vpow2.f32 %v1413_v32  ;;  %v1329_v1 = vsub.f32 %v3044_v62, %v1247_v56  ;;  %v1330_v43 = vsub.f32 %v3046_v63, %v1247_v56 }
 0x317   : > { %2513 = vpow2.f32 %v1415_v30 }
 0x318   : > { %v2504_v42 = vpop.eup %2503  ;;  %v1417_v59 = vmul.f32 1.442695, %v1329_v1  ;;  %v1419_v60 = vmul.f32 1.442695, %v1330_v43 }
 0x319   : > { %v2506_v61 = vpop.eup %2505  ;;  %v1250_v34 = vpop.xlane.xlu1 %1249  ;;  %v2280_v16 = vpack.c.bf16 %v2504_v42, %v2500_v57 }
 0x31a   : > { %v1331_v46 = vsub.f32 %v3050_v2, %v1250_v34  ;;  %v1332_v35 = vsub.f32 %v3052_v3, %v1250_v34  ;;  %v2278_v47 = vpack.c.bf16 %v2506_v61, %v2502_v44  ;;  %2515 = vpow2.f32 %v1417_v59 }
 0x31b   : > { %2517 = vpow2.f32 %v1419_v60 }
 0x31c   : > { %v1421_v24 = vmul.f32 1.442695, %v1331_v46  ;;  %v1423_v52 = vmul.f32 1.442695, %v1332_v35  ;;  %2279 = vmatprep.subr.bf16.mxu0 %v2278_v47  ;;  %v2508_v63 = vpop.eup %2507 }
 0x31d   : > { %2281 = vmatpush1.bf16.xpose.msra.mxu0 %v2280_v16  ;;  %v1253_v62 = vpop.xlane.xlu1 %1252  ;;  %v2510_v37 = vpop.eup %2509 }
 0x31e   : > { %2519 = vpow2.f32 %v1421_v24  ;;  %v1333_v25 = vsub.f32 %v3056_v5, %v1253_v62  ;;  %v1334_v26 = vsub.f32 %v3058_v6, %v1253_v62 }
 0x31f   : > { %2521 = vpow2.f32 %v1423_v52 }
 0x320   : > { %v2512_v38 = vpop.eup %2511  ;;  %v1425_v2 = vmul.f32 1.442695, %v1333_v25  ;;  %v1427_v3 = vmul.f32 1.442695, %v1334_v26 }
 0x321   : > { %v2514_v33 = vpop.eup %2513  ;;  %v1256_v50 = vpop.xlane.xlu1 %1255  ;;  %v2284_v51 = vpack.c.bf16 %v2512_v38, %v2508_v63 }
 0x322   : > { %v1335_v7 = vsub.f32 %v3062_v8, %v1256_v50  ;;  %v1336_v28 = vsub.f32 %v3064_v9, %v1256_v50  ;;  %v2282_v29 = vpack.c.bf16 %v2514_v33, %v2510_v37  ;;  %2523 = vpow2.f32 %v1425_v2 }
 0x323   : > { %2525 = vpow2.f32 %v1427_v3 }
 0x324   : > { %v1429_v40 = vmul.f32 1.442695, %v1335_v7  ;;  %v1431_v53 = vmul.f32 1.442695, %v1336_v28  ;;  %2283 = vmatprep.subr.bf16.mxu0 %v2282_v29  ;;  %v2516_v6 = vpop.eup %2515 }
 0x325   : > { %2285 = vmatpush1.bf16.xpose.msra.mxu0 %v2284_v51  ;;  %v1259_v5 = vpop.xlane.xlu1 %1258  ;;  %v2518_v41 = vpop.eup %2517 }
 0x326   : > { %2527 = vpow2.f32 %v1429_v40  ;;  %v1337_v10 = vsub.f32 %v3068_v11, %v1259_v5  ;;  %v1338_v54 = vsub.f32 %v3070_v12, %v1259_v5 }
 0x327   : > { %2529 = vpow2.f32 %v1431_v53 }
 0x328   : > { %v2520_v4 = vpop.eup %2519  ;;  %v1433_v8 = vmul.f32 1.442695, %v1337_v10  ;;  %v1435_v9 = vmul.f32 1.442695, %v1338_v54 }
 0x329   : > { %v2522_v13 = vpop.eup %2521  ;;  %v1262_v48 = vpop.xlane.xlu1 %1261  ;;  %v2288_v31 = vpack.c.bf16 %v2520_v4, %v2516_v6 }
 0x32a   : > { %v1339_v32 = vsub.f32 %v3074_v14, %v1262_v48  ;;  %v1340_v30 = vsub.f32 %v3076_v15, %v1262_v48  ;;  %v2286_v56 = vpack.c.bf16 %v2522_v13, %v2518_v41  ;;  %2531 = vpow2.f32 %v1433_v8 }
 0x32b   : > { %2533 = vpow2.f32 %v1435_v9 }
 0x32c   : > { %v1437_v57 = vmul.f32 1.442695, %v1339_v32  ;;  %v1439_v1 = vmul.f32 1.442695, %v1340_v30  ;;  %2287 = vmatprep.subr.bf16.mxu0 %v2286_v56  ;;  %v2524_v12 = vpop.eup %2523 }
 0x32d   : > { %2289 = vmatpush1.bf16.xpose.msra.mxu0 %v2288_v31  ;;  %v1265_v11 = vpop.xlane.xlu1 %1264  ;;  %v2526_v42 = vpop.eup %2525 }
 0x32e   : > { %2535 = vpow2.f32 %v1437_v57  ;;  %v1341_v43 = vsub.f32 %v3080_v17, %v1265_v11  ;;  %v1342_v44 = vsub.f32 %v3082_v18, %v1265_v11  ;;  %v3505_v57 = vld [vmem:[#allocation7_spill] sm:$0xff]  ;;  %v3506_v11 = vld [vmem:[#allocation8_spill] sm:$0xff] }
 0x32f   : > { %2537 = vpow2.f32 %v1439_v1 }
 0x330   : > { %v2528_v59 = vpop.eup %2527  ;;  %v1441_v14 = vmul.f32 1.442695, %v1341_v43  ;;  %v1443_v15 = vmul.f32 1.442695, %v1342_v44 }
 0x331   : > { %v2530_v61 = vpop.eup %2529  ;;  %v1268_v60 = vpop.xlane.xlu1 %1267  ;;  %v2292_v34 = vpack.c.bf16 %v2528_v59, %v2524_v12  ;;  %v3507_v59 = vld [vmem:[#allocation9_spill] sm:$0xff] }
 0x332   : > { %v1343_v16 = vsub.f32 %v3086_v20, %v1268_v60  ;;  %v1344_v46 = vsub.f32 %v3088_v21, %v1268_v60  ;;  %v2290_v35 = vpack.c.bf16 %v2530_v61, %v2526_v42  ;;  %2539 = vpow2.f32 %v1441_v14  ;;  %v3508_v61 = vld [vmem:[#allocation10_spill] sm:$0xff] }
 0x333   : > { %2541 = vpow2.f32 %v1443_v15 }
 0x334   : > { %v1445_v47 = vmul.f32 1.442695, %v1343_v16  ;;  %v1447_v24 = vmul.f32 1.442695, %v1344_v46  ;;  %2291 = vmatprep.subr.bf16.mxu0 %v2290_v35  ;;  %v2532_v18 = vpop.eup %2531 }
 0x335   : > { %2293 = vmatpush1.bf16.xpose.msra.mxu0 %v2292_v34  ;;  %v1271_v17 = vpop.xlane.xlu1 %1270  ;;  %v2534_v63 = vpop.eup %2533 }
 0x336   : > { %2543 = vpow2.f32 %v1445_v47  ;;  %v1345_v52 = vsub.f32 %v3092_v22, %v1271_v17  ;;  %v1346_v62 = vsub.f32 %v3094_v23, %v1271_v17  ;;  %v3509_v17 = vld [vmem:[#allocation11_spill] sm:$0xff] }
 0x337   : > { %2545 = vpow2.f32 %v1447_v24 }
 0x338   : > { %v2536_v25 = vpop.eup %2535  ;;  %v1449_v20 = vmul.f32 1.442695, %v1345_v52  ;;  %v1451_v21 = vmul.f32 1.442695, %v1346_v62  ;;  %v3510_v52 = vld [vmem:[#allocation12_spill] sm:$0xff] }
 0x339   : > { %v2538_v26 = vpop.eup %2537  ;;  %v1274_v37 = vpop.xlane.xlu1 %1273  ;;  %v2296_v38 = vpack.c.bf16 %v2536_v25, %v2532_v18 }
 0x33a   : > { %v1347_v2 = vsub.f32 %v3098_v27, %v1274_v37  ;;  %v1348_v33 = vsub.f32 %v3100_v0, %v1274_v37  ;;  %v2294_v3 = vpack.c.bf16 %v2538_v26, %v2534_v63  ;;  %2547 = vpow2.f32 %v1449_v20  ;;  %v3511_v37 = vld [vmem:[#allocation13_spill] sm:$0xff] }
 0x33b   : > { %2549 = vpow2.f32 %v1451_v21 }
 0x33c   : > { %v1453_v50 = vmul.f32 1.442695, %v1347_v2  ;;  %v1455_v51 = vmul.f32 1.442695, %v1348_v33  ;;  %2295 = vmatprep.subr.bf16.mxu0 %v2294_v3  ;;  %v2540_v23 = vpop.eup %2539  ;;  %v3512_v2 = vld [vmem:[#allocation14_spill] sm:$0xff] }
 0x33d   : > { %2297 = vmatpush1.bf16.xpose.msra.mxu0 %v2296_v38  ;;  %v1277_v22 = vpop.xlane.xlu1 %1276  ;;  %v2542_v29 = vpop.eup %2541 }
 0x33e   : > { %2551 = vpow2.f32 %v1453_v50  ;;  %v1349_v7 = vsub.f32 %v3104_v36, %v1277_v22  ;;  %v1350_v28 = vsub.f32 %v3106_v39, %v1277_v22 }
 0x33f   : > { %2553 = vpow2.f32 %v1455_v51 }
 0x340   : > { %v2544_v40 = vpop.eup %2543  ;;  %v1457_v27 = vmul.f32 1.442695, %v1349_v7  ;;  %v1459_v0 = vmul.f32 1.442695, %v1350_v28 }
 0x341   : > { %v2546_v53 = vpop.eup %2545  ;;  %v1280_v5 = vpop.xlane.xlu1 %1279  ;;  %v2300_v6 = vpack.c.bf16 %v2544_v40, %v2540_v23 }
 0x342   : > { %v1351_v10 = vsub.f32 %v3110_v45, %v1280_v5  ;;  %v1352_v54 = vsub.f32 %v3112_v49, %v1280_v5  ;;  %v2298_v41 = vpack.c.bf16 %v2546_v53, %v2542_v29  ;;  %2555 = vpow2.f32 %v1457_v27  ;;  %v3513_v29 = vld [vmem:[#allocation15_spill] sm:$0xff]  ;;  %v3514_v27 = vld [vmem:[#allocation16_spill] sm:$0xff] }
 0x343   : > { %2557 = vpow2.f32 %v1459_v0 }
 0x344   : > { %v1461_v4 = vmul.f32 1.442695, %v1351_v10  ;;  %v1463_v8 = vmul.f32 1.442695, %v1352_v54  ;;  %2299 = vmatprep.subr.bf16.mxu0 %v2298_v41  ;;  %v2548_v39 = vpop.eup %2547  ;;  %v3515_v41 = vld [vmem:[#allocation17_spill] sm:$0xff] }
 0x345   : > { %2301 = vmatpush1.bf16.xpose.msra.mxu0 %v2300_v6  ;;  %v1283_v36 = vpop.xlane.xlu1 %1282  ;;  %v2550_v48 = vpop.eup %2549 }
 0x346   : > { %2559 = vpow2.f32 %v1461_v4  ;;  %v1353_v13 = vsub.f32 %v3116_v55, %v1283_v36  ;;  %v1354_v9 = vsub.f32 %v3118_v58, %v1283_v36 }
 0x347   : > { %2561 = vpow2.f32 %v1463_v8  ;;  %v3516_v8 = vld [vmem:[#allocation18_spill] sm:$0xff] }
 0x348   : > { %v2552_v31 = vpop.eup %2551  ;;  %v1465_v45 = vmul.f32 1.442695, %v1353_v13  ;;  %v1467_v49 = vmul.f32 1.442695, %v1354_v9 }
 0x349   : > { %v2554_v32 = vpop.eup %2553  ;;  %v1286_v30 = vpop.xlane.xlu1 %1285  ;;  %v2304_v56 = vpack.c.bf16 %v2552_v31, %v2548_v39 }
 0x34a   : > { %v1355_v1 = vsub.f32 %v3505_v57, %v1286_v30  ;;  %v1356_v12 = vsub.f32 %v3506_v11, %v1286_v30  ;;  %v2302_v43 = vpack.c.bf16 %v2554_v32, %v2550_v48  ;;  %2563 = vpow2.f32 %v1465_v45  ;;  %v3517_v30 = vld [vmem:[#allocation19_spill] sm:$0xff] }
 0x34b   : > { %2565 = vpow2.f32 %v1467_v49 }
 0x34c   : > { %v1469_v44 = vmul.f32 1.442695, %v1355_v1  ;;  %v1471_v42 = vmul.f32 1.442695, %v1356_v12  ;;  %2303 = vmatprep.subr.bf16.mxu0 %v2302_v43  ;;  %v2556_v58 = vpop.eup %2555 }
 0x34d   : > { %2305 = vmatpush1.bf16.xpose.msra.mxu0 %v2304_v56  ;;  %v1289_v55 = vpop.xlane.xlu1 %1288  ;;  %v2558_v60 = vpop.eup %2557 }
 0x34e   : > { %2567 = vpow2.f32 %v1469_v44  ;;  %v1357_v14 = vsub.f32 %v3507_v59, %v1289_v55  ;;  %v1358_v15 = vsub.f32 %v3508_v61, %v1289_v55 }
 0x34f   : > { %2569 = vpow2.f32 %v1471_v42 }
 0x350   : > { %v2560_v34 = vpop.eup %2559  ;;  %v1473_v16 = vmul.f32 1.442695, %v1357_v14  ;;  %v1475_v35 = vmul.f32 1.442695, %v1358_v15 }
 0x351   : > { %v2562_v46 = vpop.eup %2561  ;;  %v1292_v47 = vpop.xlane.xlu1 %1291  ;;  %v2308_v24 = vpack.c.bf16 %v2560_v34, %v2556_v58  ;;  %v844_v34 = vld [vmem:[#allocation3] sm:$0xf0] }
 0x352   : > { %v1359_v18 = vsub.f32 %v3509_v17, %v1292_v47  ;;  %v1360_v62 = vsub.f32 %v3510_v52, %v1292_v47  ;;  %v2306_v63 = vpack.c.bf16 %v2562_v46, %v2558_v60  ;;  %2571 = vpow2.f32 %v1473_v16  ;;  %v846_v16 = vld [vmem:[#allocation3 + $0x10] sm:$0x1]  ;;  %v1630_v17 = vld [vmem:[%s3474_s5 + $0x88] sm:$0xff] }
 0x353   : > { %2573 = vpow2.f32 %v1475_v35  ;;  %v1501_v46 = vrot.slane %v844_v34, 4  ;;  %v1502_v35 = vrot.slane %v846_v16, 4  ;;  %v1643_v34 = vld [vmem:[%s3474_s5 + $0xf0] sm:$0xff]  ;;  %v1644_v16 = vld [vmem:[%s3474_s5 + $0xf8] sm:$0xff] }
 0x354   : > { %v1477_v25 = vmul.f32 1.442695, %v1359_v18  ;;  %v1479_v20 = vmul.f32 1.442695, %v1360_v62  ;;  %2307 = vmatprep.subr.bf16.mxu0 %v2306_v63  ;;  %v2564_v21 = vpop.eup %2563  ;;  %v1613_v18 = vld [vmem:[%s3474_s5] sm:$0xff]  ;;  %v1614_v62 = vld [vmem:[%s3474_s5 + $0x8] sm:$0xff] }
 0x355   : > { %2309 = vmatpush1.bf16.xpose.msra.mxu0 %v2308_v24  ;;  %v1295_v26 = vpop.xlane.xlu1 %1294  ;;  %v2566_v3 = vpop.eup %2565  ;;  %v1503_v47 = vsel %vm294_vm1, %v1501_v46, %v1502_v35  ;;  %v1629_v24 = vld [vmem:[%s3474_s5 + $0x80] sm:$0xff]  ;;  %v1631_v63 = vld [vmem:[%s3474_s5 + $0x90] sm:$0xff]  ;;  %v2354_v35 = vpack.c.bf16 %v1644_v16, %v1643_v34 }
 0x356   : > { %2575 = vpow2.f32 %v1477_v25  ;;  %v1361_v38 = vsub.f32 %v3511_v37, %v1295_v26  ;;  %v1362_v33 = vsub.f32 %v3512_v2, %v1295_v26  ;;  %v3238_v52 = vpack.c.bf16 %v1630_v17, %v1629_v24  ;;  %v1632_v25 = vld [vmem:[%s3474_s5 + $0x98] sm:$0xff]  ;;  %v1634_v2 = vld [vmem:[%s3474_s5 + $0xa8] sm:$0xff] }
 0x357   : > { %2577 = vpow2.f32 %v1479_v20  ;;  %v3249_v20 = vpack.c.bf16 %v1614_v62, %v1613_v18  ;;  %v3251_v26 = vpack.c.bf16 %v1632_v25, %v1631_v63  ;;  %v1616_v37 = vld [vmem:[%s3474_s5 + $0x18] sm:$0xff] }
 0x358   : > { %v2568_v50 = vpop.eup %2567  ;;  %v1481_v51 = vmul.f32 1.442695, %v1361_v38  ;;  %v1483_v23 = vmul.f32 1.442695, %v1362_v33  ;;  %v1633_v38 = vld [vmem:[%s3474_s5 + $0xa0] sm:$0xff]  ;;  %2327 = vmatprep.subr.bf16.mxu1 %v3238_v52  ;;  %v1628_v24 = vld [vmem:[%s3474_s5 + $0x78] sm:$0xff] }
 0x359   : > { %v2570_v22 = vpop.eup %2569  ;;  %v1298_v7 = vpop.xlane.xlu1 %1297  ;;  %v2312_v28 = vpack.c.bf16 %v2568_v50, %v2564_v21  ;;  %v1615_v21 = vld [vmem:[%s3474_s5 + $0x10] sm:$0xff]  ;;  %2329 = vmatpush3.bf16.msra.mxu1 %v3249_v20  ;;  %v1617_v50 = vld [vmem:[%s3474_s5 + $0x20] sm:$0xff] }
 0x35a   : > { %v1363_v40 = vsub.f32 %v3513_v29, %v1298_v7  ;;  %v1364_v53 = vsub.f32 %v3514_v27, %v1298_v7  ;;  %v2310_v0 = vpack.c.bf16 %v2570_v22, %v2566_v3  ;;  %2579 = vpow2.f32 %v1481_v51  ;;  %2331 = vmatprep.subr.bf16.mxu1 %v3251_v26  ;;  %v1618_v51 = vld [vmem:[%s3474_s5 + $0x28] sm:$0xff]  ;;  %v1635_v22 = vld [vmem:[%s3474_s5 + $0xb0] sm:$0xff]  ;;  %v1637_v27 = vld [vmem:[%s3474_s5 + $0xc0] sm:$0xff] }
 0x35b   : > { %2581 = vpow2.f32 %v1483_v23  ;;  %v3267_v33 = vpack.c.bf16 %v1616_v37, %v1615_v21  ;;  %v3270_v3 = vpack.c.bf16 %v1634_v2, %v1633_v38  ;;  %v1636_v23 = vld [vmem:[%s3474_s5 + $0xb8] sm:$0xff]  ;;  %v3285_v7 = vpack.c.bf16 %v1618_v51, %v1617_v50  ;;  %v1619_v29 = vld [vmem:[%s3474_s5 + $0x30] sm:$0xff] }
 0x35c   : > { %v1485_v5 = vmul.f32 1.442695, %v1363_v40  ;;  %v1487_v6 = vmul.f32 1.442695, %v1364_v53  ;;  %2311 = vmatprep.subr.bf16.mxu0 %v2310_v0  ;;  %v2572_v54 = vpop.eup %2571  ;;  %v1620_v40 = vld [vmem:[%s3474_s5 + $0x38] sm:$0xff]  ;;  %v1638_v53 = vld [vmem:[%s3474_s5 + $0xc8] sm:$0xff] }
 0x35d   : > { %2313 = vmatpush1.bf16.xpose.msra.mxu0 %v2312_v28  ;;  %v1301_v10 = vpop.xlane.xlu1 %1300  ;;  %v2574_v39 = vpop.eup %2573  ;;  %2333 = vmatpush3.bf16.msra.mxu1 %v3267_v33  ;;  %v3288_v28 = vpack.c.bf16 %v1636_v23, %v1635_v22  ;;  %v3303_v0 = vpack.c.bf16 %v1620_v40, %v1619_v29 }
 0x35e   : > { %2583 = vpow2.f32 %v1485_v5  ;;  %v1365_v4 = vsub.f32 %v3515_v41, %v1301_v10  ;;  %v1366_v36 = vsub.f32 %v3516_v8, %v1301_v10  ;;  %2335 = vmatprep.subr.bf16.mxu1 %v3270_v3  ;;  %v3306_v5 = vpack.c.bf16 %v1638_v53, %v1637_v27  ;;  %v1622_v10 = vld [vmem:[%s3474_s5 + $0x48] sm:$0xff]  ;;  %v1640_v41 = vld [vmem:[%s3474_s5 + $0xd8] sm:$0xff] }
 0x35f   : > { %2585 = vpow2.f32 %v1487_v6  ;;  %v1621_v6 = vld [vmem:[%s3474_s5 + $0x40] sm:$0xff] }
 0x360   : > { %v2576_v13 = vpop.eup %2575  ;;  %v1489_v9 = vmul.f32 1.442695, %v1365_v4  ;;  %v1491_v31 = vmul.f32 1.442695, %v1366_v36  ;;  %v3321_v4 = vpack.c.bf16 %v1622_v10, %v1621_v6  ;;  %v1623_v36 = vld [vmem:[%s3474_s5 + $0x50] sm:$0xff] }
 0x361   : > { %v2578_v48 = vpop.eup %2577  ;;  %v1304_v45 = vpop.xlane.xlu1 %1303  ;;  %v2316_v32 = vpack.c.bf16 %v2576_v13, %v2572_v54  ;;  %2337 = vmatpush3.bf16.msra.mxu1 %v3285_v7  ;;  %v1639_v54 = vld [vmem:[%s3474_s5 + $0xd0] sm:$0xff] }
 0x362   : > { %v1367_v49 = vsub.f32 %v3158_v19, %v1304_v45  ;;  %v1368_v56 = vsub.f32 %v3517_v30, %v1304_v45  ;;  %v2314_v57 = vpack.c.bf16 %v2578_v48, %v2574_v39  ;;  %2587 = vpow2.f32 %v1489_v9  ;;  %2339 = vmatprep.subr.bf16.mxu1 %v3288_v28  ;;  %v1624_v39 = vld [vmem:[%s3474_s5 + $0x58] sm:$0xff] }
 0x363   : > { %2589 = vpow2.f32 %v1491_v31  ;;  %v3324_v8 = vpack.c.bf16 %v1640_v41, %v1639_v54  ;;  %v3333_v13 = vpack.c.bf16 %v1624_v39, %v1623_v36  ;;  %v3518_v31 = vlaneseq }
 0x364   : > { %v1493_v1 = vmul.f32 1.442695, %v1367_v49  ;;  %v1495_v11 = vmul.f32 1.442695, %v1368_v56  ;;  %2315 = vmatprep.subr.bf16.mxu0 %v2314_v57  ;;  %v2580_v12 = vpop.eup %2579 }
 0x365   : > { %2317 = vmatpush1.bf16.xpose.msra.mxu0 %v2316_v32  ;;  %v2582_v43 = vpop.eup %2581  ;;  %2341 = vmatpush3.bf16.msra.mxu1 %v3303_v0  ;;  %v1583_v45 = vshrl.u32 %v3518_v31, 7 }
 0x366   : > { %2591 = vpow2.f32 %v1493_v1  ;;  %2343 = vmatprep.subr.bf16.mxu1 %v3306_v5  ;;  %v2605_v1 = vld [vmem:[%s2786_s15] sm:$0xff]  ;;  %s2109_s15 = sshll.u32 %s2676_s24, 7  ;;  %s2689_s24 = smov [#allocation4]  }
 0x367   : > { %2593 = vpow2.f32 %v1495_v11  ;;  %v1584_v32 = vsub.s32 4, %v1583_v45  ;;  %v1598_v11 = vcombine.high %v2605_v1, %v2605_v1  ;;  %s3422_s14 = scalar_lea.hbm %s3475_s6, %s2109_s15  ;;  %s2610_s18 = sshll.u32 %s2689_s24, 4  ;;  %s2611_s18 = int_to_ptr.vmem [resolvable:$false] %s2610_s18 }
 0x368   : > { %v2584_v44 = vpop.eup %2583  ;;  %s2612_s19 = scalar_lea.vmem %s2611_s18, 256  ;;  %p2613_p1 = scmp.lt.s32.totalorder %s3424_s11, %s2611_s18 }
 0x369   : > { %v2586_v42 = vpop.eup %2585  ;;  %v2320_v55 = vpack.c.bf16 %v2584_v44, %v2580_v12  ;;  %2345 = vmatpush3.bf16.msra.mxu1 %v3321_v4  ;;  %p2614_p2 = scmp.lt.s32.totalorder %s2612_s19, %s2606_s17 }
 0x36a   : > { %v2318_v58 = vpack.c.bf16 %v2586_v42, %v2582_v43  ;;  %2347 = vmatprep.subr.bf16.mxu1 %v3324_v8 }
 0x36b   : > { %p2615_p3 = por %p2614_p2, %p2613_p1 }
 0x36c   : > { %2319 = vmatprep.subr.bf16.mxu0 %v2318_v58  ;;  %v2588_v19 = vpop.eup %2587 }
 0x36d   : > { %2321 = vmatpush1.bf16.xpose.msra.mxu0 %v2320_v55  ;;  %v2590_v59 = vpop.eup %2589  ;;  %2349 = vmatpush3.bf16.msra.mxu1 %v3333_v13  ;;  %p2616_p5 = pnand %p2615_p3, %p2609_p0 }
 0x370   : > { %v2592_v14 = vpop.eup %2591 }
 0x371   : > { %v2594_v61 = vpop.eup %2593  ;;  %v2324_v15 = vpack.c.bf16 %v2592_v14, %v2588_v19  ;;  %v1642_v14 = vld [vmem:[%s3474_s5 + $0xe8] sm:$0xff] }
 0x372   : > { %v2322_v60 = vpack.c.bf16 %v2594_v61, %v2590_v59  ;;  %v1641_v59 = vld [vmem:[%s3474_s5 + $0xe0] sm:$0xff] }
 0x373   : > { %v1625_v61 = vld [vmem:[%s3474_s5 + $0x60] sm:$0xff] }
 0x374   : > { %2323 = vmatprep.subr.bf16.mxu0 %v2322_v60  ;;  %v1626_v60 = vld [vmem:[%s3474_s5 + $0x68] sm:$0xff] }
 0x375   : > { %2325 = vmatpush1.bf16.xpose.msra.mxu0 %v2324_v15  ;;  %v2350_v15 = vpack.c.bf16 %v1642_v14, %v1641_v59  ;;  %v2352_v46 = vpack.c.bf16 %v1626_v60, %v1625_v61 }
 0x377   : > { %2351 = vmatprep.subr.bf16.mxu1 %v2350_v15 }
 0x378   : > { %2353 = vmatpush3.bf16.msra.mxu1 %v2352_v46 }
 0x379   : > { %2355 = vmatprep.subr.bf16.mxu1 %v2354_v35 }
 0x37c   : > { %1574 = vmatmul.mubr.f32.vlgmr.msra.gmra.mrb[66].mxu0 %v1503_v47  ;;  %v1627_v47 = vld [vmem:[%s3474_s5 + $0x70] sm:$0xff] }
 0x37d   : > { %v2356_v17 = vpack.c.bf16 %v1628_v24, %v1627_v47 }
 0x37f   : > { %2357 = vmatpush3.bf16.msra.mxu1 %v2356_v17 }
 0x380   : > { %2360 = vmatprep.subr.msk.bf16.mxu1 %vm3367_vm4, %v3238_v52 }
 0x44f   : > { %v1575_v9 = vpop.f32.mrb[66].mxu0 }
 0x450   : > { %2595 = vrcp.f32 %v1575_v9  ;;  %v1577_v48 = vpop.f32.mrb[67].mxu0 }
 0x451   : > { %2597 = vrcp.f32 %v1577_v48 }
 0x45a   : > { %v2596_v49 = vpop.eup %2595 }
 0x45b   : > { %v2598_v30 = vpop.eup %2597  ;;  %v1585_v56 = vrot.slane %v2596_v49, %v1584_v32 }
 0x45c   : > { %v1589_v57 = vrot.slane %v2598_v30, %v1584_v32 }
 0x45d   : > { %v1590_v12 = vmul.f32 %v1585_v56, %v1575_v9 }
 0x45e   : > { %v1591_v43 = vmul.f32 %v1589_v57, %v1577_v48 }
 0x45f   : > { %v1600_v44 = vadd.f32 %v2605_v1, %v1590_v12 }
 0x460   : > { %v1601_v42 = vadd.f32 %v1598_v11, %v1591_v43 }
 0x461   : > { %v1602_v55 = vsel %vm294_vm1, %v1600_v44, -inf }
 0x462   : > { %v1603_v58 = vsel %vm294_vm1, %v1601_v42, -inf }
 0x463   : > { %v1604_v19 = vmax.f32 %v1602_v55, %v1603_v58 }
 0x465   : > { %1605 = vmax.xlane.f32.xlu1 %v1604_v19 }
 0x4f2   : > { %v1606_v62 = vpop.xlane.xlu1 %1605 }
 0x4f3   : > { %v1607_v63 = vsub.f32 %v1600_v44, %v1606_v62  ;;  %v1608_v25 = vsub.f32 %v1601_v42, %v1606_v62 }
 0x4f5   : > { %v1609_v21 = vmul.f32 1.442695, %v1607_v63  ;;  %v1611_v37 = vmul.f32 1.442695, %v1608_v25 }
 0x4f7   : > { %2599 = vpow2.f32 %v1609_v21 }
 0x4f8   : > { %2601 = vpow2.f32 %v1611_v37 }
 0x501   : > { %v2600_v38 = vpop.eup %2599 }
 0x502   : > { %v2602_v2 = vpop.eup %2601 }
 0x503   : > { %1709 = vmatprep.mubr.f32.mxu1 %v2602_v2 }
 0x504   : > { %1710 = vmatmul.mubr.f32.vlgmr.msra.gmra.mrb[32].mxu1 %v2600_v38 }
 0x505   : > { %2363 = vmatpush3.bf16.xpose.msk.msra.mxu1 %vm3367_vm4, %v3249_v20 }
 0x506   : > { %2366 = vmatprep.subr.msk.bf16.mxu1 %vm3367_vm4, %v3251_v26 }
 0x50d   : > { %2369 = vmatpush3.bf16.xpose.msk.msra.mxu1 %vm3367_vm4, %v3267_v33 }
 0x50e   : > { %2372 = vmatprep.subr.msk.bf16.mxu1 %vm3367_vm4, %v3270_v3 }
 0x515   : > { %2375 = vmatpush3.bf16.xpose.msk.msra.mxu1 %vm3367_vm4, %v3285_v7 }
 0x516   : > { %2378 = vmatprep.subr.msk.bf16.mxu1 %vm3367_vm4, %v3288_v28 }
 0x51d   : > { %2381 = vmatpush3.bf16.xpose.msk.msra.mxu1 %vm3367_vm4, %v3303_v0 }
 0x51e   : > { %2384 = vmatprep.subr.msk.bf16.mxu1 %vm3367_vm4, %v3306_v5 }
 0x525   : > { %2387 = vmatpush3.bf16.xpose.msk.msra.mxu1 %vm3367_vm4, %v3321_v4 }
 0x526   : > { %2390 = vmatprep.subr.msk.bf16.mxu1 %vm3367_vm4, %v3324_v8 }
 0x52d   : > { %2393 = vmatpush3.bf16.xpose.msk.msra.mxu1 %vm3367_vm4, %v3333_v13 }
 0x52e   : > { %2396 = vmatprep.subr.msk.bf16.mxu1 %vm3367_vm4, %v2350_v15 }
 0x535   : > { %2399 = vmatpush3.bf16.xpose.msk.msra.mxu1 %vm3367_vm4, %v2352_v46 }
 0x536   : > { %2402 = vmatprep.subr.msk.bf16.mxu1 %vm3367_vm4, %v2354_v35 }
 0x53d   : > { %2405 = vmatpush3.bf16.xpose.msk.msra.mxu1 %vm3367_vm4, %v2356_v17 }
 0x5d7   : > { %v2175_v52 = vpop.f32.mrb[32].mxu1 }
 0x5d8   : > { %v2176_v20 = vpop.f32.mrb[33].mxu1 }
 0x5d9   : > { %v2177_v26 = vadd.f32 %v2176_v20, %v2175_v52 }
 0x5db   : > { %2603 = vrcp.f32 %v2177_v26 }
 0x5e5   : > { %v2604_v33 = vpop.eup %2603 }
 0x5e6   : > { %2210 = vmatprep.mubr.msk.f32.mxu1 %vm1716_vm3, %v2604_v33 }
 0x5e7   : > { %2211 = vmatmul.mubr.msk.f32.vlgmr.msra.gmra.mrb[34].mxu1 %vm1716_vm3, %v2604_v33 }
 0x6ba   : > { %v1882_v3 = vpop.f32.mrb[34].mxu1 }
 0x6bb   : > { %v1887_v50 = vmul.f32 %v2600_v38, %v1882_v3  ;;  %v1884_v51 = vpop.f32.mrb[35].mxu1 }
 0x6bc   : > { %v1888_v22 = vmul.f32 %v2602_v2, %v1884_v51 }
 0x6be   : > { %v1891_v23 = vcombine.low %v1887_v50, %v1888_v22 }
 0x6c0   : > { %1893 = vst [vmem:[%s267_s8] sm:$0xff] %v1891_v23 }
 0x6c1   : > { %2619 = shalt.err (!%p2616_p5)
}
 0x6c2   : > { %s2620_s20 = scalar_lea.hbm %s3422_s14, 128  ;;  %s2624_s30 = scalar_lea.hbm %s3475_s6, 256 }
 0x6c3   : > { %p2621_p6 = scmp.ne.s32.totalorder %s3422_s14, %s2620_s20  ;;  %p2625_p10 = scmp.lt.u32.totalorder %s3422_s14, %s3475_s6 }
 0x6c4   : > { %p2626_p11 = scmp.lt.u32.totalorder %s2624_s30, %s2620_s20  ;;  %p2628_p13 = scmp.lt.u32.totalorder %s2620_s20, %s3422_s14 }
 0x6c5   : > { %p2622_p7 = pnand %p2621_p6, %p2765_p4 }
 0x6c6   : > { %p2627_p12 = por %p2626_p11, %p2625_p10 }
 0x6c7   : > { %p2623_p9 = pneg %p2622_p7 }
 0x6c8   : > { %p2629_p0 = por %p2628_p13, %p2627_p12 }
 0x6ca   : > { %p2630_p1 = pnand %p2629_p0, %p2623_p9 }
 0x6cc   : > { %2633 = shalt.err (!%p2630_p1)
}
 0x6cd   : > { %2406 = dma.vmem_to_hbm [thread:$0]  (%p2765_p4), %s3424_s11, 128, %s3422_s14, %s1895_s16  }
 0x6ce PF: > { %p2412_p2 = scmp.ge.s32.totalorder %s2684_s26, 2  ;;  %s1924_s12 = sand.u32 1, %s2664_s21  }
 0x6cf   : > { %s1925_s13 = scalar_lea.sflag [#allocation5], %s1924_s12 }
 0x6d0   : > { %p2409_p3 = pnand %p2412_p2, %p2772_p8 }
 0x6d2   : > { %2659 = dma.done.wait (!%p2409_p3), %s1925_s13, 128  }
 0x6d3   : > { %2661 = vsyncadd (!%p2409_p3), %s1925_s13, 4294967168  ;;  %s19_s26 = sadd.s32 1, %s2684_s26   ;;  %s3521_s21 = smov %s2668_s22 }
 0x6d4   : > { %p16_p5 = scmp.ge.s32.totalorder %s19_s26, 4   ;;  %s3522_s22 = smov %s2672_s23 }
 0x6d5   : > { %s3523_s23 = smov %s2778_s10  ;;  %s3524_s24 = smov %s2680_s25 }
 0x6d6   : > { %s3525_s25 = smov %s3527_s29  ;;  %18 = sbr.rel (!%p16_p5) target bundleno = 4 (0x4), region = 86 }
 0x6dd   :  { %1930 = vsyncpa [#allocation5], 1 }
 0x6de   :  { %1932 = vsyncpa [#allocation5 + $0x1], 1 }

</bundles_post_ra>
